<compile_context>
chip_gen: v6e
topology: v6e:2x2x1
jax: 0.10.0
libtpu: 0.0.40
codegen_flags: <defaults>
</compile_context>

<pallas_src>
import jax
import jax.numpy as jnp
from jax.experimental import pallas as pl
from jax.experimental.pallas import tpu as pltpu

NOISE_DIM = 32
IMAGE_SIZE = 16
BATCH = 8
BN_EPS = 1e-5
LEAKY_SLOPE = 0.2
_K_PAD = 128  # pad the 32-wide noise dim up to one full lane width

# Packed layout for all small per-feature vectors (biases + BN gamma/beta).
# Every offset is a multiple of 128 so in-kernel static slices are lane-aligned.
_VEC_LAYOUT = (
    ("b1", 128),
    ("b2", 256), ("g2", 256), ("be2", 256),
    ("b3", 512), ("g3", 512), ("be3", 512),
    ("b4", 1024), ("g4", 1024), ("be4", 1024),
    ("b5", IMAGE_SIZE ** 2),
)
_VEC_OFFSETS = {}
_off = 0
for _name, _n in _VEC_LAYOUT:
    _VEC_OFFSETS[_name] = (_off, _n)
    _off += _n
_VEC_TOTAL = _off  # 5760 = 45 * 128


def _leaky_relu(h):
    return jnp.where(h >= 0, h, LEAKY_SLOPE * h)


def _bn_leaky(h, gamma, beta):
    # Training-mode BatchNorm1d folded into a single scale/shift (one pass over h).
    mean = jnp.mean(h, axis=0, keepdims=True)
    var = jnp.mean(h * h, axis=0, keepdims=True) - mean * mean
    scale = gamma * jax.lax.rsqrt(var + BN_EPS)
    shift = beta - mean * scale
    return _leaky_relu(h * scale + shift)


def _dot(h, w):
    # bf16 x bf16 on the MXU, f32 accumulation; activations stay f32 elsewhere.
    return jnp.dot(h.astype(jnp.bfloat16), w.astype(jnp.bfloat16),
                   preferred_element_type=jnp.float32)


def generator_kernel(x_ref, w1_ref, w2_ref, w3_hbm, w4_hbm, w5_hbm, vec_ref,
                     out_ref, w3_vmem, w4_vmem, w5_vmem, sem):
    # Start streaming the large layer-3/4/5 weights (HBM -> VMEM) immediately so
    # the DMAs overlap with the layer-1/2 compute.
    cp3 = pltpu.make_async_copy(w3_hbm, w3_vmem, sem.at[0])
    cp4 = pltpu.make_async_copy(w4_hbm, w4_vmem, sem.at[1])
    cp5 = pltpu.make_async_copy(w5_hbm, w5_vmem, sem.at[2])
    cp3.start()
    cp4.start()
    cp5.start()

    def vec(name):
        start, size = _VEC_OFFSETS[name]
        return vec_ref[:, start:start + size]  # (1, size) f32, lane-aligned

    # block(noise_dim, 128, norm=False)   (x / w1 pre-padded K: 32 -> 128)
    h = _leaky_relu(_dot(x_ref[...], w1_ref[...]) + vec("b1"))

    # block(128, 256)
    h = _bn_leaky(_dot(h, w2_ref[...]) + vec("b2"), vec("g2"), vec("be2"))

    # block(256, 512)
    cp3.wait()
    h = _bn_leaky(_dot(h, w3_vmem[...]) + vec("b3"), vec("g3"), vec("be3"))

    # block(512, 1024)
    cp4.wait()
    h = _bn_leaky(_dot(h, w4_vmem[...]) + vec("b4"), vec("g4"), vec("be4"))

    # Linear(1024, image_size**2) + Tanh
    cp5.wait()
    out_ref[...] = jnp.tanh(_dot(h, w5_vmem[...]) + vec("b5"))


def prepare_params(params):
    """One-time preprocessing (outside the hot path): bf16 weights, padded w1,
    and all biases / BN-affine vectors packed into one (1, 5760) f32 array."""
    return {
        "w1": jnp.pad(params["w1"].astype(jnp.bfloat16),
                      ((0, _K_PAD - NOISE_DIM), (0, 0))),
        "w2": params["w2"].astype(jnp.bfloat16),
        "w3": params["w3"].astype(jnp.bfloat16),
        "w4": params["w4"].astype(jnp.bfloat16),
        "w5": params["w5"].astype(jnp.bfloat16),
        "vec": jnp.concatenate(
            [params[name].reshape(1, size).astype(jnp.float32)
             for name, size in _VEC_LAYOUT],
            axis=1,
        ),
    }


@jax.jit
def generator_forward(x, prep):
    """x: (B, NOISE_DIM) f32, prep: output of prepare_params -> (B, IMAGE_SIZE**2) f32."""
    B = x.shape[0]
    x_pad = jnp.pad(x.astype(jnp.bfloat16), ((0, 0), (0, _K_PAD - NOISE_DIM)))

    vmem = pl.BlockSpec(memory_space=pltpu.MemorySpace.VMEM)
    hbm = pl.BlockSpec(memory_space=pl.ANY)
    return pl.pallas_call(
        generator_kernel,
        out_shape=jax.ShapeDtypeStruct((B, IMAGE_SIZE ** 2), jnp.float32),
        in_specs=[vmem, vmem, vmem, hbm, hbm, hbm, vmem],
        out_specs=vmem,
        scratch_shapes=[
            pltpu.VMEM((256, 512), jnp.bfloat16),    # w3 staging
            pltpu.VMEM((512, 1024), jnp.bfloat16),   # w4 staging
            pltpu.VMEM((1024, IMAGE_SIZE ** 2), jnp.bfloat16),  # w5 staging
            pltpu.SemaphoreType.DMA((3,)),
        ],
        compiler_params=pltpu.CompilerParams(vmem_limit_bytes=16 << 20),
    )(x_pad, prep["w1"], prep["w2"], prep["w3"], prep["w4"], prep["w5"], prep["vec"])


def init_params(key):
    """Deterministic synthetic f32 parameters (PyTorch-like uniform fan-in init)."""
    dims = [NOISE_DIM, 128, 256, 512, 1024, IMAGE_SIZE ** 2]
    params = {}
    for i in range(5):
        fan_in, fan_out = dims[i], dims[i + 1]
        key, kw, kb = jax.random.split(key, 3)
        bound = 1.0 / jnp.sqrt(fan_in)
        params[f"w{i + 1}"] = jax.random.uniform(
            kw, (fan_in, fan_out), jnp.float32, -bound, bound)
        params[f"b{i + 1}"] = jax.random.uniform(
            kb, (1, fan_out), jnp.float32, -bound, bound)
    for i, d in zip((2, 3, 4), (256, 512, 1024)):
        params[f"g{i}"] = jnp.ones((1, d), jnp.float32)
        params[f"be{i}"] = jnp.zeros((1, d), jnp.float32)
    return params


def _reference_forward(x, p):
    """Pure-JAX reference using the same bf16 weight quantization / bf16 MXU inputs."""
    h = _leaky_relu(_dot(x, p["w1"]) + p["b1"])
    h = _bn_leaky(_dot(h, p["w2"]) + p["b2"], p["g2"], p["be2"])
    h = _bn_leaky(_dot(h, p["w3"]) + p["b3"], p["g3"], p["be3"])
    h = _bn_leaky(_dot(h, p["w4"]) + p["b4"], p["g4"], p["be4"])
    return jnp.tanh(_dot(h, p["w5"]) + p["b5"])


if __name__ == "__main__":
    key = jax.random.PRNGKey(0)
    key, kx = jax.random.split(key)
    x = jax.random.normal(kx, (BATCH, NOISE_DIM), jnp.float32)
    params = init_params(key)
    prep = prepare_params(params)

    out = generator_forward(x, prep)
    out = jax.block_until_ready(out)

    ref = _reference_forward(x, params)
    assert out.shape == (BATCH, IMAGE_SIZE ** 2), out.shape
    max_err = float(jnp.max(jnp.abs(out - ref)))
    assert jnp.allclose(out, ref, atol=1e-3, rtol=1e-3), max_err
    print("KERNEL_OK")
</pallas_src>

<mosaic_0001>
module attributes {stable_mosaic.version = 11 : i64} {
  func.func @generator_kernel(%arg0: memref<8x128xbf16, #tpu.memory_space<vmem>>, %arg1: memref<128x128xbf16, #tpu.memory_space<vmem>>, %arg2: memref<128x256xbf16, #tpu.memory_space<vmem>>, %arg3: memref<256x512xbf16, #tpu.memory_space<any>>, %arg4: memref<512x1024xbf16, #tpu.memory_space<any>>, %arg5: memref<1024x256xbf16, #tpu.memory_space<any>>, %arg6: memref<1x5760xf32, #tpu.memory_space<vmem>>, %arg7: memref<8x256xf32, #tpu.memory_space<vmem>>, %arg8: memref<256x512xbf16, #tpu.memory_space<vmem>>, %arg9: memref<512x1024xbf16, #tpu.memory_space<vmem>>, %arg10: memref<1024x256xbf16, #tpu.memory_space<vmem>>, %arg11: memref<3x!tpu.dma_semaphore, #tpu.memory_space<semaphore_mem>>) attributes {dimension_semantics = [], scalar_prefetch = 0 : i64, scratch_operands = 4 : i64, tpu.core_type = #tpu.core_type<tc>} {
    %c0_i32 = arith.constant 0 : i32
    %0 = tpu.memref_slice %arg11[%c0_i32] : memref<3x!tpu.dma_semaphore, #tpu.memory_space<semaphore_mem>> -> memref<1x!tpu.dma_semaphore, #tpu.memory_space<semaphore_mem>>
    %1 = tpu.memref_squeeze %0 : memref<1x!tpu.dma_semaphore, #tpu.memory_space<semaphore_mem>> -> memref<!tpu.dma_semaphore, #tpu.memory_space<semaphore_mem>>
    tpu.enqueue_dma source(%arg3 : memref<256x512xbf16, #tpu.memory_space<any>>) target(%arg8 : memref<256x512xbf16, #tpu.memory_space<vmem>>) target_semaphore(%1 : memref<!tpu.dma_semaphore, #tpu.memory_space<semaphore_mem>>)
    %c1_i32 = arith.constant 1 : i32
    %2 = tpu.memref_slice %arg11[%c1_i32] : memref<3x!tpu.dma_semaphore, #tpu.memory_space<semaphore_mem>> -> memref<1x!tpu.dma_semaphore, #tpu.memory_space<semaphore_mem>>
    %3 = tpu.memref_squeeze %2 : memref<1x!tpu.dma_semaphore, #tpu.memory_space<semaphore_mem>> -> memref<!tpu.dma_semaphore, #tpu.memory_space<semaphore_mem>>
    tpu.enqueue_dma source(%arg4 : memref<512x1024xbf16, #tpu.memory_space<any>>) target(%arg9 : memref<512x1024xbf16, #tpu.memory_space<vmem>>) target_semaphore(%3 : memref<!tpu.dma_semaphore, #tpu.memory_space<semaphore_mem>>)
    %c2_i32 = arith.constant 2 : i32
    %4 = tpu.memref_slice %arg11[%c2_i32] : memref<3x!tpu.dma_semaphore, #tpu.memory_space<semaphore_mem>> -> memref<1x!tpu.dma_semaphore, #tpu.memory_space<semaphore_mem>>
    %5 = tpu.memref_squeeze %4 : memref<1x!tpu.dma_semaphore, #tpu.memory_space<semaphore_mem>> -> memref<!tpu.dma_semaphore, #tpu.memory_space<semaphore_mem>>
    tpu.enqueue_dma source(%arg5 : memref<1024x256xbf16, #tpu.memory_space<any>>) target(%arg10 : memref<1024x256xbf16, #tpu.memory_space<vmem>>) target_semaphore(%5 : memref<!tpu.dma_semaphore, #tpu.memory_space<semaphore_mem>>)
    %c0 = arith.constant 0 : index
    %c0_0 = arith.constant 0 : index
    %6 = vector.load %arg0[%c0, %c0_0] : memref<8x128xbf16, #tpu.memory_space<vmem>>, vector<8x128xbf16>
    %c0_1 = arith.constant 0 : index
    %c0_2 = arith.constant 0 : index
    %7 = vector.load %arg1[%c0_1, %c0_2] : memref<128x128xbf16, #tpu.memory_space<vmem>>, vector<128x128xbf16>
    %cst = arith.constant dense<0.000000e+00> : vector<8x128xf32>
    %8 = tpu.matmul %6, %7, %cst {dimension_numbers = #tpu.dot_dimension_numbers<[1], [0], [0], [1], [0, 0, 1, 1], [], []>} : vector<8x128xbf16>, vector<128x128xbf16>, vector<8x128xf32> -> vector<8x128xf32>
    %c0_3 = arith.constant 0 : index
    %c0_4 = arith.constant 0 : index
    %9 = vector.load %arg6[%c0_3, %c0_4] : memref<1x5760xf32, #tpu.memory_space<vmem>>, vector<1x128xf32>
    %10 = vector.broadcast %9 : vector<1x128xf32> to vector<8x128xf32>
    %11 = arith.addf %8, %10 : vector<8x128xf32>
    %cst_5 = arith.constant 0.000000e+00 : f32
    %12 = vector.broadcast %cst_5 : f32 to vector<8x128xf32>
    %13 = arith.cmpf oge, %11, %12 : vector<8x128xf32>
    %cst_6 = arith.constant 2.000000e-01 : f32
    %14 = vector.broadcast %cst_6 : f32 to vector<8x128xf32>
    %15 = arith.mulf %14, %11 : vector<8x128xf32>
    %16 = arith.select %13, %11, %15 : vector<8x128xi1>, vector<8x128xf32>
    %c0_7 = arith.constant 0 : index
    %c0_8 = arith.constant 0 : index
    %17 = vector.load %arg2[%c0_7, %c0_8] : memref<128x256xbf16, #tpu.memory_space<vmem>>, vector<128x256xbf16>
    %18 = arith.truncf %16 : vector<8x128xf32> to vector<8x128xbf16>
    %cst_9 = arith.constant dense<0.000000e+00> : vector<8x256xf32>
    %19 = tpu.matmul %18, %17, %cst_9 {dimension_numbers = #tpu.dot_dimension_numbers<[1], [0], [0], [1], [0, 0, 1, 1], [], []>} : vector<8x128xbf16>, vector<128x256xbf16>, vector<8x256xf32> -> vector<8x256xf32>
    %c0_10 = arith.constant 0 : index
    %c128 = arith.constant 128 : index
    %20 = vector.load %arg6[%c0_10, %c128] : memref<1x5760xf32, #tpu.memory_space<vmem>>, vector<1x256xf32>
    %21 = vector.broadcast %20 : vector<1x256xf32> to vector<8x256xf32>
    %22 = arith.addf %19, %21 : vector<8x256xf32>
    %c0_11 = arith.constant 0 : index
    %c384 = arith.constant 384 : index
    %23 = vector.load %arg6[%c0_11, %c384] : memref<1x5760xf32, #tpu.memory_space<vmem>>, vector<1x256xf32>
    %c0_12 = arith.constant 0 : index
    %c640 = arith.constant 640 : index
    %24 = vector.load %arg6[%c0_12, %c640] : memref<1x5760xf32, #tpu.memory_space<vmem>>, vector<1x256xf32>
    %cst_13 = arith.constant dense<0.000000e+00> : vector<256xf32>
    %25 = vector.multi_reduction <add>, %22, %cst_13 [0] : vector<8x256xf32> to vector<256xf32>
    %26 = vector.shape_cast %25 : vector<256xf32> to vector<1x256xf32>
    %cst_14 = arith.constant 8.000000e+00 : f32
    %27 = vector.broadcast %cst_14 : f32 to vector<1x256xf32>
    %28 = arith.divf %26, %27 : vector<1x256xf32>
    %29 = arith.mulf %22, %22 : vector<8x256xf32>
    %cst_15 = arith.constant dense<0.000000e+00> : vector<256xf32>
    %30 = vector.multi_reduction <add>, %29, %cst_15 [0] : vector<8x256xf32> to vector<256xf32>
    %31 = vector.shape_cast %30 : vector<256xf32> to vector<1x256xf32>
    %cst_16 = arith.constant 8.000000e+00 : f32
    %32 = vector.broadcast %cst_16 : f32 to vector<1x256xf32>
    %33 = arith.divf %31, %32 : vector<1x256xf32>
    %34 = arith.mulf %28, %28 : vector<1x256xf32>
    %35 = arith.subf %33, %34 : vector<1x256xf32>
    %cst_17 = arith.constant 9.99999974E-6 : f32
    %36 = vector.broadcast %cst_17 : f32 to vector<1x256xf32>
    %37 = arith.addf %35, %36 : vector<1x256xf32>
    %38 = math.rsqrt %37 : vector<1x256xf32>
    %39 = arith.mulf %23, %38 : vector<1x256xf32>
    %40 = arith.mulf %28, %39 : vector<1x256xf32>
    %41 = arith.subf %24, %40 : vector<1x256xf32>
    %42 = vector.broadcast %39 : vector<1x256xf32> to vector<8x256xf32>
    %43 = arith.mulf %22, %42 : vector<8x256xf32>
    %44 = vector.broadcast %41 : vector<1x256xf32> to vector<8x256xf32>
    %45 = arith.addf %43, %44 : vector<8x256xf32>
    %cst_18 = arith.constant 0.000000e+00 : f32
    %46 = vector.broadcast %cst_18 : f32 to vector<8x256xf32>
    %47 = arith.cmpf oge, %45, %46 : vector<8x256xf32>
    %cst_19 = arith.constant 2.000000e-01 : f32
    %48 = vector.broadcast %cst_19 : f32 to vector<8x256xf32>
    %49 = arith.mulf %48, %45 : vector<8x256xf32>
    %50 = arith.select %47, %45, %49 : vector<8x256xi1>, vector<8x256xf32>
    %c0_i32_20 = arith.constant 0 : i32
    %51 = tpu.memref_slice %arg11[%c0_i32_20] : memref<3x!tpu.dma_semaphore, #tpu.memory_space<semaphore_mem>> -> memref<1x!tpu.dma_semaphore, #tpu.memory_space<semaphore_mem>>
    %52 = tpu.memref_squeeze %51 : memref<1x!tpu.dma_semaphore, #tpu.memory_space<semaphore_mem>> -> memref<!tpu.dma_semaphore, #tpu.memory_space<semaphore_mem>>
    tpu.wait_dma2 semaphore(%52 : memref<!tpu.dma_semaphore, #tpu.memory_space<semaphore_mem>>) src(%arg3 : memref<256x512xbf16, #tpu.memory_space<any>>) dst(%arg8 : memref<256x512xbf16, #tpu.memory_space<vmem>>)
    %c0_21 = arith.constant 0 : index
    %c0_22 = arith.constant 0 : index
    %53 = vector.load %arg8[%c0_21, %c0_22] : memref<256x512xbf16, #tpu.memory_space<vmem>>, vector<256x512xbf16>
    %54 = arith.truncf %50 : vector<8x256xf32> to vector<8x256xbf16>
    %cst_23 = arith.constant dense<0.000000e+00> : vector<8x512xf32>
    %55 = tpu.matmul %54, %53, %cst_23 {dimension_numbers = #tpu.dot_dimension_numbers<[1], [0], [0], [1], [0, 0, 1, 1], [], []>} : vector<8x256xbf16>, vector<256x512xbf16>, vector<8x512xf32> -> vector<8x512xf32>
    %c0_24 = arith.constant 0 : index
    %c896 = arith.constant 896 : index
    %56 = vector.load %arg6[%c0_24, %c896] : memref<1x5760xf32, #tpu.memory_space<vmem>>, vector<1x512xf32>
    %57 = vector.broadcast %56 : vector<1x512xf32> to vector<8x512xf32>
    %58 = arith.addf %55, %57 : vector<8x512xf32>
    %c0_25 = arith.constant 0 : index
    %c1408 = arith.constant 1408 : index
    %59 = vector.load %arg6[%c0_25, %c1408] : memref<1x5760xf32, #tpu.memory_space<vmem>>, vector<1x512xf32>
    %c0_26 = arith.constant 0 : index
    %c1920 = arith.constant 1920 : index
    %60 = vector.load %arg6[%c0_26, %c1920] : memref<1x5760xf32, #tpu.memory_space<vmem>>, vector<1x512xf32>
    %cst_27 = arith.constant dense<0.000000e+00> : vector<512xf32>
    %61 = vector.multi_reduction <add>, %58, %cst_27 [0] : vector<8x512xf32> to vector<512xf32>
    %62 = vector.shape_cast %61 : vector<512xf32> to vector<1x512xf32>
    %cst_28 = arith.constant 8.000000e+00 : f32
    %63 = vector.broadcast %cst_28 : f32 to vector<1x512xf32>
    %64 = arith.divf %62, %63 : vector<1x512xf32>
    %65 = arith.mulf %58, %58 : vector<8x512xf32>
    %cst_29 = arith.constant dense<0.000000e+00> : vector<512xf32>
    %66 = vector.multi_reduction <add>, %65, %cst_29 [0] : vector<8x512xf32> to vector<512xf32>
    %67 = vector.shape_cast %66 : vector<512xf32> to vector<1x512xf32>
    %cst_30 = arith.constant 8.000000e+00 : f32
    %68 = vector.broadcast %cst_30 : f32 to vector<1x512xf32>
    %69 = arith.divf %67, %68 : vector<1x512xf32>
    %70 = arith.mulf %64, %64 : vector<1x512xf32>
    %71 = arith.subf %69, %70 : vector<1x512xf32>
    %cst_31 = arith.constant 9.99999974E-6 : f32
    %72 = vector.broadcast %cst_31 : f32 to vector<1x512xf32>
    %73 = arith.addf %71, %72 : vector<1x512xf32>
    %74 = math.rsqrt %73 : vector<1x512xf32>
    %75 = arith.mulf %59, %74 : vector<1x512xf32>
    %76 = arith.mulf %64, %75 : vector<1x512xf32>
    %77 = arith.subf %60, %76 : vector<1x512xf32>
    %78 = vector.broadcast %75 : vector<1x512xf32> to vector<8x512xf32>
    %79 = arith.mulf %58, %78 : vector<8x512xf32>
    %80 = vector.broadcast %77 : vector<1x512xf32> to vector<8x512xf32>
    %81 = arith.addf %79, %80 : vector<8x512xf32>
    %cst_32 = arith.constant 0.000000e+00 : f32
    %82 = vector.broadcast %cst_32 : f32 to vector<8x512xf32>
    %83 = arith.cmpf oge, %81, %82 : vector<8x512xf32>
    %cst_33 = arith.constant 2.000000e-01 : f32
    %84 = vector.broadcast %cst_33 : f32 to vector<8x512xf32>
    %85 = arith.mulf %84, %81 : vector<8x512xf32>
    %86 = arith.select %83, %81, %85 : vector<8x512xi1>, vector<8x512xf32>
    %c1_i32_34 = arith.constant 1 : i32
    %87 = tpu.memref_slice %arg11[%c1_i32_34] : memref<3x!tpu.dma_semaphore, #tpu.memory_space<semaphore_mem>> -> memref<1x!tpu.dma_semaphore, #tpu.memory_space<semaphore_mem>>
    %88 = tpu.memref_squeeze %87 : memref<1x!tpu.dma_semaphore, #tpu.memory_space<semaphore_mem>> -> memref<!tpu.dma_semaphore, #tpu.memory_space<semaphore_mem>>
    tpu.wait_dma2 semaphore(%88 : memref<!tpu.dma_semaphore, #tpu.memory_space<semaphore_mem>>) src(%arg4 : memref<512x1024xbf16, #tpu.memory_space<any>>) dst(%arg9 : memref<512x1024xbf16, #tpu.memory_space<vmem>>)
    %c0_35 = arith.constant 0 : index
    %c0_36 = arith.constant 0 : index
    %89 = vector.load %arg9[%c0_35, %c0_36] : memref<512x1024xbf16, #tpu.memory_space<vmem>>, vector<512x1024xbf16>
    %90 = arith.truncf %86 : vector<8x512xf32> to vector<8x512xbf16>
    %cst_37 = arith.constant dense<0.000000e+00> : vector<8x1024xf32>
    %91 = tpu.matmul %90, %89, %cst_37 {dimension_numbers = #tpu.dot_dimension_numbers<[1], [0], [0], [1], [0, 0, 1, 1], [], []>} : vector<8x512xbf16>, vector<512x1024xbf16>, vector<8x1024xf32> -> vector<8x1024xf32>
    %c0_38 = arith.constant 0 : index
    %c2432 = arith.constant 2432 : index
    %92 = vector.load %arg6[%c0_38, %c2432] : memref<1x5760xf32, #tpu.memory_space<vmem>>, vector<1x1024xf32>
    %93 = vector.broadcast %92 : vector<1x1024xf32> to vector<8x1024xf32>
    %94 = arith.addf %91, %93 : vector<8x1024xf32>
    %c0_39 = arith.constant 0 : index
    %c3456 = arith.constant 3456 : index
    %95 = vector.load %arg6[%c0_39, %c3456] : memref<1x5760xf32, #tpu.memory_space<vmem>>, vector<1x1024xf32>
    %c0_40 = arith.constant 0 : index
    %c4480 = arith.constant 4480 : index
    %96 = vector.load %arg6[%c0_40, %c4480] : memref<1x5760xf32, #tpu.memory_space<vmem>>, vector<1x1024xf32>
    %cst_41 = arith.constant dense<0.000000e+00> : vector<1024xf32>
    %97 = vector.multi_reduction <add>, %94, %cst_41 [0] : vector<8x1024xf32> to vector<1024xf32>
    %98 = vector.shape_cast %97 : vector<1024xf32> to vector<1x1024xf32>
    %cst_42 = arith.constant 8.000000e+00 : f32
    %99 = vector.broadcast %cst_42 : f32 to vector<1x1024xf32>
    %100 = arith.divf %98, %99 : vector<1x1024xf32>
    %101 = arith.mulf %94, %94 : vector<8x1024xf32>
    %cst_43 = arith.constant dense<0.000000e+00> : vector<1024xf32>
    %102 = vector.multi_reduction <add>, %101, %cst_43 [0] : vector<8x1024xf32> to vector<1024xf32>
    %103 = vector.shape_cast %102 : vector<1024xf32> to vector<1x1024xf32>
    %cst_44 = arith.constant 8.000000e+00 : f32
    %104 = vector.broadcast %cst_44 : f32 to vector<1x1024xf32>
    %105 = arith.divf %103, %104 : vector<1x1024xf32>
    %106 = arith.mulf %100, %100 : vector<1x1024xf32>
    %107 = arith.subf %105, %106 : vector<1x1024xf32>
    %cst_45 = arith.constant 9.99999974E-6 : f32
    %108 = vector.broadcast %cst_45 : f32 to vector<1x1024xf32>
    %109 = arith.addf %107, %108 : vector<1x1024xf32>
    %110 = math.rsqrt %109 : vector<1x1024xf32>
    %111 = arith.mulf %95, %110 : vector<1x1024xf32>
    %112 = arith.mulf %100, %111 : vector<1x1024xf32>
    %113 = arith.subf %96, %112 : vector<1x1024xf32>
    %114 = vector.broadcast %111 : vector<1x1024xf32> to vector<8x1024xf32>
    %115 = arith.mulf %94, %114 : vector<8x1024xf32>
    %116 = vector.broadcast %113 : vector<1x1024xf32> to vector<8x1024xf32>
    %117 = arith.addf %115, %116 : vector<8x1024xf32>
    %cst_46 = arith.constant 0.000000e+00 : f32
    %118 = vector.broadcast %cst_46 : f32 to vector<8x1024xf32>
    %119 = arith.cmpf oge, %117, %118 : vector<8x1024xf32>
    %cst_47 = arith.constant 2.000000e-01 : f32
    %120 = vector.broadcast %cst_47 : f32 to vector<8x1024xf32>
    %121 = arith.mulf %120, %117 : vector<8x1024xf32>
    %122 = arith.select %119, %117, %121 : vector<8x1024xi1>, vector<8x1024xf32>
    %c2_i32_48 = arith.constant 2 : i32
    %123 = tpu.memref_slice %arg11[%c2_i32_48] : memref<3x!tpu.dma_semaphore, #tpu.memory_space<semaphore_mem>> -> memref<1x!tpu.dma_semaphore, #tpu.memory_space<semaphore_mem>>
    %124 = tpu.memref_squeeze %123 : memref<1x!tpu.dma_semaphore, #tpu.memory_space<semaphore_mem>> -> memref<!tpu.dma_semaphore, #tpu.memory_space<semaphore_mem>>
    tpu.wait_dma2 semaphore(%124 : memref<!tpu.dma_semaphore, #tpu.memory_space<semaphore_mem>>) src(%arg5 : memref<1024x256xbf16, #tpu.memory_space<any>>) dst(%arg10 : memref<1024x256xbf16, #tpu.memory_space<vmem>>)
    %c0_49 = arith.constant 0 : index
    %c0_50 = arith.constant 0 : index
    %125 = vector.load %arg10[%c0_49, %c0_50] : memref<1024x256xbf16, #tpu.memory_space<vmem>>, vector<1024x256xbf16>
    %126 = arith.truncf %122 : vector<8x1024xf32> to vector<8x1024xbf16>
    %cst_51 = arith.constant dense<0.000000e+00> : vector<8x256xf32>
    %127 = tpu.matmul %126, %125, %cst_51 {dimension_numbers = #tpu.dot_dimension_numbers<[1], [0], [0], [1], [0, 0, 1, 1], [], []>} : vector<8x1024xbf16>, vector<1024x256xbf16>, vector<8x256xf32> -> vector<8x256xf32>
    %c0_52 = arith.constant 0 : index
    %c5504 = arith.constant 5504 : index
    %128 = vector.load %arg6[%c0_52, %c5504] : memref<1x5760xf32, #tpu.memory_space<vmem>>, vector<1x256xf32>
    %129 = vector.broadcast %128 : vector<1x256xf32> to vector<8x256xf32>
    %130 = arith.addf %127, %129 : vector<8x256xf32>
    %131 = math.tanh %130 : vector<8x256xf32>
    %c0_53 = arith.constant 0 : index
    %c0_54 = arith.constant 0 : index
    %132 = vector.load %arg7[%c0_53, %c0_54] : memref<8x256xf32, #tpu.memory_space<vmem>>, vector<8x256xf32>
    tpu.vector_store %arg7[%c0_53, %c0_54], %131 {strides = array<i32>} : memref<8x256xf32, #tpu.memory_space<vmem>>, vector<8x256xf32>,
    return
  }
}

</mosaic_0001>

<bundles_post_ra>
// kernel: generator_forward.1
= control target key start
LH: loop header
LB: loop body
LE: loop exit
PB: predicated region body
PF: predicated region fallthrough
CT: control target
= control target key end

     0   :  { %12 = vsyncpa [#allocation7], 0  ;;  %s5890_s0 = inlined_call_operand.vmem [shape: bf16[8,128], index: 0, kind: input, shape index: {}]   ;;  %s5891_s1 = inlined_call_operand.hbm [shape: bf16[128,128], index: 1, kind: input, shape index: {}]   ;;  %s5892_s2 = inlined_call_operand.hbm [shape: bf16[128,256], index: 2, kind: input, shape index: {}]   ;;  %s5893_s3 = inlined_call_operand.hbm [shape: bf16[256,512], index: 3, kind: input, shape index: {}]   ;;  %s5894_s4 = inlined_call_operand.hbm [shape: bf16[512,1024], index: 4, kind: input, shape index: {}]   ;;  %s5895_s5 = inlined_call_operand.hbm [shape: bf16[1024,256], index: 5, kind: input, shape index: {}]   ;;  %s5896_s6 = inlined_call_operand.hbm [shape: f32[1,5760], index: 6, kind: input, shape index: {}]   ;;  %s5897_s7 = inlined_call_operand.hbm [shape: f32[8,256], index: 7, kind: output, shape index: {}]  }
   0x1   :  { %13 = vsyncpa [#allocation10], 0 }
   0x2   :  { %14 = vsyncpa [#allocation8], 0  ;;  %s5508_s24 = smov [#allocation9]  }
   0x3   :  { %s34_s25 = sshll.u32 %s5508_s24, 4  ;;  %s35_s25 = int_to_ptr.vmem [resolvable:$true] %s34_s25 }
   0x4   :  { %s5364_s26 = scalar_lea.vmem %s35_s25, 2048  ;;  %p5369_p1 = scmp.lt.s32.totalorder %s35_s25, %s35_s25 }
   0x5   :  { %p5365_p0 = scmp.ne.s32.totalorder %s35_s25, %s5364_s26  ;;  %p5370_p2 = scmp.lt.s32.totalorder %s5364_s26, %s5364_s26 }
   0x7   :  { %p5371_p3 = por %p5370_p2, %p5369_p1 }
   0x9   :  { %p5372_p4 = pnand %p5371_p3, %p5365_p0 }
   0xb   :  { %5375 = shalt.err (!%p5372_p4)
}
   0xc   :  { %s5509_s27 = smov 128   ;;  %s5510_s28 = smov 8  }
   0xd   :  { %40 = dma.hbm_to_vmem [thread:$0]  %s5892_s2, 2048, %s35_s25, [#allocation10], %s5509_s27, %s5509_s27, %s5510_s28  }
   0xe   :  { %s5511_s8 = smov [#allocation6]  }
   0xf   :  { %s22_s9 = sshll.u32 %s5511_s8, 4  ;;  %s23_s9 = int_to_ptr.vmem [resolvable:$true] %s22_s9 }
  0x10   :  { %s5384_s10 = scalar_lea.vmem %s23_s9, 1024  ;;  %p5389_p6 = scmp.lt.s32.totalorder %s23_s9, %s23_s9 }
  0x11   :  { %p5385_p5 = scmp.ne.s32.totalorder %s23_s9, %s5384_s10  ;;  %p5390_p7 = scmp.lt.s32.totalorder %s5384_s10, %s5384_s10 }
  0x13   :  { %p5391_p8 = por %p5390_p7, %p5389_p6 }
  0x15   :  { %p5392_p9 = pnand %p5391_p8, %p5385_p5 }
  0x17   :  { %5395 = shalt.err (!%p5392_p9)
}
  0x18   :  { %s5512_s11 = smov 64   ;;  %s5513_s12 = smov 4  }
  0x19   :  { %28 = dma.hbm_to_vmem [thread:$0]  %s5891_s1, 1024, %s23_s9, [#allocation7], %s5512_s11, %s5512_s11, %s5513_s12  }
  0x1a   :  { %s5514_s15 = smov [#allocation11]  }
  0x1b   :  { %s47_s16 = sshll.u32 %s5514_s15, 4  ;;  %s48_s16 = int_to_ptr.vmem [resolvable:$true] %s47_s16 }
  0x1c   :  { %s5404_s2 = scalar_lea.vmem %s48_s16, 720  ;;  %s5408_s17 = scalar_lea.vmem %s48_s16, 736 }
  0x1d   :  { %p5405_p10 = scmp.ne.s32.totalorder %s48_s16, %s5404_s2  ;;  %p5409_p11 = scmp.lt.s32.totalorder %s48_s16, %s48_s16 }
  0x1e   :  { %p5410_p12 = scmp.lt.s32.totalorder %s5408_s17, %s5404_s2 }
  0x20   :  { %p5411_p13 = por %p5410_p12, %p5409_p11 }
  0x22   :  { %p5412_p0 = pnand %p5411_p13, %p5405_p10 }
  0x24   :  { %5415 = shalt.err (!%p5412_p0)
}
  0x25   :  { %50 = dma.hbm_to_vmem [thread:$0]  %s5896_s6, 720, %s48_s16, [#allocation10]  }
  0x26   :  { %5496 = dma.done.wait [#allocation7], 1024  }
  0x27   :  { %5497 = vsyncadd [#allocation7], 4294966272 }
  0x28   :  { %5498 = dma.done.wait [#allocation10], 2768  }
  0x29   :  { %5499 = vsyncadd [#allocation10], 4294964528  ;;  %v5515_v0 = vmov 0.0   ;;  %vm5516_vm0 = vmmov 0   ;;  %v5004_v1 = vld [vmem:[#allocation6 + $0x38] sm:$0xff]   ;;  %v5005_v2 = vld [vmem:[#allocation6 + $0x30] sm:$0xff]  }
  0x2a   :  { %4969 = vmatprep.subr.bf16.mxu0 %v5515_v0  ;;  %4985 = vmatprep.mubr.msk.bf16.mxu0 %vm5516_vm0, %v5515_v0  ;;  %v5006_v3 = vld [vmem:[#allocation6 + $0x28] sm:$0xff]   ;;  %v5012_v4 = vld [vmem:[#allocation9 + $0x74] ss:$8 sps:$4 sm:$0xff]   ;;  %v5014_v5 = vld [vmem:[#allocation9 + $0x70] ss:$8 sps:$4 sm:$0xff]   ;;  %v5517_v26 = vmov 0  }
  0x2b   :  { %4970 = vmatpush3.bf16.msra.mxu0 %v5004_v1  ;;  %v5007_v6 = vld [vmem:[#allocation6 + $0x20] sm:$0xff]   ;;  %320 = vmatprep.subr.bf16.mxu1 %v5012_v4  ;;  %v5018_v9 = vld [vmem:[#allocation9 + $0x54] ss:$8 sps:$4 sm:$0xff]   ;;  %v5020_v11 = vld [vmem:[#allocation9 + $0x50] ss:$8 sps:$4 sm:$0xff]   ;;  %s5519_s21 = smov [#allocation3]  }
  0x2c   :  { %4971 = vmatprep.subr.bf16.mxu0 %v5515_v0  ;;  %v5015_v7 = vld [vmem:[#allocation9 + $0x64] ss:$8 sps:$4 sm:$0xff]   ;;  %321 = vmatpush1.bf16.msra.mxu1 %v5014_v5  ;;  %v5017_v8 = vld [vmem:[#allocation9 + $0x60] ss:$8 sps:$4 sm:$0xff]   ;;  %v5008_v10 = vld [vmem:[#allocation6 + $0x18] sm:$0xff]   ;;  %s80_s22 = sshll.u32 %s5519_s21, 4  ;;  %s81_s22 = int_to_ptr.vmem [resolvable:$true] %s80_s22 }
  0x2d   :  { %322 = vmatprep.subr.bf16.mxu1 %v5015_v7  ;;  %v5021_v12 = vld [vmem:[#allocation9 + $0x44] ss:$8 sps:$4 sm:$0xff]   ;;  %v5009_v13 = vld [vmem:[#allocation6 + $0x10] sm:$0xff]   ;;  %v5023_v14 = vld [vmem:[#allocation9 + $0x40] ss:$8 sps:$4 sm:$0xff]   ;;  %352 = vmatprep.mubr.bf16.mxu1 %v5517_v26 }
  0x2e   :  { %v5024_v15 = vld [vmem:[#allocation9 + $0x34] ss:$8 sps:$4 sm:$0xff]   ;;  %v5010_v16 = vld [vmem:[#allocation6 + $0x8] sm:$0xff]   ;;  %v5026_v17 = vld [vmem:[#allocation9 + $0x30] ss:$8 sps:$4 sm:$0xff]  }
  0x2f   :  { %4972 = vmatpush3.bf16.msra.mxu0 %v5005_v2  ;;  %v5027_v18 = vld [vmem:[#allocation9 + $0x24] ss:$8 sps:$4 sm:$0xff]   ;;  %v5029_v20 = vld [vmem:[#allocation9 + $0x20] ss:$8 sps:$4 sm:$0xff]   ;;  %v5030_v22 = vld [vmem:[#allocation9 + $0x14] ss:$8 sps:$4 sm:$0xff]  }
  0x30   :  { %4973 = vmatprep.subr.bf16.mxu0 %v5515_v0  ;;  %323 = vmatpush1.bf16.msra.mxu1 %v5017_v8  ;;  %v5011_v19 = vld [vmem:[#allocation6] sm:$0xff]   ;;  %v5032_v23 = vld [vmem:[#allocation9 + $0x10] ss:$8 sps:$4 sm:$0xff]  }
  0x31   :  { %324 = vmatprep.subr.bf16.mxu1 %v5018_v9  ;;  %v96_v21 = vld [vmem:[%s5890_s0] sm:$0xf]  ;;  %v5033_v24 = vld [vmem:[#allocation9 + $0x4] ss:$8 sps:$4 sm:$0xff]   ;;  %s5518_s0 = smov [#allocation2]  }
  0x32   :  { %v5035_v25 = vld [vmem:[#allocation9] ss:$8 sps:$4 sm:$0xff]   ;;  %s68_s20 = sshll.u32 %s5518_s0, 4  ;;  %s69_s20 = int_to_ptr.vmem [resolvable:$true] %s68_s20 }
  0x33   :  { %4974 = vmatpush3.bf16.msra.mxu0 %v5006_v3  ;;  %v4484_v27 = vld [vmem:[#allocation11] ss:$0 sm:$0xff]  ;;  %s5424_s23 = scalar_lea.vmem %s69_s20, 8192  ;;  %p5429_p2 = scmp.lt.s32.totalorder %s69_s20, %s69_s20 }
  0x34   :  { %4975 = vmatprep.subr.bf16.mxu0 %v5515_v0  ;;  %325 = vmatpush1.bf16.msra.mxu1 %v5020_v11  ;;  %p5425_p1 = scmp.ne.s32.totalorder %s69_s20, %s5424_s23  ;;  %p5430_p3 = scmp.lt.s32.totalorder %s5424_s23, %s5424_s23 }
  0x35   :  { %326 = vmatprep.subr.bf16.mxu1 %v5021_v12 }
  0x36   :  { %p5431_p4 = por %p5430_p3, %p5429_p2 }
  0x37   :  { %4976 = vmatpush3.bf16.msra.mxu0 %v5007_v6 }
  0x38   :  { %4977 = vmatprep.subr.bf16.mxu0 %v5515_v0  ;;  %327 = vmatpush1.bf16.msra.mxu1 %v5023_v14  ;;  %p5432_p5 = pnand %p5431_p4, %p5425_p1 }
  0x39   :  { %328 = vmatprep.subr.bf16.mxu1 %v5024_v15 }
  0x3b   :  { %4978 = vmatpush3.bf16.msra.mxu0 %v5008_v10 }
  0x3c   :  { %4979 = vmatprep.subr.bf16.mxu0 %v5515_v0  ;;  %329 = vmatpush1.bf16.msra.mxu1 %v5026_v17 }
  0x3d   :  { %330 = vmatprep.subr.bf16.mxu1 %v5027_v18 }
  0x3f   :  { %4980 = vmatpush3.bf16.msra.mxu0 %v5009_v13 }
  0x40   :  { %4981 = vmatprep.subr.bf16.mxu0 %v5515_v0  ;;  %331 = vmatpush1.bf16.msra.mxu1 %v5029_v20 }
  0x41   :  { %332 = vmatprep.subr.bf16.mxu1 %v5030_v22 }
  0x43   :  { %4982 = vmatpush3.bf16.msra.mxu0 %v5010_v16 }
  0x44   :  { %4983 = vmatprep.subr.bf16.mxu0 %v5515_v0  ;;  %333 = vmatpush1.bf16.msra.mxu1 %v5032_v23 }
  0x45   :  { %334 = vmatprep.subr.bf16.mxu1 %v5033_v24 }
  0x47   :  { %4984 = vmatpush3.bf16.msra.mxu0 %v5011_v19 }
  0x48   :  { %335 = vmatpush1.bf16.msra.mxu1 %v5035_v25 }
  0x4a   :  { %4986 = vmatmul.mubr.bf16.vlgmr.msra.gmra.mxu0 %v96_v21 }
 0x10a   :  { %v202_v28 = vpop.f32.mrf.mxu0 }
 0x10b   :  { %v203_v29 = vadd.f32 %v4484_v27, %v202_v28 }
 0x10c   :  { %v4987_v30 = vpop.f32.mrf.mxu0 }
 0x10d   :  { %vm208_vm1 = vcmp.ge.f32.partialorder %v203_v29, 0.0  ;;  %v209_v31 = vmul.f32 0.2, %v203_v29 }
 0x10e   :  { %v205_v32 = vpop.f32.mrf.mxu0 }
 0x10f   :  { %v210_v33 = vsel %vm208_vm1, %v203_v29, %v209_v31 }
 0x110   :  { %v4988_v34 = vpop.f32.mrf.mxu0  ;;  %v227_v35 = vpack.c.bf16 %v210_v33, %v210_v33 }
 0x112   :  { %353 = vmatmul.mubr.bf16.vlgmr.msra.gmra.mxu1 %v227_v35 }
 0x113   :  { %5435 = shalt.err (!%p5432_p5)  }
 0x114   :  { %71 = dma.hbm_to_vmem [thread:$0]  %s5893_s3, 8192, %s69_s20, [#allocation5] }
 0x115   :  { %s5444_s26 = scalar_lea.vmem %s81_s22, 32768  ;;  %p5449_p7 = scmp.lt.s32.totalorder %s81_s22, %s81_s22 }
 0x116   :  { %p5445_p6 = scmp.ne.s32.totalorder %s81_s22, %s5444_s26  ;;  %p5450_p8 = scmp.lt.s32.totalorder %s5444_s26, %s5444_s26 }
 0x118   :  { %p5451_p9 = por %p5450_p8, %p5449_p7 }
 0x11a   :  { %p5452_p10 = pnand %p5451_p9, %p5445_p6 }
 0x11c   :  { %5455 = shalt.err (!%p5452_p10)  }
 0x11d   :  { %83 = dma.hbm_to_vmem [thread:$0]  %s5894_s4, 32768, %s81_s22, [#allocation5 + $0x1] }
 0x11e   :  { %s5520_s29 = smov [#allocation4]  }
 0x11f   :  { %s92_s30 = sshll.u32 %s5520_s29, 4  ;;  %s93_s30 = int_to_ptr.vmem [resolvable:$true] %s92_s30 }
 0x120   :  { %s5464_s8 = scalar_lea.vmem %s93_s30, 16384  ;;  %p5469_p12 = scmp.lt.s32.totalorder %s93_s30, %s93_s30 }
 0x121   :  { %p5465_p11 = scmp.ne.s32.totalorder %s93_s30, %s5464_s8  ;;  %p5470_p13 = scmp.lt.s32.totalorder %s5464_s8, %s5464_s8 }
 0x123   :  { %p5471_p0 = por %p5470_p13, %p5469_p12 }
 0x125   :  { %p5472_p1 = pnand %p5471_p0, %p5465_p11 }
 0x127   :  { %5475 = shalt.err (!%p5472_p1)  }
 0x128   :  { %95 = dma.hbm_to_vmem [thread:$0]  %s5895_s5, 16384, %s93_s30, [#allocation5 + $0x2]  ;;  %v230_v36 = vlaneseq  ;;  %v228_v39 = vld [vmem:[#allocation11 + $0x1] sm:$0x3]  ;;  %v5521_v21 = vmov 1966171168  }
 0x129   :  { %v406_v22 = vunpack.c.l.s4 %v5521_v21  ;;  %v361_v29 = vld [vmem:[#allocation11 + $0x3] sm:$0x3] }
 0x12a   :  { %v5584_v37 = vshrl.u32 %v230_v36, 7 }
 0x12b   :  { %v407_v23 = vunpack.c.0.s8 %v406_v22 }
 0x12c   :  { %v5587_v38 = vsub.s32 0, %v5584_v37  ;;  %v5590_v40 = vsub.s32 1, %v5584_v37 }
 0x12d   :  { %v5601_v25 = vsub.s32 %v407_v23, %v5584_v37 }
 0x12e   :  { %v233_v41 = vrot.slane %v228_v39, %v5587_v38  ;;  %v237_v42 = vrot.slane %v228_v39, %v5590_v40 }
 0x1d2   :  { %v354_v43 = vpop.f32.mrf.mxu1 }
 0x1d3   :  { %v5594_v44 = vadd.f32 %v354_v43, %v233_v41  ;;  %v362_v41 = vld [vmem:[#allocation11 + $0x5] sm:$0x3] }
 0x1d4   :  { %v356_v45 = vpop.f32.mrf.mxu1 }
 0x1d5   :  { %v363_v46 = vrot.slane %v5594_v44, 4  ;;  %v378_v47 = vmul.f32 %v5594_v44, %v5594_v44  ;;  %v357_v48 = vadd.f32 %v356_v45, %v237_v42 }
 0x1d6   :  { %v358_v49 = vpop.f32.mrf.mxu1 }
 0x1d7   :  { %v364_v50 = vadd.f32 %v363_v46, %v5594_v44  ;;  %v380_v51 = vrot.slane %v378_v47, 4  ;;  %v369_v52 = vrot.slane %v357_v48, 4  ;;  %v379_v53 = vmul.f32 %v357_v48, %v357_v48 }
 0x1d8   :  { %v359_v54 = vpop.f32.mrf.mxu1 }
 0x1d9   :  { %v365_v55 = vrot.slane %v364_v50, 2  ;;  %v381_v56 = vadd.f32 %v380_v51, %v378_v47  ;;  %v370_v57 = vadd.f32 %v369_v52, %v357_v48  ;;  %v386_v58 = vrot.slane %v379_v53, 4 }
 0x1db   :  { %v366_v59 = vadd.f32 %v365_v55, %v364_v50  ;;  %v382_v60 = vrot.slane %v381_v56, 2  ;;  %v371_v61 = vrot.slane %v370_v57, 2  ;;  %v387_v62 = vadd.f32 %v386_v58, %v379_v53 }
 0x1dd   :  { %v367_v63 = vrot.slane %v366_v59, 1  ;;  %v383_v0 = vadd.f32 %v382_v60, %v381_v56  ;;  %v372_v1 = vadd.f32 %v371_v61, %v370_v57  ;;  %v388_v2 = vrot.slane %v387_v62, 2 }
 0x1df   :  { %v368_v3 = vadd.f32 %v367_v63, %v366_v59  ;;  %v384_v4 = vrot.slane %v383_v0, 1  ;;  %v373_v5 = vrot.slane %v372_v1, 1  ;;  %v389_v6 = vadd.f32 %v388_v2, %v387_v62 }
 0x1e1   :  { %v376_v7 = vmul.f32 0.125, %v368_v3  ;;  %v385_v8 = vadd.f32 %v384_v4, %v383_v0  ;;  %v374_v9 = vadd.f32 %v373_v5, %v372_v1  ;;  %v390_v10 = vrot.slane %v389_v6, 1 }
 0x1e3   :  { %v392_v11 = vmul.f32 0.125, %v385_v8  ;;  %v394_v12 = vmul.f32 %v376_v7, %v376_v7  ;;  %v377_v13 = vmul.f32 0.125, %v374_v9  ;;  %v391_v14 = vadd.f32 %v390_v10, %v389_v6 }
 0x1e5   :  { %v396_v15 = vsub.f32 %v392_v11, %v394_v12  ;;  %v393_v16 = vmul.f32 0.125, %v391_v14  ;;  %v395_v17 = vmul.f32 %v377_v13, %v377_v13 }
 0x1e7   :  { %v398_v18 = vadd.f32 1e-05, %v396_v15  ;;  %v397_v19 = vsub.f32 %v393_v16, %v395_v17 }
 0x1e9   :  { %v399_v20 = vadd.f32 1e-05, %v397_v19  ;;  %5036 = vrsqrt.f32 %v398_v18 }
 0x1eb   :  { %5038 = vrsqrt.f32 %v399_v20 }
 0x1f6   :  { %v5037_v24 = vpop.eup %5036 }
 0x1f8   :  { %v5039_v26 = vpop.eup %5038 }
 0x1f9   :  { %v404_v27 = vcombine.low %v5037_v24, %v5039_v26 }
 0x1fb   :  { %v411_v28 = vrot.slane %v404_v27, %v5601_v25 }
 0x1fd   :  { %v418_v30 = vrot.slane %v411_v28, %v5601_v25 }
 0x1ff   :  { %v420_v31 = vmul.f32 %v418_v30, %v361_v29 }
 0x201   :  { %v425_v32 = vrot.slane %v420_v31, %v5587_v38  ;;  %v429_v33 = vrot.slane %v420_v31, %v5590_v40 }
 0x203   :  { %v432_v34 = vmul.f32 %v425_v32, %v376_v7  ;;  %v433_v35 = vmul.f32 %v429_v33, %v377_v13  ;;  %v453_v45 = vmul.f32 %v425_v32, %v5594_v44  ;;  %v454_v46 = vmul.f32 %v429_v33, %v357_v48 }
 0x205   :  { %v436_v36 = vcombine.low %v432_v34, %v433_v35 }
 0x207   :  { %v443_v39 = vrot.slane %v436_v36, %v5601_v25 }
 0x209   :  { %v450_v42 = vrot.slane %v443_v39, %v5601_v25 }
 0x20b   :  { %v452_v43 = vsub.f32 %v362_v41, %v450_v42 }
 0x20d   :  { %v459_v47 = vrot.slane %v452_v43, %v5587_v38  ;;  %v463_v49 = vrot.slane %v452_v43, %v5590_v40 }
 0x20f   :  { %v466_v50 = vadd.f32 %v459_v47, %v453_v45  ;;  %v467_v51 = vadd.f32 %v463_v49, %v454_v46 }
 0x211   :  { %vm468_vm2 = vcmp.ge.f32.partialorder %v466_v50, 0.0  ;;  %vm469_vm3 = vcmp.ge.f32.partialorder %v467_v51, 0.0  ;;  %v470_v52 = vmul.f32 0.2, %v466_v50  ;;  %v471_v53 = vmul.f32 0.2, %v467_v51 }
 0x213   :  { %v5612_v54 = vsel %vm468_vm2, %v466_v50, %v470_v52  ;;  %v473_v55 = vsel %vm469_vm3, %v467_v51, %v471_v53 }
 0x214   :  { %5500 = dma.done.wait [#allocation5], 8192 }
 0x215   :  { %5501 = vsyncadd [#allocation5], 4294959104  ;;  %v543_v56 = vpack.c.bf16 %v473_v55, %v473_v55  ;;  %v5040_v44 = vld [vmem:[#allocation2 + $0xe4] ss:$16 sps:$4 sm:$0xff]   ;;  %v5042_v48 = vld [vmem:[#allocation2 + $0xec] ss:$16 sps:$4 sm:$0xff]  }
 0x216   :  { %886 = vmatprep.subr.bf16.mxu0 %v5040_v44  ;;  %v5044_v57 = vld [vmem:[#allocation2 + $0xe0] ss:$16 sps:$4 sm:$0xff]   ;;  %v5045_v58 = vld [vmem:[#allocation2 + $0xe8] ss:$16 sps:$4 sm:$0xff]   ;;  %927 = vmatprep.subr.bf16.mxu1 %v5042_v48  ;;  %v5046_v59 = vld [vmem:[#allocation2 + $0xc4] ss:$16 sps:$4 sm:$0xff]  }
 0x217   :  { %918 = vmatprep.mubr.bf16.mxu0 %v543_v56  ;;  %959 = vmatprep.mubr.bf16.mxu1 %v543_v56  ;;  %v5048_v60 = vld [vmem:[#allocation2 + $0xcc] ss:$16 sps:$4 sm:$0xff]   ;;  %v5050_v61 = vld [vmem:[#allocation2 + $0xc0] ss:$16 sps:$4 sm:$0xff]   ;;  %v5051_v62 = vld [vmem:[#allocation2 + $0xc8] ss:$16 sps:$4 sm:$0xff]  }
 0x218   :  { %887 = vmatpush1.bf16.msra.mxu0 %v5044_v57  ;;  %928 = vmatpush1.bf16.msra.mxu1 %v5045_v58  ;;  %v5052_v63 = vld [vmem:[#allocation2 + $0xa4] ss:$16 sps:$4 sm:$0xff]   ;;  %v5054_v0 = vld [vmem:[#allocation2 + $0xac] ss:$16 sps:$4 sm:$0xff]   ;;  %v5056_v1 = vld [vmem:[#allocation2 + $0xa0] ss:$16 sps:$4 sm:$0xff]  }
 0x219   :  { %888 = vmatprep.subr.bf16.mxu0 %v5046_v59  ;;  %929 = vmatprep.subr.bf16.mxu1 %v5048_v60  ;;  %v5057_v2 = vld [vmem:[#allocation2 + $0xa8] ss:$16 sps:$4 sm:$0xff]   ;;  %v5058_v3 = vld [vmem:[#allocation2 + $0x84] ss:$16 sps:$4 sm:$0xff]   ;;  %v5060_v4 = vld [vmem:[#allocation2 + $0x8c] ss:$16 sps:$4 sm:$0xff]   ;;  %v542_v60 = vpack.c.bf16 %v5612_v54, %v5612_v54 }
 0x21a   :  { %v5062_v5 = vld [vmem:[#allocation2 + $0x80] ss:$16 sps:$4 sm:$0xff]   ;;  %v5063_v6 = vld [vmem:[#allocation2 + $0x88] ss:$16 sps:$4 sm:$0xff]   ;;  %v5064_v7 = vld [vmem:[#allocation2 + $0x64] ss:$16 sps:$4 sm:$0xff]  }
 0x21b   :  { %v5066_v8 = vld [vmem:[#allocation2 + $0x6c] ss:$16 sps:$4 sm:$0xff]   ;;  %v5068_v9 = vld [vmem:[#allocation2 + $0x60] ss:$16 sps:$4 sm:$0xff]   ;;  %v5069_v10 = vld [vmem:[#allocation2 + $0x68] ss:$16 sps:$4 sm:$0xff]  }
 0x21c   :  { %889 = vmatpush1.bf16.msra.mxu0 %v5050_v61  ;;  %930 = vmatpush1.bf16.msra.mxu1 %v5051_v62  ;;  %v5070_v11 = vld [vmem:[#allocation2 + $0x44] ss:$16 sps:$4 sm:$0xff]   ;;  %v5072_v12 = vld [vmem:[#allocation2 + $0x4c] ss:$16 sps:$4 sm:$0xff]   ;;  %v5074_v13 = vld [vmem:[#allocation2 + $0x40] ss:$16 sps:$4 sm:$0xff]  }
 0x21d   :  { %890 = vmatprep.subr.bf16.mxu0 %v5052_v63  ;;  %931 = vmatprep.subr.bf16.mxu1 %v5054_v0  ;;  %v5075_v14 = vld [vmem:[#allocation2 + $0x48] ss:$16 sps:$4 sm:$0xff]   ;;  %v5076_v15 = vld [vmem:[#allocation2 + $0x24] ss:$16 sps:$4 sm:$0xff]   ;;  %v5078_v16 = vld [vmem:[#allocation2 + $0x2c] ss:$16 sps:$4 sm:$0xff]  }
 0x21e   :  { %v5080_v17 = vld [vmem:[#allocation2 + $0x20] ss:$16 sps:$4 sm:$0xff]   ;;  %v5081_v18 = vld [vmem:[#allocation2 + $0x28] ss:$16 sps:$4 sm:$0xff]   ;;  %v5082_v19 = vld [vmem:[#allocation2 + $0x4] ss:$16 sps:$4 sm:$0xff]  }
 0x21f   :  { %v5084_v20 = vld [vmem:[#allocation2 + $0xc] ss:$16 sps:$4 sm:$0xff]   ;;  %v5086_v21 = vld [vmem:[#allocation2] ss:$16 sps:$4 sm:$0xff]   ;;  %v5087_v22 = vld [vmem:[#allocation2 + $0x8] ss:$16 sps:$4 sm:$0xff]  }
 0x220   :  { %891 = vmatpush1.bf16.msra.mxu0 %v5056_v1  ;;  %932 = vmatpush1.bf16.msra.mxu1 %v5057_v2  ;;  %v5088_v23 = vld [vmem:[#allocation2 + $0x1e4] ss:$16 sps:$4 sm:$0xff]   ;;  %v5090_v24 = vld [vmem:[#allocation2 + $0x1ec] ss:$16 sps:$4 sm:$0xff]   ;;  %v5092_v26 = vld [vmem:[#allocation2 + $0x1e0] ss:$16 sps:$4 sm:$0xff]  }
 0x221   :  { %892 = vmatprep.subr.bf16.mxu0 %v5058_v3  ;;  %933 = vmatprep.subr.bf16.mxu1 %v5060_v4  ;;  %v5093_v27 = vld [vmem:[#allocation2 + $0x1e8] ss:$16 sps:$4 sm:$0xff]   ;;  %v5094_v28 = vld [vmem:[#allocation2 + $0x1c4] ss:$16 sps:$4 sm:$0xff]   ;;  %v5096_v29 = vld [vmem:[#allocation2 + $0x1cc] ss:$16 sps:$4 sm:$0xff]  }
 0x222   :  { %v5098_v30 = vld [vmem:[#allocation2 + $0x1c0] ss:$16 sps:$4 sm:$0xff]   ;;  %v5099_v31 = vld [vmem:[#allocation2 + $0x1c8] ss:$16 sps:$4 sm:$0xff]   ;;  %v5100_v32 = vld [vmem:[#allocation2 + $0x1a4] ss:$16 sps:$4 sm:$0xff]  }
 0x223   :  { %v5102_v33 = vld [vmem:[#allocation2 + $0x1ac] ss:$16 sps:$4 sm:$0xff]   ;;  %v5104_v34 = vld [vmem:[#allocation2 + $0x1a0] ss:$16 sps:$4 sm:$0xff]   ;;  %v5105_v35 = vld [vmem:[#allocation2 + $0x1a8] ss:$16 sps:$4 sm:$0xff]  }
 0x224   :  { %893 = vmatpush1.bf16.msra.mxu0 %v5062_v5  ;;  %934 = vmatpush1.bf16.msra.mxu1 %v5063_v6  ;;  %v5106_v36 = vld [vmem:[#allocation2 + $0x184] ss:$16 sps:$4 sm:$0xff]   ;;  %v5108_v39 = vld [vmem:[#allocation2 + $0x18c] ss:$16 sps:$4 sm:$0xff]   ;;  %v5110_v41 = vld [vmem:[#allocation2 + $0x180] ss:$16 sps:$4 sm:$0xff]  }
 0x225   :  { %894 = vmatprep.subr.bf16.mxu0 %v5064_v7  ;;  %935 = vmatprep.subr.bf16.mxu1 %v5066_v8  ;;  %v5111_v42 = vld [vmem:[#allocation2 + $0x188] ss:$16 sps:$4 sm:$0xff]   ;;  %v5112_v43 = vld [vmem:[#allocation2 + $0x164] ss:$16 sps:$4 sm:$0xff]   ;;  %v5114_v45 = vld [vmem:[#allocation2 + $0x16c] ss:$16 sps:$4 sm:$0xff]  }
 0x226   :  { %v5116_v46 = vld [vmem:[#allocation2 + $0x160] ss:$16 sps:$4 sm:$0xff]   ;;  %v5117_v47 = vld [vmem:[#allocation2 + $0x168] ss:$16 sps:$4 sm:$0xff]   ;;  %v5118_v49 = vld [vmem:[#allocation2 + $0x144] ss:$16 sps:$4 sm:$0xff]  }
 0x227   :  { %v5120_v50 = vld [vmem:[#allocation2 + $0x14c] ss:$16 sps:$4 sm:$0xff]   ;;  %v5122_v51 = vld [vmem:[#allocation2 + $0x140] ss:$16 sps:$4 sm:$0xff]   ;;  %v5123_v52 = vld [vmem:[#allocation2 + $0x148] ss:$16 sps:$4 sm:$0xff]  }
 0x228   :  { %895 = vmatpush1.bf16.msra.mxu0 %v5068_v9  ;;  %936 = vmatpush1.bf16.msra.mxu1 %v5069_v10  ;;  %v5124_v53 = vld [vmem:[#allocation2 + $0x124] ss:$16 sps:$4 sm:$0xff]   ;;  %v5126_v55 = vld [vmem:[#allocation2 + $0x12c] ss:$16 sps:$4 sm:$0xff]   ;;  %v5128_v56 = vld [vmem:[#allocation2 + $0x120] ss:$16 sps:$4 sm:$0xff]  }
 0x229   :  { %896 = vmatprep.subr.bf16.mxu0 %v5070_v11  ;;  %937 = vmatprep.subr.bf16.mxu1 %v5072_v12  ;;  %v5129_v44 = vld [vmem:[#allocation2 + $0x128] ss:$16 sps:$4 sm:$0xff]   ;;  %v5130_v48 = vld [vmem:[#allocation2 + $0x104] ss:$16 sps:$4 sm:$0xff]   ;;  %v5132_v57 = vld [vmem:[#allocation2 + $0x10c] ss:$16 sps:$4 sm:$0xff]  }
 0x22a   :  { %v5134_v58 = vld [vmem:[#allocation2 + $0x100] ss:$16 sps:$4 sm:$0xff]   ;;  %v5135_v59 = vld [vmem:[#allocation2 + $0x108] ss:$16 sps:$4 sm:$0xff]   ;;  %v5617_v61 = vsub.s32 2, %v5584_v37  ;;  %v5620_v63 = vsub.s32 3, %v5584_v37 }
 0x22b   :  { %v544_v62 = vld [vmem:[#allocation11 + $0x7] sm:$0xf] }
 0x22c   :  { %897 = vmatpush1.bf16.msra.mxu0 %v5074_v13  ;;  %938 = vmatpush1.bf16.msra.mxu1 %v5075_v14  ;;  %v549_v0 = vrot.slane %v544_v62, %v5587_v38  ;;  %v557_v1 = vrot.slane %v544_v62, %v5617_v61  ;;  %v553_v4 = vrot.slane %v544_v62, %v5590_v40 }
 0x22d   :  { %898 = vmatprep.subr.bf16.mxu0 %v5076_v15  ;;  %939 = vmatprep.subr.bf16.mxu1 %v5078_v16  ;;  %v561_v54 = vrot.slane %v544_v62, %v5620_v63 }
 0x230   :  { %899 = vmatpush1.bf16.msra.mxu0 %v5080_v17  ;;  %940 = vmatpush1.bf16.msra.mxu1 %v5081_v18 }
 0x231   :  { %900 = vmatprep.subr.bf16.mxu0 %v5082_v19  ;;  %941 = vmatprep.subr.bf16.mxu1 %v5084_v20 }
 0x234   :  { %901 = vmatpush1.bf16.msra.mxu0 %v5086_v21  ;;  %942 = vmatpush1.bf16.msra.mxu1 %v5087_v22 }
 0x235   :  { %902 = vmatprep.subr.bf16.mxu0 %v5088_v23  ;;  %943 = vmatprep.subr.bf16.mxu1 %v5090_v24 }
 0x238   :  { %903 = vmatpush2.bf16.msra.mxu0 %v5092_v26  ;;  %944 = vmatpush2.bf16.msra.mxu1 %v5093_v27 }
 0x239   :  { %904 = vmatprep.subr.bf16.mxu0 %v5094_v28  ;;  %945 = vmatprep.subr.bf16.mxu1 %v5096_v29 }
 0x23c   :  { %905 = vmatpush2.bf16.msra.mxu0 %v5098_v30  ;;  %946 = vmatpush2.bf16.msra.mxu1 %v5099_v31 }
 0x23d   :  { %906 = vmatprep.subr.bf16.mxu0 %v5100_v32  ;;  %947 = vmatprep.subr.bf16.mxu1 %v5102_v33 }
 0x240   :  { %907 = vmatpush2.bf16.msra.mxu0 %v5104_v34  ;;  %948 = vmatpush2.bf16.msra.mxu1 %v5105_v35 }
 0x241   :  { %908 = vmatprep.subr.bf16.mxu0 %v5106_v36  ;;  %949 = vmatprep.subr.bf16.mxu1 %v5108_v39 }
 0x244   :  { %909 = vmatpush2.bf16.msra.mxu0 %v5110_v41  ;;  %950 = vmatpush2.bf16.msra.mxu1 %v5111_v42 }
 0x245   :  { %910 = vmatprep.subr.bf16.mxu0 %v5112_v43  ;;  %951 = vmatprep.subr.bf16.mxu1 %v5114_v45 }
 0x248   :  { %911 = vmatpush2.bf16.msra.mxu0 %v5116_v46  ;;  %952 = vmatpush2.bf16.msra.mxu1 %v5117_v47 }
 0x249   :  { %912 = vmatprep.subr.bf16.mxu0 %v5118_v49  ;;  %953 = vmatprep.subr.bf16.mxu1 %v5120_v50 }
 0x24c   :  { %913 = vmatpush2.bf16.msra.mxu0 %v5122_v51  ;;  %954 = vmatpush2.bf16.msra.mxu1 %v5123_v52 }
 0x24d   :  { %914 = vmatprep.subr.bf16.mxu0 %v5124_v53  ;;  %955 = vmatprep.subr.bf16.mxu1 %v5126_v55 }
 0x250   :  { %915 = vmatpush2.bf16.msra.mxu0 %v5128_v56  ;;  %956 = vmatpush2.bf16.msra.mxu1 %v5129_v44 }
 0x251   :  { %916 = vmatprep.subr.bf16.mxu0 %v5130_v48  ;;  %957 = vmatprep.subr.bf16.mxu1 %v5132_v57 }
 0x254   :  { %917 = vmatpush2.bf16.msra.mxu0 %v5134_v58  ;;  %958 = vmatpush2.bf16.msra.mxu1 %v5135_v59 }
 0x257   :  { %919 = vmatmul.mubr.bf16.vlgmr.msra.gmra.mxu0 %v542_v60  ;;  %960 = vmatmul.mubr.bf16.vlgmr.msra.gmra.mxu1 %v542_v60 }
 0x317   :  { %v920_v2 = vpop.f32.mrf.mxu0  ;;  %v961_v3 = vpop.f32.mrf.mxu1 }
 0x318   :  { %v5626_v5 = vadd.f32 %v920_v2, %v549_v0  ;;  %v5628_v6 = vadd.f32 %v961_v3, %v557_v1 }
 0x319   :  { %v922_v7 = vpop.f32.mrf.mxu0  ;;  %v963_v8 = vpop.f32.mrf.mxu1 }
 0x31a   :  { %v970_v9 = vrot.slane %v5626_v5, 4  ;;  %v998_v10 = vmul.f32 %v5626_v5, %v5626_v5  ;;  %v982_v11 = vrot.slane %v5628_v6, 4  ;;  %v1000_v12 = vmul.f32 %v5628_v6, %v5628_v6 }
 0x31b   :  { %v5636_v13 = vadd.f32 %v922_v7, %v553_v4  ;;  %v5638_v14 = vadd.f32 %v963_v8, %v561_v54  ;;  %v924_v15 = vpop.f32.mrf.mxu0  ;;  %v965_v16 = vpop.f32.mrf.mxu1 }
 0x31c   :  { %v971_v17 = vadd.f32 %v970_v9, %v5626_v5  ;;  %v1002_v18 = vrot.slane %v998_v10, 4  ;;  %v983_v19 = vadd.f32 %v982_v11, %v5628_v6  ;;  %v1014_v20 = vrot.slane %v1000_v12, 4 }
 0x31d   :  { %v976_v21 = vrot.slane %v5636_v13, 4  ;;  %v999_v22 = vmul.f32 %v5636_v13, %v5636_v13  ;;  %v988_v23 = vrot.slane %v5638_v14, 4  ;;  %v1001_v24 = vmul.f32 %v5638_v14, %v5638_v14  ;;  %v925_v26 = vpop.f32.mrf.mxu0  ;;  %v966_v27 = vpop.f32.mrf.mxu1 }
 0x31e   :  { %v972_v28 = vrot.slane %v971_v17, 2  ;;  %v1003_v29 = vadd.f32 %v1002_v18, %v998_v10  ;;  %v984_v30 = vrot.slane %v983_v19, 2  ;;  %v1015_v31 = vadd.f32 %v1014_v20, %v1000_v12 }
 0x31f   :  { %v977_v32 = vadd.f32 %v976_v21, %v5636_v13  ;;  %v1008_v33 = vrot.slane %v999_v22, 4  ;;  %v989_v34 = vadd.f32 %v988_v23, %v5638_v14  ;;  %v1020_v35 = vrot.slane %v1001_v24, 4 }
 0x320   :  { %v973_v36 = vadd.f32 %v972_v28, %v971_v17  ;;  %v1004_v39 = vrot.slane %v1003_v29, 2  ;;  %v985_v41 = vadd.f32 %v984_v30, %v983_v19  ;;  %v1016_v42 = vrot.slane %v1015_v31, 2 }
 0x321   :  { %v978_v43 = vrot.slane %v977_v32, 2  ;;  %v1009_v45 = vadd.f32 %v1008_v33, %v999_v22  ;;  %v990_v46 = vrot.slane %v989_v34, 2  ;;  %v1021_v47 = vadd.f32 %v1020_v35, %v1001_v24 }
 0x322   :  { %v974_v49 = vrot.slane %v973_v36, 1  ;;  %v1005_v50 = vadd.f32 %v1004_v39, %v1003_v29  ;;  %v986_v51 = vrot.slane %v985_v41, 1  ;;  %v1017_v52 = vadd.f32 %v1016_v42, %v1015_v31 }
 0x323   :  { %v979_v53 = vadd.f32 %v978_v43, %v977_v32  ;;  %v1010_v55 = vrot.slane %v1009_v45, 2  ;;  %v991_v56 = vadd.f32 %v990_v46, %v989_v34  ;;  %v1022_v44 = vrot.slane %v1021_v47, 2 }
 0x324   :  { %v975_v48 = vadd.f32 %v974_v49, %v973_v36  ;;  %v1006_v57 = vrot.slane %v1005_v50, 1  ;;  %v987_v58 = vadd.f32 %v986_v51, %v985_v41  ;;  %v1018_v59 = vrot.slane %v1017_v52, 1 }
 0x325   :  { %v980_v60 = vrot.slane %v979_v53, 1  ;;  %v1011_v62 = vadd.f32 %v1010_v55, %v1009_v45  ;;  %v992_v0 = vrot.slane %v991_v56, 1  ;;  %v1023_v1 = vadd.f32 %v1022_v44, %v1021_v47  ;;  %v968_v47 = vld [vmem:[#allocation11 + $0xb] sm:$0xf] }
 0x326   :  { %v994_v2 = vmul.f32 0.125, %v975_v48  ;;  %v1007_v3 = vadd.f32 %v1006_v57, %v1005_v50  ;;  %v996_v4 = vmul.f32 0.125, %v987_v58  ;;  %v1019_v54 = vadd.f32 %v1018_v59, %v1017_v52 }
 0x327   :  { %v981_v7 = vadd.f32 %v980_v60, %v979_v53  ;;  %v1012_v8 = vrot.slane %v1011_v62, 1  ;;  %v993_v9 = vadd.f32 %v992_v0, %v991_v56  ;;  %v1024_v10 = vrot.slane %v1023_v1, 1 }
 0x328   :  { %v1026_v11 = vmul.f32 0.125, %v1007_v3  ;;  %v1030_v12 = vmul.f32 %v994_v2, %v994_v2  ;;  %v1028_v15 = vmul.f32 0.125, %v1019_v54  ;;  %v1032_v16 = vmul.f32 %v996_v4, %v996_v4 }
 0x329   :  { %v995_v17 = vmul.f32 0.125, %v981_v7  ;;  %v1013_v18 = vadd.f32 %v1012_v8, %v1011_v62  ;;  %v997_v19 = vmul.f32 0.125, %v993_v9  ;;  %v1025_v20 = vadd.f32 %v1024_v10, %v1023_v1  ;;  %v969_v1 = vld [vmem:[#allocation11 + $0xf] sm:$0xf] }
 0x32a   :  { %v1034_v21 = vsub.f32 %v1026_v11, %v1030_v12  ;;  %v1036_v22 = vsub.f32 %v1028_v15, %v1032_v16 }
 0x32b   :  { %v1027_v23 = vmul.f32 0.125, %v1013_v18  ;;  %v1031_v24 = vmul.f32 %v995_v17, %v995_v17  ;;  %v1029_v26 = vmul.f32 0.125, %v1025_v20  ;;  %v1033_v27 = vmul.f32 %v997_v19, %v997_v19 }
 0x32c   :  { %v1038_v28 = vadd.f32 1e-05, %v1034_v21  ;;  %v1040_v29 = vadd.f32 1e-05, %v1036_v22 }
 0x32d   :  { %v1035_v30 = vsub.f32 %v1027_v23, %v1031_v24  ;;  %v1037_v31 = vsub.f32 %v1029_v26, %v1033_v27 }
 0x32e   :  { %5136 = vrsqrt.f32 %v1038_v28 }
 0x32f   :  { %v1039_v32 = vadd.f32 1e-05, %v1035_v30  ;;  %v1041_v33 = vadd.f32 1e-05, %v1037_v31  ;;  %5138 = vrsqrt.f32 %v1040_v29 }
 0x331   :  { %5140 = vrsqrt.f32 %v1039_v32 }
 0x332   :  { %5142 = vrsqrt.f32 %v1041_v33 }
 0x33b   :  { %v5137_v34 = vpop.eup %5136 }
 0x33c   :  { %v5139_v35 = vpop.eup %5138 }
 0x33e   :  { %v5141_v36 = vpop.eup %5140 }
 0x33f   :  { %v5143_v39 = vpop.eup %5142  ;;  %v1050_v41 = vcombine.low %v5137_v34, %v5141_v36 }
 0x340   :  { %v1051_v42 = vcombine.low %v5139_v35, %v5143_v39 }
 0x341   :  { %v1058_v43 = vrot.slane %v1050_v41, %v5601_v25 }
 0x342   :  { %v1065_v45 = vrot.slane %v1051_v42, %v5601_v25 }
 0x344   :  { %v1066_v46 = vcombine.low %v1058_v43, %v1065_v45 }
 0x346   :  { %v1073_v49 = vrot.slane %v1066_v46, %v5601_v25 }
 0x348   :  { %v1075_v50 = vmul.f32 %v1073_v49, %v968_v47 }
 0x34a   :  { %v1080_v51 = vrot.slane %v1075_v50, %v5587_v38  ;;  %v1084_v52 = vrot.slane %v1075_v50, %v5590_v40  ;;  %v1088_v53 = vrot.slane %v1075_v50, %v5617_v61  ;;  %v1092_v55 = vrot.slane %v1075_v50, %v5620_v63 }
 0x34c   :  { %v1097_v56 = vmul.f32 %v1080_v51, %v994_v2  ;;  %v1098_v44 = vmul.f32 %v1084_v52, %v995_v17  ;;  %v1099_v48 = vmul.f32 %v1088_v53, %v996_v4  ;;  %v1100_v57 = vmul.f32 %v1092_v55, %v997_v19 }
 0x34d   :  { %v1131_v7 = vmul.f32 %v1080_v51, %v5626_v5  ;;  %v1132_v8 = vmul.f32 %v1084_v52, %v5636_v13  ;;  %v1133_v2 = vmul.f32 %v1088_v53, %v5628_v6  ;;  %v1134_v4 = vmul.f32 %v1092_v55, %v5638_v14 }
 0x34e   :  { %v1105_v58 = vcombine.low %v1097_v56, %v1098_v44  ;;  %v1106_v59 = vcombine.low %v1099_v48, %v1100_v57 }
 0x350   :  { %v1113_v60 = vrot.slane %v1105_v58, %v5601_v25  ;;  %v1120_v62 = vrot.slane %v1106_v59, %v5601_v25 }
 0x352   :  { %v1121_v0 = vcombine.low %v1113_v60, %v1120_v62 }
 0x354   :  { %v1128_v3 = vrot.slane %v1121_v0, %v5601_v25 }
 0x356   :  { %v1130_v54 = vsub.f32 %v969_v1, %v1128_v3 }
 0x358   :  { %v1139_v9 = vrot.slane %v1130_v54, %v5587_v38  ;;  %v1143_v10 = vrot.slane %v1130_v54, %v5590_v40  ;;  %v1147_v11 = vrot.slane %v1130_v54, %v5617_v61  ;;  %v1151_v12 = vrot.slane %v1130_v54, %v5620_v63 }
 0x35a   :  { %v1156_v15 = vadd.f32 %v1139_v9, %v1131_v7  ;;  %v1157_v16 = vadd.f32 %v1143_v10, %v1132_v8  ;;  %v1158_v17 = vadd.f32 %v1147_v11, %v1133_v2  ;;  %v1159_v18 = vadd.f32 %v1151_v12, %v1134_v4 }
 0x35c   :  { %vm1160_vm4 = vcmp.ge.f32.partialorder %v1156_v15, 0.0  ;;  %vm1161_vm5 = vcmp.ge.f32.partialorder %v1157_v16, 0.0  ;;  %vm1162_vm6 = vcmp.ge.f32.partialorder %v1158_v17, 0.0  ;;  %vm1163_vm7 = vcmp.ge.f32.partialorder %v1159_v18, 0.0 }
 0x35d   :  { %v1164_v5 = vmul.f32 0.2, %v1156_v15  ;;  %v1165_v6 = vmul.f32 0.2, %v1157_v16  ;;  %v1166_v13 = vmul.f32 0.2, %v1158_v17 }
 0x35e   :  { %v1167_v14 = vmul.f32 0.2, %v1159_v18 }
 0x35f   :  { %v5668_v19 = vsel %vm1160_vm4, %v1156_v15, %v1164_v5  ;;  %v1169_v20 = vsel %vm1161_vm5, %v1157_v16, %v1165_v6  ;;  %v5670_v21 = vsel %vm1162_vm6, %v1158_v17, %v1166_v13 }
 0x360   :  { %v1171_v22 = vsel %vm1163_vm7, %v1159_v18, %v1167_v14 }
 0x361   :  { %5502 = dma.done.wait [#allocation5 + $0x1], 32768 }
 0x362   :  { %5503 = vsyncadd [#allocation5 + $0x1], 4294934528  ;;  %v5672_v23 = vpack.c.bf16 %v1169_v20, %v1169_v20  ;;  %v5674_v24 = vpack.c.bf16 %v1171_v22, %v1171_v22  ;;  %v1232_v26 = vld [vmem:[#allocation3 + $0x1c0] sm:$0xff] }
 0x363   :  { %v1236_v27 = vld [vmem:[#allocation3 + $0x1e0] sm:$0xff] }
 0x364   :  { %2790 = vmatprep.mubr.bf16.mxu0 %v5672_v23  ;;  %2831 = vmatprep.mubr.bf16.mxu1 %v5674_v24  ;;  %v1360_v28 = vld [vmem:[#allocation3 + $0x5c0] sm:$0xff]  ;;  %v4630_v29 = vcombine.high %v1232_v26, %v1236_v27  ;;  %v4629_v31 = vcombine.low %v1232_v26, %v1236_v27 }
 0x365   :  { %v1364_v30 = vld [vmem:[#allocation3 + $0x5e0] sm:$0xff] }
 0x366   :  { %v1224_v32 = vld [vmem:[#allocation3 + $0x180] sm:$0xff]  ;;  %v4758_v34 = vcombine.high %v1360_v28, %v1364_v30  ;;  %v4757_v35 = vcombine.low %v1360_v28, %v1364_v30  ;;  %2758 = vmatprep.subr.bf16.mxu0 %v4630_v29 }
 0x367   :  { %v1228_v33 = vld [vmem:[#allocation3 + $0x1a0] sm:$0xff]  ;;  %2759 = vmatpush1.bf16.msra.mxu0 %v4629_v31 }
 0x368   :  { %v4622_v36 = vcombine.high %v1224_v32, %v1228_v33  ;;  %v1352_v39 = vld [vmem:[#allocation3 + $0x580] sm:$0xff]  ;;  %2799 = vmatprep.subr.bf16.mxu1 %v4758_v34  ;;  %v4621_v49 = vcombine.low %v1224_v32, %v1228_v33 }
 0x369   :  { %v1356_v41 = vld [vmem:[#allocation3 + $0x5a0] sm:$0xff]  ;;  %2800 = vmatpush1.bf16.msra.mxu1 %v4757_v35 }
 0x36a   :  { %v1216_v42 = vld [vmem:[#allocation3 + $0x140] sm:$0xff]  ;;  %v4750_v43 = vcombine.high %v1352_v39, %v1356_v41  ;;  %2760 = vmatprep.subr.bf16.mxu0 %v4622_v36  ;;  %v4749_v50 = vcombine.low %v1352_v39, %v1356_v41 }
 0x36b   :  { %v1220_v45 = vld [vmem:[#allocation3 + $0x160] sm:$0xff]  ;;  %2761 = vmatpush1.bf16.msra.mxu0 %v4621_v49 }
 0x36c   :  { %v1344_v46 = vld [vmem:[#allocation3 + $0x540] sm:$0xff]  ;;  %v4614_v51 = vcombine.high %v1216_v42, %v1220_v45  ;;  %2801 = vmatprep.subr.bf16.mxu1 %v4750_v43  ;;  %v4613_v48 = vcombine.low %v1216_v42, %v1220_v45 }
 0x36d   :  { %v1348_v47 = vld [vmem:[#allocation3 + $0x560] sm:$0xff]  ;;  %2802 = vmatpush1.bf16.msra.mxu1 %v4749_v50 }
 0x36e   :  { %v4742_v52 = vcombine.high %v1344_v46, %v1348_v47  ;;  %v1208_v53 = vld [vmem:[#allocation3 + $0x100] sm:$0xff]  ;;  %2762 = vmatprep.subr.bf16.mxu0 %v4614_v51  ;;  %v4741_v57 = vcombine.low %v1344_v46, %v1348_v47 }
 0x36f   :  { %v1212_v55 = vld [vmem:[#allocation3 + $0x120] sm:$0xff]  ;;  %2763 = vmatpush1.bf16.msra.mxu0 %v4613_v48 }
 0x370   :  { %v1336_v56 = vld [vmem:[#allocation3 + $0x500] sm:$0xff]  ;;  %v4606_v58 = vcombine.high %v1208_v53, %v1212_v55  ;;  %2803 = vmatprep.subr.bf16.mxu1 %v4742_v52  ;;  %v4605_v3 = vcombine.low %v1208_v53, %v1212_v55 }
 0x371   :  { %v1340_v44 = vld [vmem:[#allocation3 + $0x520] sm:$0xff]  ;;  %2804 = vmatpush1.bf16.msra.mxu1 %v4741_v57 }
 0x372   :  { %v4734_v59 = vcombine.high %v1336_v56, %v1340_v44  ;;  %v1200_v60 = vld [vmem:[#allocation3 + $0xc0] sm:$0xff]  ;;  %2764 = vmatprep.subr.bf16.mxu0 %v4606_v58  ;;  %v4733_v54 = vcombine.low %v1336_v56, %v1340_v44 }
 0x373   :  { %v1204_v62 = vld [vmem:[#allocation3 + $0xe0] sm:$0xff]  ;;  %2765 = vmatpush1.bf16.msra.mxu0 %v4605_v3 }
 0x374   :  { %v1328_v0 = vld [vmem:[#allocation3 + $0x4c0] sm:$0xff]  ;;  %v4598_v7 = vcombine.high %v1200_v60, %v1204_v62  ;;  %2805 = vmatprep.subr.bf16.mxu1 %v4734_v59  ;;  %v4597_v11 = vcombine.low %v1200_v60, %v1204_v62 }
 0x375   :  { %v1332_v1 = vld [vmem:[#allocation3 + $0x4e0] sm:$0xff]  ;;  %2806 = vmatpush1.bf16.msra.mxu1 %v4733_v54 }
 0x376   :  { %v4726_v8 = vcombine.high %v1328_v0, %v1332_v1  ;;  %v1192_v2 = vld [vmem:[#allocation3 + $0x80] sm:$0xff]  ;;  %2766 = vmatprep.subr.bf16.mxu0 %v4598_v7  ;;  %v4725_v12 = vcombine.low %v1328_v0, %v1332_v1 }
 0x377   :  { %v1196_v4 = vld [vmem:[#allocation3 + $0xa0] sm:$0xff]  ;;  %2767 = vmatpush1.bf16.msra.mxu0 %v4597_v11 }
 0x378   :  { %v1320_v9 = vld [vmem:[#allocation3 + $0x480] sm:$0xff]  ;;  %v4590_v15 = vcombine.high %v1192_v2, %v1196_v4  ;;  %2807 = vmatprep.subr.bf16.mxu1 %v4726_v8  ;;  %v4589_v13 = vcombine.low %v1192_v2, %v1196_v4 }
 0x379   :  { %v1324_v10 = vld [vmem:[#allocation3 + $0x4a0] sm:$0xff]  ;;  %2808 = vmatpush1.bf16.msra.mxu1 %v4725_v12 }
 0x37a   :  { %v4718_v16 = vcombine.high %v1320_v9, %v1324_v10  ;;  %v1184_v17 = vld [vmem:[#allocation3 + $0x40] sm:$0xff]  ;;  %2768 = vmatprep.subr.bf16.mxu0 %v4590_v15  ;;  %v4717_v14 = vcombine.low %v1320_v9, %v1324_v10 }
 0x37b   :  { %v1188_v18 = vld [vmem:[#allocation3 + $0x60] sm:$0xff]  ;;  %2769 = vmatpush1.bf16.msra.mxu0 %v4589_v13 }
 0x37c   :  { %v1312_v5 = vld [vmem:[#allocation3 + $0x440] sm:$0xff]  ;;  %v4582_v20 = vcombine.high %v1184_v17, %v1188_v18  ;;  %2809 = vmatprep.subr.bf16.mxu1 %v4718_v16  ;;  %v4581_v30 = vcombine.low %v1184_v17, %v1188_v18 }
 0x37d   :  { %v1316_v6 = vld [vmem:[#allocation3 + $0x460] sm:$0xff]  ;;  %2810 = vmatpush1.bf16.msra.mxu1 %v4717_v14 }
 0x37e   :  { %v4710_v22 = vcombine.high %v1312_v5, %v1316_v6  ;;  %v1176_v26 = vld [vmem:[#allocation3] sm:$0xff]  ;;  %2770 = vmatprep.subr.bf16.mxu0 %v4582_v20  ;;  %v4709_v31 = vcombine.low %v1312_v5, %v1316_v6 }
 0x37f   :  { %v1180_v27 = vld [vmem:[#allocation3 + $0x20] sm:$0xff]  ;;  %2771 = vmatpush1.bf16.msra.mxu0 %v4581_v30 }
 0x380   :  { %v1304_v28 = vld [vmem:[#allocation3 + $0x400] sm:$0xff]  ;;  %v4574_v32 = vcombine.high %v1176_v26, %v1180_v27  ;;  %2811 = vmatprep.subr.bf16.mxu1 %v4710_v22  ;;  %v4573_v41 = vcombine.low %v1176_v26, %v1180_v27 }
 0x381   :  { %v1308_v29 = vld [vmem:[#allocation3 + $0x420] sm:$0xff]  ;;  %2812 = vmatpush1.bf16.msra.mxu1 %v4709_v31 }
 0x382   :  { %v4702_v33 = vcombine.high %v1304_v28, %v1308_v29  ;;  %v1296_v34 = vld [vmem:[#allocation3 + $0x3c0] sm:$0xff]  ;;  %2772 = vmatprep.subr.bf16.mxu0 %v4574_v32  ;;  %v4701_v42 = vcombine.low %v1304_v28, %v1308_v29 }
 0x383   :  { %v1300_v35 = vld [vmem:[#allocation3 + $0x3e0] sm:$0xff]  ;;  %2773 = vmatpush1.bf16.msra.mxu0 %v4573_v41 }
 0x384   :  { %v1424_v36 = vld [vmem:[#allocation3 + $0x7c0] sm:$0xff]  ;;  %v4694_v43 = vcombine.high %v1296_v34, %v1300_v35  ;;  %2813 = vmatprep.subr.bf16.mxu1 %v4702_v33  ;;  %v4693_v51 = vcombine.low %v1296_v34, %v1300_v35 }
 0x385   :  { %v1428_v39 = vld [vmem:[#allocation3 + $0x7e0] sm:$0xff]  ;;  %2814 = vmatpush1.bf16.msra.mxu1 %v4701_v42 }
 0x386   :  { %v4822_v45 = vcombine.high %v1424_v36, %v1428_v39  ;;  %v1288_v46 = vld [vmem:[#allocation3 + $0x380] sm:$0xff]  ;;  %2774 = vmatprep.subr.bf16.mxu0 %v4694_v43  ;;  %v4821_v52 = vcombine.low %v1424_v36, %v1428_v39 }
 0x387   :  { %v1292_v47 = vld [vmem:[#allocation3 + $0x3a0] sm:$0xff]  ;;  %2775 = vmatpush2.bf16.msra.mxu0 %v4693_v51  ;;  %v1361_v51 = vld [vmem:[#allocation3 + $0x5c8] sm:$0xff] }
 0x388   :  { %v1416_v49 = vld [vmem:[#allocation3 + $0x780] sm:$0xff]  ;;  %v4686_v53 = vcombine.high %v1288_v46, %v1292_v47  ;;  %2815 = vmatprep.subr.bf16.mxu1 %v4822_v45  ;;  %v4685_v58 = vcombine.low %v1288_v46, %v1292_v47 }
 0x389   :  { %v1420_v50 = vld [vmem:[#allocation3 + $0x7a0] sm:$0xff]  ;;  %2816 = vmatpush2.bf16.msra.mxu1 %v4821_v52  ;;  %v1365_v52 = vld [vmem:[#allocation3 + $0x5e8] sm:$0xff] }
 0x38a   :  { %v4814_v55 = vcombine.high %v1416_v49, %v1420_v50  ;;  %v1280_v56 = vld [vmem:[#allocation3 + $0x340] sm:$0xff]  ;;  %2776 = vmatprep.subr.bf16.mxu0 %v4686_v53  ;;  %v4813_v59 = vcombine.low %v1416_v49, %v1420_v50  ;;  %v1233_v49 = vld [vmem:[#allocation3 + $0x1c8] sm:$0xff] }
 0x38b   :  { %v1284_v44 = vld [vmem:[#allocation3 + $0x360] sm:$0xff]  ;;  %2777 = vmatpush2.bf16.msra.mxu0 %v4685_v58  ;;  %v1237_v50 = vld [vmem:[#allocation3 + $0x1e8] sm:$0xff]  ;;  %v5680_v58 = vpack.c.bf16 %v5668_v19, %v5668_v19 }
 0x38c   :  { %v1408_v48 = vld [vmem:[#allocation3 + $0x740] sm:$0xff]  ;;  %v4678_v60 = vcombine.high %v1280_v56, %v1284_v44  ;;  %2817 = vmatprep.subr.bf16.mxu1 %v4814_v55  ;;  %v4677_v7 = vcombine.low %v1280_v56, %v1284_v44  ;;  %v4632_v56 = vcombine.high %v1233_v49, %v1237_v50  ;;  %v4760_v44 = vcombine.high %v1361_v51, %v1365_v52  ;;  %v1345_v19 = vld [vmem:[#allocation3 + $0x548] sm:$0xff] }
 0x38d   :  { %v1412_v57 = vld [vmem:[#allocation3 + $0x760] sm:$0xff]  ;;  %2818 = vmatpush2.bf16.msra.mxu1 %v4813_v59  ;;  %v1353_v59 = vld [vmem:[#allocation3 + $0x588] sm:$0xff] }
 0x38e   :  { %v4806_v62 = vcombine.high %v1408_v48, %v1412_v57  ;;  %v1272_v0 = vld [vmem:[#allocation3 + $0x300] sm:$0xff]  ;;  %2778 = vmatprep.subr.bf16.mxu0 %v4678_v60  ;;  %v4805_v8 = vcombine.low %v1408_v48, %v1412_v57  ;;  %v1225_v48 = vld [vmem:[#allocation3 + $0x188] sm:$0xff] }
 0x38f   :  { %v1276_v1 = vld [vmem:[#allocation3 + $0x320] sm:$0xff]  ;;  %2779 = vmatpush2.bf16.msra.mxu0 %v4677_v7  ;;  %v1229_v57 = vld [vmem:[#allocation3 + $0x1a8] sm:$0xff] }
 0x390   :  { %v1400_v3 = vld [vmem:[#allocation3 + $0x700] sm:$0xff]  ;;  %v4670_v2 = vcombine.high %v1272_v0, %v1276_v1  ;;  %2819 = vmatprep.subr.bf16.mxu1 %v4806_v62  ;;  %v4669_v15 = vcombine.low %v1272_v0, %v1276_v1  ;;  %v1357_v60 = vld [vmem:[#allocation3 + $0x5a8] sm:$0xff]  ;;  %v5684_v62 = vpack.c.bf16 %v5670_v21, %v5670_v21  ;;  %v4631_v0 = vcombine.low %v1233_v49, %v1237_v50 }
 0x391   :  { %v1404_v54 = vld [vmem:[#allocation3 + $0x720] sm:$0xff]  ;;  %2820 = vmatpush2.bf16.msra.mxu1 %v4805_v8  ;;  %v4759_v1 = vcombine.low %v1361_v51, %v1365_v52  ;;  %v1217_v7 = vld [vmem:[#allocation3 + $0x148] sm:$0xff]  ;;  %v4751_v21 = vcombine.low %v1353_v59, %v1357_v60 }
 0x392   :  { %v4798_v4 = vcombine.high %v1400_v3, %v1404_v54  ;;  %v1264_v9 = vld [vmem:[#allocation3 + $0x2c0] sm:$0xff]  ;;  %2780 = vmatprep.subr.bf16.mxu0 %v4670_v2  ;;  %v4797_v16 = vcombine.low %v1400_v3, %v1404_v54  ;;  %v4624_v3 = vcombine.high %v1225_v48, %v1229_v57  ;;  %v4752_v54 = vcombine.high %v1353_v59, %v1357_v60  ;;  %v1221_v8 = vld [vmem:[#allocation3 + $0x168] sm:$0xff] }
 0x393   :  { %v1268_v10 = vld [vmem:[#allocation3 + $0x2e0] sm:$0xff]  ;;  %2781 = vmatpush2.bf16.msra.mxu0 %v4669_v15  ;;  %v1349_v2 = vld [vmem:[#allocation3 + $0x568] sm:$0xff] }
 0x394   :  { %v1392_v11 = vld [vmem:[#allocation3 + $0x6c0] sm:$0xff]  ;;  %v4662_v17 = vcombine.high %v1264_v9, %v1268_v10  ;;  %2821 = vmatprep.subr.bf16.mxu1 %v4798_v4  ;;  %v4661_v20 = vcombine.low %v1264_v9, %v1268_v10  ;;  %v4623_v4 = vcombine.low %v1225_v48, %v1229_v57  ;;  %v4616_v9 = vcombine.high %v1217_v7, %v1221_v8  ;;  %v1337_v15 = vld [vmem:[#allocation3 + $0x508] sm:$0xff] }
 0x395   :  { %v1396_v12 = vld [vmem:[#allocation3 + $0x6e0] sm:$0xff]  ;;  %2822 = vmatpush2.bf16.msra.mxu1 %v4797_v16  ;;  %v4744_v10 = vcombine.high %v1345_v19, %v1349_v2  ;;  %v1341_v16 = vld [vmem:[#allocation3 + $0x528] sm:$0xff] }
 0x396   :  { %v4790_v18 = vcombine.high %v1392_v11, %v1396_v12  ;;  %v1256_v5 = vld [vmem:[#allocation3 + $0x280] sm:$0xff]  ;;  %2782 = vmatprep.subr.bf16.mxu0 %v4662_v17  ;;  %v4789_v22 = vcombine.low %v1392_v11, %v1396_v12  ;;  %v1209_v11 = vld [vmem:[#allocation3 + $0x108] sm:$0xff]  ;;  %v4615_v17 = vcombine.low %v1217_v7, %v1221_v8 }
 0x397   :  { %v1260_v6 = vld [vmem:[#allocation3 + $0x2a0] sm:$0xff]  ;;  %2783 = vmatpush2.bf16.msra.mxu0 %v4661_v20  ;;  %v1213_v12 = vld [vmem:[#allocation3 + $0x128] sm:$0xff] }
 0x398   :  { %v1384_v13 = vld [vmem:[#allocation3 + $0x680] sm:$0xff]  ;;  %v4654_v26 = vcombine.high %v1256_v5, %v1260_v6  ;;  %2823 = vmatprep.subr.bf16.mxu1 %v4790_v18  ;;  %v4653_v32 = vcombine.low %v1256_v5, %v1260_v6  ;;  %v4743_v18 = vcombine.low %v1345_v19, %v1349_v2  ;;  %v4608_v5 = vcombine.high %v1209_v11, %v1213_v12  ;;  %v1329_v20 = vld [vmem:[#allocation3 + $0x4c8] sm:$0xff] }
 0x399   :  { %v1388_v14 = vld [vmem:[#allocation3 + $0x6a0] sm:$0xff]  ;;  %2824 = vmatpush2.bf16.msra.mxu1 %v4789_v22  ;;  %v4736_v6 = vcombine.high %v1337_v15, %v1341_v16  ;;  %v1333_v22 = vld [vmem:[#allocation3 + $0x4e8] sm:$0xff] }
 0x39a   :  { %v4782_v27 = vcombine.high %v1384_v13, %v1388_v14  ;;  %v1248_v28 = vld [vmem:[#allocation3 + $0x240] sm:$0xff]  ;;  %2784 = vmatprep.subr.bf16.mxu0 %v4654_v26  ;;  %v4781_v33 = vcombine.low %v1384_v13, %v1388_v14  ;;  %v1201_v13 = vld [vmem:[#allocation3 + $0xc8] sm:$0xff]  ;;  %v4607_v26 = vcombine.low %v1209_v11, %v1213_v12 }
 0x39b   :  { %v1252_v29 = vld [vmem:[#allocation3 + $0x260] sm:$0xff]  ;;  %2785 = vmatpush2.bf16.msra.mxu0 %v4653_v32  ;;  %v1205_v14 = vld [vmem:[#allocation3 + $0xe8] sm:$0xff] }
 0x39c   :  { %v1376_v30 = vld [vmem:[#allocation3 + $0x640] sm:$0xff]  ;;  %v4646_v34 = vcombine.high %v1248_v28, %v1252_v29  ;;  %2825 = vmatprep.subr.bf16.mxu1 %v4782_v27  ;;  %v4645_v43 = vcombine.low %v1248_v28, %v1252_v29  ;;  %v4735_v27 = vcombine.low %v1337_v15, %v1341_v16  ;;  %v4600_v28 = vcombine.high %v1201_v13, %v1205_v14  ;;  %v1321_v32 = vld [vmem:[#allocation3 + $0x488] sm:$0xff] }
 0x39d   :  { %v1380_v31 = vld [vmem:[#allocation3 + $0x660] sm:$0xff]  ;;  %2826 = vmatpush2.bf16.msra.mxu1 %v4781_v33  ;;  %v4728_v29 = vcombine.high %v1329_v20, %v1333_v22  ;;  %v1325_v33 = vld [vmem:[#allocation3 + $0x4a8] sm:$0xff] }
 0x39e   :  { %v4774_v35 = vcombine.high %v1376_v30, %v1380_v31  ;;  %v1240_v36 = vld [vmem:[#allocation3 + $0x200] sm:$0xff]  ;;  %2786 = vmatprep.subr.bf16.mxu0 %v4646_v34  ;;  %v4773_v45 = vcombine.low %v1376_v30, %v1380_v31  ;;  %v1193_v30 = vld [vmem:[#allocation3 + $0x88] sm:$0xff]  ;;  %v4599_v34 = vcombine.low %v1201_v13, %v1205_v14 }
 0x39f   :  { %v1244_v39 = vld [vmem:[#allocation3 + $0x220] sm:$0xff]  ;;  %2787 = vmatpush2.bf16.msra.mxu0 %v4645_v43  ;;  %v1197_v31 = vld [vmem:[#allocation3 + $0xa8] sm:$0xff] }
 0x3a0   :  { %v1368_v41 = vld [vmem:[#allocation3 + $0x600] sm:$0xff]  ;;  %v4638_v46 = vcombine.high %v1240_v36, %v1244_v39  ;;  %2827 = vmatprep.subr.bf16.mxu1 %v4774_v35  ;;  %v4637_v53 = vcombine.low %v1240_v36, %v1244_v39  ;;  %v4727_v35 = vcombine.low %v1329_v20, %v1333_v22  ;;  %v4592_v36 = vcombine.high %v1193_v30, %v1197_v31  ;;  %v1313_v43 = vld [vmem:[#allocation3 + $0x448] sm:$0xff] }
 0x3a1   :  { %v1372_v42 = vld [vmem:[#allocation3 + $0x620] sm:$0xff]  ;;  %2828 = vmatpush2.bf16.msra.mxu1 %v4773_v45  ;;  %v4720_v39 = vcombine.high %v1321_v32, %v1325_v33  ;;  %v1317_v45 = vld [vmem:[#allocation3 + $0x468] sm:$0xff] }
 0x3a2   :  { %v4766_v47 = vcombine.high %v1368_v41, %v1372_v42  ;;  %2788 = vmatprep.subr.bf16.mxu0 %v4638_v46  ;;  %v4765_v55 = vcombine.low %v1368_v41, %v1372_v42  ;;  %v1185_v41 = vld [vmem:[#allocation3 + $0x48] sm:$0xff]  ;;  %v4591_v46 = vcombine.low %v1193_v30, %v1197_v31  ;;  %v4712_v50 = vcombine.high %v1313_v43, %v1317_v45 }
 0x3a3   :  { %2789 = vmatpush2.bf16.msra.mxu0 %v4637_v53  ;;  %v1189_v42 = vld [vmem:[#allocation3 + $0x68] sm:$0xff] }
 0x3a4   :  { %2829 = vmatprep.subr.bf16.mxu1 %v4766_v47  ;;  %2840 = vmatprep.subr.bf16.mxu0 %v4632_v56  ;;  %v4719_v47 = vcombine.low %v1321_v32, %v1325_v33  ;;  %v4584_v49 = vcombine.high %v1185_v41, %v1189_v42  ;;  %v1177_v51 = vld [vmem:[#allocation3 + $0x8] sm:$0xff]  ;;  %v4583_v56 = vcombine.low %v1185_v41, %v1189_v42 }
 0x3a5   :  { %2830 = vmatpush2.bf16.msra.mxu1 %v4765_v55  ;;  %v1181_v52 = vld [vmem:[#allocation3 + $0x28] sm:$0xff] }
 0x3a6   :  { %2881 = vmatprep.subr.bf16.mxu1 %v4760_v44  ;;  %2791 = vmatmul.mubr.bf16.vlgmr.msra.gmra.mxu0 %v5680_v58  ;;  %v1305_v53 = vld [vmem:[#allocation3 + $0x408] sm:$0xff]  ;;  %v4711_v44 = vcombine.low %v1313_v43, %v1317_v45  ;;  %v4576_v48 = vcombine.high %v1177_v51, %v1181_v52 }
 0x3a7   :  { %2841 = vmatpush1.bf16.msra.mxu0 %v4631_v0  ;;  %2872 = vmatprep.mubr.bf16.mxu0 %v5672_v23  ;;  %v1309_v55 = vld [vmem:[#allocation3 + $0x428] sm:$0xff] }
 0x3a8   :  { %2832 = vmatmul.mubr.bf16.vlgmr.msra.gmra.mxu1 %v5684_v62  ;;  %2842 = vmatprep.subr.bf16.mxu0 %v4624_v3  ;;  %v4704_v57 = vcombine.high %v1305_v53, %v1309_v55  ;;  %v1297_v59 = vld [vmem:[#allocation3 + $0x3c8] sm:$0xff]  ;;  %v4575_v3 = vcombine.low %v1177_v51, %v1181_v52 }
 0x3a9   :  { %2882 = vmatpush1.bf16.msra.mxu1 %v4759_v1  ;;  %2913 = vmatprep.mubr.bf16.mxu1 %v5674_v24  ;;  %v1301_v60 = vld [vmem:[#allocation3 + $0x3e8] sm:$0xff] }
 0x3aa   :  { %2883 = vmatprep.subr.bf16.mxu1 %v4752_v54  ;;  %v1425_v0 = vld [vmem:[#allocation3 + $0x7c8] sm:$0xff]  ;;  %v4703_v54 = vcombine.low %v1305_v53, %v1309_v55  ;;  %v4696_v7 = vcombine.high %v1297_v59, %v1301_v60 }
 0x3ab   :  { %2843 = vmatpush1.bf16.msra.mxu0 %v4623_v4  ;;  %v1429_v1 = vld [vmem:[#allocation3 + $0x7e8] sm:$0xff] }
 0x3ac   :  { %2844 = vmatprep.subr.bf16.mxu0 %v4616_v9  ;;  %v4824_v8 = vcombine.high %v1425_v0, %v1429_v1  ;;  %v1289_v19 = vld [vmem:[#allocation3 + $0x388] sm:$0xff]  ;;  %v4695_v9 = vcombine.low %v1297_v59, %v1301_v60 }
 0x3ad   :  { %2884 = vmatpush1.bf16.msra.mxu1 %v4751_v21  ;;  %v1293_v2 = vld [vmem:[#allocation3 + $0x3a8] sm:$0xff] }
 0x3ae   :  { %2885 = vmatprep.subr.bf16.mxu1 %v4744_v10  ;;  %v1417_v4 = vld [vmem:[#allocation3 + $0x788] sm:$0xff]  ;;  %v4823_v10 = vcombine.low %v1425_v0, %v1429_v1  ;;  %v4688_v11 = vcombine.high %v1289_v19, %v1293_v2 }
 0x3af   :  { %2845 = vmatpush1.bf16.msra.mxu0 %v4615_v17  ;;  %v1421_v21 = vld [vmem:[#allocation3 + $0x7a8] sm:$0xff] }
 0x3b0   :  { %2846 = vmatprep.subr.bf16.mxu0 %v4608_v5  ;;  %v4816_v12 = vcombine.high %v1417_v4, %v1421_v21  ;;  %v1281_v15 = vld [vmem:[#allocation3 + $0x348] sm:$0xff]  ;;  %v4687_v5 = vcombine.low %v1289_v19, %v1293_v2 }
 0x3b1   :  { %2886 = vmatpush1.bf16.msra.mxu1 %v4743_v18  ;;  %v1285_v16 = vld [vmem:[#allocation3 + $0x368] sm:$0xff] }
 0x3b2   :  { %2887 = vmatprep.subr.bf16.mxu1 %v4736_v6  ;;  %v1409_v17 = vld [vmem:[#allocation3 + $0x748] sm:$0xff]  ;;  %v4815_v6 = vcombine.low %v1417_v4, %v1421_v21  ;;  %v4680_v13 = vcombine.high %v1281_v15, %v1285_v16  ;;  %v1234_v4 = vld [vmem:[#allocation3 + $0x1d0] sm:$0xff] }
 0x3b3   :  { %2847 = vmatpush1.bf16.msra.mxu0 %v4607_v26  ;;  %v1413_v18 = vld [vmem:[#allocation3 + $0x768] sm:$0xff]  ;;  %v1238_v21 = vld [vmem:[#allocation3 + $0x1f0] sm:$0xff] }
 0x3b4   :  { %2848 = vmatprep.subr.bf16.mxu0 %v4600_v28  ;;  %v4808_v14 = vcombine.high %v1409_v17, %v1413_v18  ;;  %v1273_v20 = vld [vmem:[#allocation3 + $0x308] sm:$0xff]  ;;  %v4679_v28 = vcombine.low %v1281_v15, %v1285_v16  ;;  %v4634_v15 = vcombine.high %v1234_v4, %v1238_v21 }
 0x3b5   :  { %2888 = vmatpush1.bf16.msra.mxu1 %v4735_v27  ;;  %v1277_v22 = vld [vmem:[#allocation3 + $0x328] sm:$0xff] }
 0x3b6   :  { %2889 = vmatprep.subr.bf16.mxu1 %v4728_v29  ;;  %v1401_v26 = vld [vmem:[#allocation3 + $0x708] sm:$0xff]  ;;  %v4807_v29 = vcombine.low %v1409_v17, %v1413_v18  ;;  %v4672_v30 = vcombine.high %v1273_v20, %v1277_v22  ;;  %v1226_v17 = vld [vmem:[#allocation3 + $0x190] sm:$0xff] }
 0x3b7   :  { %2849 = vmatpush1.bf16.msra.mxu0 %v4599_v34  ;;  %v1405_v27 = vld [vmem:[#allocation3 + $0x728] sm:$0xff]  ;;  %v1230_v18 = vld [vmem:[#allocation3 + $0x1b0] sm:$0xff] }
 0x3b8   :  { %2850 = vmatprep.subr.bf16.mxu0 %v4592_v36  ;;  %v4800_v31 = vcombine.high %v1401_v26, %v1405_v27  ;;  %v1265_v32 = vld [vmem:[#allocation3 + $0x2c8] sm:$0xff]  ;;  %v4671_v36 = vcombine.low %v1273_v20, %v1277_v22  ;;  %v4626_v20 = vcombine.high %v1226_v17, %v1230_v18 }
 0x3b9   :  { %2890 = vmatpush1.bf16.msra.mxu1 %v4727_v35  ;;  %v1269_v33 = vld [vmem:[#allocation3 + $0x2e8] sm:$0xff] }
 0x3ba   :  { %2891 = vmatprep.subr.bf16.mxu1 %v4720_v39  ;;  %v1393_v34 = vld [vmem:[#allocation3 + $0x6c8] sm:$0xff]  ;;  %v4799_v39 = vcombine.low %v1401_v26, %v1405_v27  ;;  %v4664_v41 = vcombine.high %v1265_v32, %v1269_v33  ;;  %v1218_v26 = vld [vmem:[#allocation3 + $0x150] sm:$0xff] }
 0x3bb   :  { %2851 = vmatpush1.bf16.msra.mxu0 %v4591_v46  ;;  %v1397_v35 = vld [vmem:[#allocation3 + $0x6e8] sm:$0xff]  ;;  %v1222_v27 = vld [vmem:[#allocation3 + $0x170] sm:$0xff] }
 0x3bc   :  { %2852 = vmatprep.subr.bf16.mxu0 %v4584_v49  ;;  %v4792_v42 = vcombine.high %v1393_v34, %v1397_v35  ;;  %v1257_v43 = vld [vmem:[#allocation3 + $0x288] sm:$0xff]  ;;  %v4663_v49 = vcombine.low %v1265_v32, %v1269_v33  ;;  %v4618_v32 = vcombine.high %v1218_v26, %v1222_v27 }
 0x3bd   :  { %2892 = vmatpush1.bf16.msra.mxu1 %v4719_v47  ;;  %v1261_v45 = vld [vmem:[#allocation3 + $0x2a8] sm:$0xff] }
 0x3be   :  { %2893 = vmatprep.subr.bf16.mxu1 %v4712_v50  ;;  %v1385_v46 = vld [vmem:[#allocation3 + $0x688] sm:$0xff]  ;;  %v4791_v50 = vcombine.low %v1393_v34, %v1397_v35  ;;  %v4656_v51 = vcombine.high %v1257_v43, %v1261_v45  ;;  %v1210_v34 = vld [vmem:[#allocation3 + $0x110] sm:$0xff] }
 0x3bf   :  { %2853 = vmatpush1.bf16.msra.mxu0 %v4583_v56  ;;  %v1389_v47 = vld [vmem:[#allocation3 + $0x6a8] sm:$0xff]  ;;  %v1214_v35 = vld [vmem:[#allocation3 + $0x130] sm:$0xff] }
 0x3c0   :  { %2854 = vmatprep.subr.bf16.mxu0 %v4576_v48  ;;  %v4784_v52 = vcombine.high %v1385_v46, %v1389_v47  ;;  %v1249_v53 = vld [vmem:[#allocation3 + $0x248] sm:$0xff]  ;;  %v4655_v48 = vcombine.low %v1257_v43, %v1261_v45  ;;  %v4610_v43 = vcombine.high %v1210_v34, %v1214_v35 }
 0x3c1   :  { %2894 = vmatpush1.bf16.msra.mxu1 %v4711_v44  ;;  %v1253_v55 = vld [vmem:[#allocation3 + $0x268] sm:$0xff] }
 0x3c2   :  { %2895 = vmatprep.subr.bf16.mxu1 %v4704_v57  ;;  %v1377_v56 = vld [vmem:[#allocation3 + $0x648] sm:$0xff]  ;;  %v4783_v57 = vcombine.low %v1385_v46, %v1389_v47  ;;  %v4648_v59 = vcombine.high %v1249_v53, %v1253_v55  ;;  %v1202_v46 = vld [vmem:[#allocation3 + $0xd0] sm:$0xff] }
 0x3c3   :  { %2855 = vmatpush1.bf16.msra.mxu0 %v4575_v3  ;;  %v1381_v44 = vld [vmem:[#allocation3 + $0x668] sm:$0xff]  ;;  %v1206_v47 = vld [vmem:[#allocation3 + $0xf0] sm:$0xff] }
 0x3c4   :  { %2856 = vmatprep.subr.bf16.mxu0 %v4696_v7  ;;  %v4776_v60 = vcombine.high %v1377_v56, %v1381_v44  ;;  %v1241_v0 = vld [vmem:[#allocation3 + $0x208] sm:$0xff]  ;;  %v4647_v7 = vcombine.low %v1249_v53, %v1253_v55  ;;  %v4602_v53 = vcombine.high %v1202_v46, %v1206_v47 }
 0x3c5   :  { %2896 = vmatpush1.bf16.msra.mxu1 %v4703_v54  ;;  %v1245_v1 = vld [vmem:[#allocation3 + $0x228] sm:$0xff] }
 0x3c6   :  { %2897 = vmatprep.subr.bf16.mxu1 %v4824_v8  ;;  %v1369_v3 = vld [vmem:[#allocation3 + $0x608] sm:$0xff]  ;;  %v4775_v8 = vcombine.low %v1377_v56, %v1381_v44  ;;  %v4640_v19 = vcombine.high %v1241_v0, %v1245_v1  ;;  %v1194_v56 = vld [vmem:[#allocation3 + $0x90] sm:$0xff] }
 0x3c7   :  { %2857 = vmatpush2.bf16.msra.mxu0 %v4695_v9  ;;  %v1373_v54 = vld [vmem:[#allocation3 + $0x628] sm:$0xff]  ;;  %v1362_v9 = vld [vmem:[#allocation3 + $0x5d0] sm:$0xff] }
 0x3c8   :  { %2858 = vmatprep.subr.bf16.mxu0 %v4688_v11  ;;  %v4768_v2 = vcombine.high %v1369_v3, %v1373_v54  ;;  %v4639_v11 = vcombine.low %v1241_v0, %v1245_v1  ;;  %v1198_v44 = vld [vmem:[#allocation3 + $0xb0] sm:$0xff] }
 0x3c9   :  { %2898 = vmatpush2.bf16.msra.mxu1 %v4823_v10  ;;  %v1366_v10 = vld [vmem:[#allocation3 + $0x5f0] sm:$0xff]  ;;  %v4594_v0 = vcombine.high %v1194_v56, %v1198_v44 }
 0x3ca   :  { %2899 = vmatprep.subr.bf16.mxu1 %v4816_v12  ;;  %v4767_v12 = vcombine.low %v1369_v3, %v1373_v54  ;;  %v4762_v16 = vcombine.high %v1362_v9, %v1366_v10  ;;  %v1186_v3 = vld [vmem:[#allocation3 + $0x50] sm:$0xff] }
 0x3cb   :  { %2859 = vmatpush2.bf16.msra.mxu0 %v4687_v5  ;;  %v1354_v5 = vld [vmem:[#allocation3 + $0x590] sm:$0xff] }
 0x3cc   :  { %2860 = vmatprep.subr.bf16.mxu0 %v4680_v13  ;;  %v4633_v13 = vcombine.low %v1234_v4, %v1238_v21  ;;  %v1190_v54 = vld [vmem:[#allocation3 + $0x70] sm:$0xff] }
 0x3cd   :  { %2900 = vmatpush2.bf16.msra.mxu1 %v4815_v6  ;;  %v1358_v6 = vld [vmem:[#allocation3 + $0x5b0] sm:$0xff]  ;;  %v4586_v4 = vcombine.high %v1186_v3, %v1190_v54 }
 0x3ce   :  { %2901 = vmatprep.subr.bf16.mxu1 %v4808_v14  ;;  %v4761_v14 = vcombine.low %v1362_v9, %v1366_v10  ;;  %v4754_v22 = vcombine.high %v1354_v5, %v1358_v6  ;;  %v1178_v9 = vld [vmem:[#allocation3 + $0x10] sm:$0xff] }
 0x3cf   :  { %2861 = vmatpush2.bf16.msra.mxu0 %v4679_v28  ;;  %v1346_v28 = vld [vmem:[#allocation3 + $0x550] sm:$0xff] }
 0x3d0   :  { %2862 = vmatprep.subr.bf16.mxu0 %v4672_v30  ;;  %v4625_v30 = vcombine.low %v1226_v17, %v1230_v18  ;;  %v1182_v10 = vld [vmem:[#allocation3 + $0x30] sm:$0xff] }
 0x3d1   :  { %2902 = vmatpush2.bf16.msra.mxu1 %v4807_v29  ;;  %v1350_v29 = vld [vmem:[#allocation3 + $0x570] sm:$0xff]  ;;  %v4578_v17 = vcombine.high %v1178_v9, %v1182_v10 }
 0x3d2   :  { %2903 = vmatprep.subr.bf16.mxu1 %v4800_v31  ;;  %v4753_v31 = vcombine.low %v1354_v5, %v1358_v6  ;;  %v4746_v33 = vcombine.high %v1346_v28, %v1350_v29  ;;  %v1298_v5 = vld [vmem:[#allocation3 + $0x3d0] sm:$0xff] }
 0x3d3   :  { %2863 = vmatpush2.bf16.msra.mxu0 %v4671_v36  ;;  %v1338_v36 = vld [vmem:[#allocation3 + $0x510] sm:$0xff] }
 0x3d4   :  { %2864 = vmatprep.subr.bf16.mxu0 %v4664_v41  ;;  %v4617_v41 = vcombine.low %v1218_v26, %v1222_v27  ;;  %v1302_v6 = vld [vmem:[#allocation3 + $0x3f0] sm:$0xff] }
 0x3d5   :  { %2904 = vmatpush2.bf16.msra.mxu1 %v4799_v39  ;;  %v1342_v39 = vld [vmem:[#allocation3 + $0x530] sm:$0xff]  ;;  %v4698_v26 = vcombine.high %v1298_v5, %v1302_v6 }
 0x3d6   :  { %2905 = vmatprep.subr.bf16.mxu1 %v4792_v42  ;;  %v4745_v42 = vcombine.low %v1346_v28, %v1350_v29  ;;  %v4738_v45 = vcombine.high %v1338_v36, %v1342_v39  ;;  %v1290_v28 = vld [vmem:[#allocation3 + $0x390] sm:$0xff] }
 0x3d7   :  { %2865 = vmatpush2.bf16.msra.mxu0 %v4663_v49  ;;  %v1330_v49 = vld [vmem:[#allocation3 + $0x4d0] sm:$0xff] }
 0x3d8   :  { %2866 = vmatprep.subr.bf16.mxu0 %v4656_v51  ;;  %v4609_v51 = vcombine.low %v1210_v34, %v1214_v35  ;;  %v1294_v29 = vld [vmem:[#allocation3 + $0x3b0] sm:$0xff] }
 0x3d9   :  { %2906 = vmatpush2.bf16.msra.mxu1 %v4791_v50  ;;  %v1334_v50 = vld [vmem:[#allocation3 + $0x4f0] sm:$0xff]  ;;  %v4690_v34 = vcombine.high %v1290_v28, %v1294_v29 }
 0x3da   :  { %2907 = vmatprep.subr.bf16.mxu1 %v4784_v52  ;;  %v4737_v52 = vcombine.low %v1338_v36, %v1342_v39  ;;  %v4730_v55 = vcombine.high %v1330_v49, %v1334_v50  ;;  %v1282_v36 = vld [vmem:[#allocation3 + $0x350] sm:$0xff] }
 0x3db   :  { %2867 = vmatpush2.bf16.msra.mxu0 %v4655_v48  ;;  %v1322_v48 = vld [vmem:[#allocation3 + $0x490] sm:$0xff] }
 0x3dc   :  { %2868 = vmatprep.subr.bf16.mxu0 %v4648_v59  ;;  %v4601_v59 = vcombine.low %v1202_v46, %v1206_v47  ;;  %v1286_v39 = vld [vmem:[#allocation3 + $0x370] sm:$0xff] }
 0x3dd   :  { %2908 = vmatpush2.bf16.msra.mxu1 %v4783_v57  ;;  %v1326_v57 = vld [vmem:[#allocation3 + $0x4b0] sm:$0xff]  ;;  %v4682_v46 = vcombine.high %v1282_v36, %v1286_v39 }
 0x3de   :  { %2909 = vmatprep.subr.bf16.mxu1 %v4776_v60  ;;  %v4729_v60 = vcombine.low %v1330_v49, %v1334_v50  ;;  %v4722_v1 = vcombine.high %v1322_v48, %v1326_v57  ;;  %v1274_v49 = vld [vmem:[#allocation3 + $0x310] sm:$0xff] }
 0x3df   :  { %2869 = vmatpush2.bf16.msra.mxu0 %v4647_v7  ;;  %v1314_v7 = vld [vmem:[#allocation3 + $0x450] sm:$0xff] }
 0x3e0   :  { %2870 = vmatprep.subr.bf16.mxu0 %v4640_v19  ;;  %v4593_v19 = vcombine.low %v1194_v56, %v1198_v44  ;;  %v1278_v50 = vld [vmem:[#allocation3 + $0x330] sm:$0xff] }
 0x3e1   :  { %2910 = vmatpush2.bf16.msra.mxu1 %v4775_v8  ;;  %v1318_v8 = vld [vmem:[#allocation3 + $0x470] sm:$0xff]  ;;  %v4674_v56 = vcombine.high %v1274_v49, %v1278_v50 }
 0x3e2   :  { %2911 = vmatprep.subr.bf16.mxu1 %v4768_v2  ;;  %v4721_v2 = vcombine.low %v1322_v48, %v1326_v57  ;;  %v4714_v21 = vcombine.high %v1314_v7, %v1318_v8  ;;  %v1266_v48 = vld [vmem:[#allocation3 + $0x2d0] sm:$0xff] }
 0x3e3   :  { %2871 = vmatpush2.bf16.msra.mxu0 %v4639_v11  ;;  %v1306_v11 = vld [vmem:[#allocation3 + $0x410] sm:$0xff] }
 0x3e4   :  { %2922 = vmatprep.subr.bf16.mxu0 %v4634_v15  ;;  %v4585_v15 = vcombine.low %v1186_v3, %v1190_v54  ;;  %v1270_v57 = vld [vmem:[#allocation3 + $0x2f0] sm:$0xff] }
 0x3e5   :  { %2912 = vmatpush2.bf16.msra.mxu1 %v4767_v12  ;;  %v1310_v12 = vld [vmem:[#allocation3 + $0x430] sm:$0xff]  ;;  %v4666_v3 = vcombine.high %v1266_v48, %v1270_v57 }
 0x3e6   :  { %2963 = vmatprep.subr.bf16.mxu1 %v4762_v16  ;;  %2873 = vmatmul.mubr.bf16.vlgmr.msra.gmra.mxu0 %v5680_v58  ;;  %v4713_v16 = vcombine.low %v1314_v7, %v1318_v8  ;;  %v4706_v18 = vcombine.high %v1306_v11, %v1310_v12  ;;  %v1258_v7 = vld [vmem:[#allocation3 + $0x290] sm:$0xff] }
 0x3e7   :  { %2923 = vmatpush1.bf16.msra.mxu0 %v4633_v13  ;;  %2954 = vmatprep.mubr.bf16.mxu0 %v5672_v23  ;;  %v1426_v13 = vld [vmem:[#allocation3 + $0x7d0] sm:$0xff] }
 0x3e8   :  { %2914 = vmatmul.mubr.bf16.vlgmr.msra.gmra.mxu1 %v5684_v62  ;;  %2924 = vmatprep.subr.bf16.mxu0 %v4626_v20  ;;  %v4577_v20 = vcombine.low %v1178_v9, %v1182_v10  ;;  %v1262_v8 = vld [vmem:[#allocation3 + $0x2b0] sm:$0xff] }
 0x3e9   :  { %2964 = vmatpush1.bf16.msra.mxu1 %v4761_v14  ;;  %2995 = vmatprep.mubr.bf16.mxu1 %v5674_v24  ;;  %v1430_v14 = vld [vmem:[#allocation3 + $0x7f0] sm:$0xff]  ;;  %v4658_v9 = vcombine.high %v1258_v7, %v1262_v8 }
 0x3ea   :  { %2965 = vmatprep.subr.bf16.mxu1 %v4754_v22  ;;  %v4705_v22 = vcombine.low %v1306_v11, %v1310_v12  ;;  %v4826_v27 = vcombine.high %v1426_v13, %v1430_v14  ;;  %v1250_v11 = vld [vmem:[#allocation3 + $0x250] sm:$0xff] }
 0x3eb   :  { %2925 = vmatpush1.bf16.msra.mxu0 %v4625_v30  ;;  %v1418_v30 = vld [vmem:[#allocation3 + $0x790] sm:$0xff] }
 0x3ec   :  { %2926 = vmatprep.subr.bf16.mxu0 %v4618_v32  ;;  %v4697_v32 = vcombine.low %v1298_v5, %v1302_v6  ;;  %v1254_v12 = vld [vmem:[#allocation3 + $0x270] sm:$0xff] }
 0x3ed   :  { %2966 = vmatpush1.bf16.msra.mxu1 %v4753_v31  ;;  %v1422_v31 = vld [vmem:[#allocation3 + $0x7b0] sm:$0xff]  ;;  %v4650_v5 = vcombine.high %v1250_v11, %v1254_v12 }
 0x3ee   :  { %2967 = vmatprep.subr.bf16.mxu1 %v4746_v33  ;;  %v4825_v33 = vcombine.low %v1426_v13, %v1430_v14  ;;  %v4818_v35 = vcombine.high %v1418_v30, %v1422_v31  ;;  %v1242_v13 = vld [vmem:[#allocation3 + $0x210] sm:$0xff] }
 0x3ef   :  { %2927 = vmatpush1.bf16.msra.mxu0 %v4617_v41  ;;  %v1410_v41 = vld [vmem:[#allocation3 + $0x750] sm:$0xff] }
 0x3f0   :  { %2928 = vmatprep.subr.bf16.mxu0 %v4610_v43  ;;  %v4689_v43 = vcombine.low %v1290_v28, %v1294_v29  ;;  %v1246_v14 = vld [vmem:[#allocation3 + $0x230] sm:$0xff] }
 0x3f1   :  { %2968 = vmatpush1.bf16.msra.mxu1 %v4745_v42  ;;  %v1414_v42 = vld [vmem:[#allocation3 + $0x770] sm:$0xff]  ;;  %v4642_v28 = vcombine.high %v1242_v13, %v1246_v14 }
 0x3f2   :  { %2969 = vmatprep.subr.bf16.mxu1 %v4738_v45  ;;  %v4817_v45 = vcombine.low %v1418_v30, %v1422_v31  ;;  %v4810_v47 = vcombine.high %v1410_v41, %v1414_v42  ;;  %v1235_v30 = vld [vmem:[#allocation3 + $0x1d8] sm:$0xff] }
 0x3f3   :  { %2929 = vmatpush1.bf16.msra.mxu0 %v4609_v51  ;;  %v1402_v51 = vld [vmem:[#allocation3 + $0x710] sm:$0xff]  ;;  %v1239_v31 = vld [vmem:[#allocation3 + $0x1f8] sm:$0xff] }
 0x3f4   :  { %2930 = vmatprep.subr.bf16.mxu0 %v4602_v53  ;;  %v4681_v53 = vcombine.low %v1282_v36, %v1286_v39  ;;  %v4636_v36 = vcombine.high %v1235_v30, %v1239_v31 }
 0x3f5   :  { %2970 = vmatpush1.bf16.msra.mxu1 %v4737_v52  ;;  %v1406_v52 = vld [vmem:[#allocation3 + $0x730] sm:$0xff] }
 0x3f6   :  { %2971 = vmatprep.subr.bf16.mxu1 %v4730_v55  ;;  %v4809_v55 = vcombine.low %v1410_v41, %v1414_v42  ;;  %v4802_v44 = vcombine.high %v1402_v51, %v1406_v52  ;;  %v1227_v41 = vld [vmem:[#allocation3 + $0x198] sm:$0xff] }
 0x3f7   :  { %2931 = vmatpush1.bf16.msra.mxu0 %v4601_v59  ;;  %v1394_v59 = vld [vmem:[#allocation3 + $0x6d0] sm:$0xff]  ;;  %v1231_v42 = vld [vmem:[#allocation3 + $0x1b8] sm:$0xff] }
 0x3f8   :  { %2932 = vmatprep.subr.bf16.mxu0 %v4594_v0  ;;  %v4673_v0 = vcombine.low %v1274_v49, %v1278_v50  ;;  %v4628_v49 = vcombine.high %v1227_v41, %v1231_v42 }
 0x3f9   :  { %2972 = vmatpush1.bf16.msra.mxu1 %v4729_v60  ;;  %v1398_v60 = vld [vmem:[#allocation3 + $0x6f0] sm:$0xff] }
 0x3fa   :  { %2973 = vmatprep.subr.bf16.mxu1 %v4722_v1  ;;  %v4801_v1 = vcombine.low %v1402_v51, %v1406_v52  ;;  %v4794_v54 = vcombine.high %v1394_v59, %v1398_v60  ;;  %v1219_v51 = vld [vmem:[#allocation3 + $0x158] sm:$0xff] }
 0x3fb   :  { %2933 = vmatpush1.bf16.msra.mxu0 %v4593_v19  ;;  %v1386_v19 = vld [vmem:[#allocation3 + $0x690] sm:$0xff]  ;;  %v1223_v52 = vld [vmem:[#allocation3 + $0x178] sm:$0xff] }
 0x3fc   :  { %2934 = vmatprep.subr.bf16.mxu0 %v4586_v4  ;;  %v4665_v4 = vcombine.low %v1266_v48, %v1270_v57  ;;  %v4620_v48 = vcombine.high %v1219_v51, %v1223_v52 }
 0x3fd   :  { %2974 = vmatpush1.bf16.msra.mxu1 %v4721_v2  ;;  %v1390_v2 = vld [vmem:[#allocation3 + $0x6b0] sm:$0xff] }
 0x3fe   :  { %2975 = vmatprep.subr.bf16.mxu1 %v4714_v21  ;;  %v4793_v21 = vcombine.low %v1394_v59, %v1398_v60  ;;  %v4786_v10 = vcombine.high %v1386_v19, %v1390_v2  ;;  %v1211_v59 = vld [vmem:[#allocation3 + $0x118] sm:$0xff] }
 0x3ff   :  { %2935 = vmatpush1.bf16.msra.mxu0 %v4585_v15  ;;  %v1378_v15 = vld [vmem:[#allocation3 + $0x650] sm:$0xff]  ;;  %v1215_v60 = vld [vmem:[#allocation3 + $0x138] sm:$0xff] }
 0x400   :  { %2936 = vmatprep.subr.bf16.mxu0 %v4578_v17  ;;  %v4657_v17 = vcombine.low %v1258_v7, %v1262_v8  ;;  %v4612_v7 = vcombine.high %v1211_v59, %v1215_v60 }
 0x401   :  { %2976 = vmatpush1.bf16.msra.mxu1 %v4713_v16  ;;  %v1382_v16 = vld [vmem:[#allocation3 + $0x670] sm:$0xff] }
 0x402   :  { %2977 = vmatprep.subr.bf16.mxu1 %v4706_v18  ;;  %v4785_v18 = vcombine.low %v1386_v19, %v1390_v2  ;;  %v4778_v6 = vcombine.high %v1378_v15, %v1382_v16  ;;  %v1203_v19 = vld [vmem:[#allocation3 + $0xd8] sm:$0xff] }
 0x403   :  { %2937 = vmatpush1.bf16.msra.mxu0 %v4577_v20  ;;  %v1370_v20 = vld [vmem:[#allocation3 + $0x610] sm:$0xff]  ;;  %v1207_v2 = vld [vmem:[#allocation3 + $0xf8] sm:$0xff] }
 0x404   :  { %2938 = vmatprep.subr.bf16.mxu0 %v4698_v26  ;;  %v4649_v26 = vcombine.low %v1250_v11, %v1254_v12  ;;  %v1195_v11 = vld [vmem:[#allocation3 + $0x98] sm:$0xff] }
 0x405   :  { %2978 = vmatpush1.bf16.msra.mxu1 %v4705_v22  ;;  %v1374_v22 = vld [vmem:[#allocation3 + $0x630] sm:$0xff]  ;;  %v1199_v12 = vld [vmem:[#allocation3 + $0xb8] sm:$0xff] }
 0x406   :  { %2979 = vmatprep.subr.bf16.mxu1 %v4826_v27  ;;  %v4777_v27 = vcombine.low %v1378_v15, %v1382_v16  ;;  %v4770_v29 = vcombine.high %v1370_v20, %v1374_v22  ;;  %v1323_v15 = vld [vmem:[#allocation3 + $0x498] sm:$0xff] }
 0x407   :  { %2939 = vmatpush2.bf16.msra.mxu0 %v4697_v32  ;;  %v1363_v32 = vld [vmem:[#allocation3 + $0x5d8] sm:$0xff] }
 0x408   :  { %2940 = vmatprep.subr.bf16.mxu0 %v4690_v34  ;;  %v4641_v34 = vcombine.low %v1242_v13, %v1246_v14  ;;  %v1327_v16 = vld [vmem:[#allocation3 + $0x4b8] sm:$0xff] }
 0x409   :  { %2980 = vmatpush2.bf16.msra.mxu1 %v4825_v33  ;;  %v1367_v33 = vld [vmem:[#allocation3 + $0x5f8] sm:$0xff] }
 0x40a   :  { %2981 = vmatprep.subr.bf16.mxu1 %v4818_v35  ;;  %v4769_v35 = vcombine.low %v1370_v20, %v1374_v22  ;;  %v4764_v39 = vcombine.high %v1363_v32, %v1367_v33  ;;  %v1187_v13 = vld [vmem:[#allocation3 + $0x58] sm:$0xff] }
 0x40b   :  { %2941 = vmatpush2.bf16.msra.mxu0 %v4689_v43  ;;  %v1355_v43 = vld [vmem:[#allocation3 + $0x598] sm:$0xff] }
 0x40c   :  { %2942 = vmatprep.subr.bf16.mxu0 %v4682_v46  ;;  %v4635_v46 = vcombine.low %v1235_v30, %v1239_v31  ;;  %v1191_v14 = vld [vmem:[#allocation3 + $0x78] sm:$0xff] }
 0x40d   :  { %2982 = vmatpush2.bf16.msra.mxu1 %v4817_v45  ;;  %v1359_v45 = vld [vmem:[#allocation3 + $0x5b8] sm:$0xff] }
 0x40e   :  { %2983 = vmatprep.subr.bf16.mxu1 %v4810_v47  ;;  %v4763_v47 = vcombine.low %v1363_v32, %v1367_v33  ;;  %v4756_v50 = vcombine.high %v1355_v43, %v1359_v45  ;;  %v1315_v20 = vld [vmem:[#allocation3 + $0x458] sm:$0xff] }
 0x40f   :  { %2943 = vmatpush2.bf16.msra.mxu0 %v4681_v53  ;;  %v1347_v53 = vld [vmem:[#allocation3 + $0x558] sm:$0xff] }
 0x410   :  { %2944 = vmatprep.subr.bf16.mxu0 %v4674_v56  ;;  %v4627_v56 = vcombine.low %v1227_v41, %v1231_v42  ;;  %v1319_v22 = vld [vmem:[#allocation3 + $0x478] sm:$0xff] }
 0x411   :  { %2984 = vmatpush2.bf16.msra.mxu1 %v4809_v55  ;;  %v1351_v55 = vld [vmem:[#allocation3 + $0x578] sm:$0xff] }
 0x412   :  { %2985 = vmatprep.subr.bf16.mxu1 %v4802_v44  ;;  %v4755_v44 = vcombine.low %v1355_v43, %v1359_v45  ;;  %v4748_v57 = vcombine.high %v1347_v53, %v1351_v55  ;;  %v1179_v30 = vld [vmem:[#allocation3 + $0x18] sm:$0xff] }
 0x413   :  { %2945 = vmatpush2.bf16.msra.mxu0 %v4673_v0  ;;  %v1339_v0 = vld [vmem:[#allocation3 + $0x518] sm:$0xff] }
 0x414   :  { %2946 = vmatprep.subr.bf16.mxu0 %v4666_v3  ;;  %v4619_v3 = vcombine.low %v1219_v51, %v1223_v52  ;;  %v1183_v31 = vld [vmem:[#allocation3 + $0x38] sm:$0xff] }
 0x415   :  { %2986 = vmatpush2.bf16.msra.mxu1 %v4801_v1  ;;  %v1343_v1 = vld [vmem:[#allocation3 + $0x538] sm:$0xff] }
 0x416   :  { %2987 = vmatprep.subr.bf16.mxu1 %v4794_v54  ;;  %v4747_v54 = vcombine.low %v1347_v53, %v1351_v55  ;;  %v4740_v8 = vcombine.high %v1339_v0, %v1343_v1  ;;  %v1307_v32 = vld [vmem:[#allocation3 + $0x418] sm:$0xff] }
 0x417   :  { %2947 = vmatpush2.bf16.msra.mxu0 %v4665_v4  ;;  %v1331_v4 = vld [vmem:[#allocation3 + $0x4d8] sm:$0xff] }
 0x418   :  { %2948 = vmatprep.subr.bf16.mxu0 %v4658_v9  ;;  %v4611_v9 = vcombine.low %v1211_v59, %v1215_v60  ;;  %v1311_v33 = vld [vmem:[#allocation3 + $0x438] sm:$0xff] }
 0x419   :  { %2988 = vmatpush2.bf16.msra.mxu1 %v4793_v21  ;;  %v1335_v21 = vld [vmem:[#allocation3 + $0x4f8] sm:$0xff] }
 0x41a   :  { %2989 = vmatprep.subr.bf16.mxu1 %v4786_v10  ;;  %v4604_v10 = vcombine.high %v1203_v19, %v1207_v2  ;;  %v1299_v41 = vld [vmem:[#allocation3 + $0x3d8] sm:$0xff] }
 0x41b   :  { %2949 = vmatpush2.bf16.msra.mxu0 %v4657_v17  ;;  %v4603_v17 = vcombine.low %v1203_v19, %v1207_v2  ;;  %v1303_v42 = vld [vmem:[#allocation3 + $0x3f8] sm:$0xff] }
 0x41c   :  { %2950 = vmatprep.subr.bf16.mxu0 %v4650_v5  ;;  %v4596_v5 = vcombine.high %v1195_v11, %v1199_v12  ;;  %v1427_v43 = vld [vmem:[#allocation3 + $0x7d8] sm:$0xff] }
 0x41d   :  { %2990 = vmatpush2.bf16.msra.mxu1 %v4785_v18  ;;  %v4731_v18 = vcombine.low %v1331_v4, %v1335_v21  ;;  %v1431_v45 = vld [vmem:[#allocation3 + $0x7f8] sm:$0xff] }
 0x41e   :  { %2991 = vmatprep.subr.bf16.mxu1 %v4778_v6  ;;  %v4724_v6 = vcombine.high %v1323_v15, %v1327_v16  ;;  %v1291_v51 = vld [vmem:[#allocation3 + $0x398] sm:$0xff] }
 0x41f   :  { %2951 = vmatpush2.bf16.msra.mxu0 %v4649_v26  ;;  %v4595_v26 = vcombine.low %v1195_v11, %v1199_v12  ;;  %v1295_v52 = vld [vmem:[#allocation3 + $0x3b8] sm:$0xff] }
 0x420   :  { %2952 = vmatprep.subr.bf16.mxu0 %v4642_v28  ;;  %v4588_v28 = vcombine.high %v1187_v13, %v1191_v14  ;;  %v1419_v53 = vld [vmem:[#allocation3 + $0x798] sm:$0xff] }
 0x421   :  { %2992 = vmatpush2.bf16.msra.mxu1 %v4777_v27  ;;  %v4723_v27 = vcombine.low %v1323_v15, %v1327_v16  ;;  %v1423_v55 = vld [vmem:[#allocation3 + $0x7b8] sm:$0xff] }
 0x422   :  { %2993 = vmatprep.subr.bf16.mxu1 %v4770_v29  ;;  %v4716_v29 = vcombine.high %v1315_v20, %v1319_v22  ;;  %v1283_v59 = vld [vmem:[#allocation3 + $0x358] sm:$0xff] }
 0x423   :  { %2953 = vmatpush2.bf16.msra.mxu0 %v4641_v34  ;;  %v4587_v34 = vcombine.low %v1187_v13, %v1191_v14  ;;  %v1287_v60 = vld [vmem:[#allocation3 + $0x378] sm:$0xff] }
 0x424   :  { %3004 = vmatprep.subr.bf16.mxu0 %v4636_v36  ;;  %v4580_v36 = vcombine.high %v1179_v30, %v1183_v31  ;;  %v1275_v19 = vld [vmem:[#allocation3 + $0x318] sm:$0xff] }
 0x425   :  { %2994 = vmatpush2.bf16.msra.mxu1 %v4769_v35  ;;  %v4715_v35 = vcombine.low %v1315_v20, %v1319_v22  ;;  %v1279_v2 = vld [vmem:[#allocation3 + $0x338] sm:$0xff] }
 0x426   :  { %3045 = vmatprep.subr.bf16.mxu1 %v4764_v39  ;;  %2955 = vmatmul.mubr.bf16.vlgmr.msra.gmra.mxu0 %v5680_v58  ;;  %v4708_v39 = vcombine.high %v1307_v32, %v1311_v33  ;;  %v1267_v11 = vld [vmem:[#allocation3 + $0x2d8] sm:$0xff] }
 0x427   :  { %3005 = vmatpush1.bf16.msra.mxu0 %v4635_v46  ;;  %3036 = vmatprep.mubr.bf16.mxu0 %v5672_v23  ;;  %v4739_v23 = vcombine.low %v1339_v0, %v1343_v1  ;;  %v4579_v46 = vcombine.low %v1179_v30, %v1183_v31  ;;  %v1411_v0 = vld [vmem:[#allocation3 + $0x758] sm:$0xff] }
 0x428   :  { %2996 = vmatmul.mubr.bf16.vlgmr.msra.gmra.mxu1 %v5684_v62  ;;  %3006 = vmatprep.subr.bf16.mxu0 %v4628_v49  ;;  %v4700_v49 = vcombine.high %v1299_v41, %v1303_v42  ;;  %v1415_v1 = vld [vmem:[#allocation3 + $0x778] sm:$0xff] }
 0x429   :  { %3046 = vmatpush1.bf16.msra.mxu1 %v4763_v47  ;;  %3077 = vmatprep.mubr.bf16.mxu1 %v5674_v24  ;;  %v4732_v24 = vcombine.high %v1331_v4, %v1335_v21  ;;  %v4707_v47 = vcombine.low %v1307_v32, %v1311_v33  ;;  %v1403_v4 = vld [vmem:[#allocation3 + $0x718] sm:$0xff] }
 0x42a   :  { %3047 = vmatprep.subr.bf16.mxu1 %v4756_v50  ;;  %v4828_v50 = vcombine.high %v1427_v43, %v1431_v45  ;;  %v1407_v21 = vld [vmem:[#allocation3 + $0x738] sm:$0xff] }
 0x42b   :  { %3007 = vmatpush1.bf16.msra.mxu0 %v4627_v56  ;;  %v4699_v56 = vcombine.low %v1299_v41, %v1303_v42  ;;  %v1271_v12 = vld [vmem:[#allocation3 + $0x2f8] sm:$0xff] }
 0x42c   :  { %3008 = vmatprep.subr.bf16.mxu0 %v4620_v48  ;;  %v4692_v48 = vcombine.high %v1291_v51, %v1295_v52  ;;  %v1395_v15 = vld [vmem:[#allocation3 + $0x6d8] sm:$0xff] }
 0x42d   :  { %3048 = vmatpush1.bf16.msra.mxu1 %v4755_v44  ;;  %v4827_v44 = vcombine.low %v1427_v43, %v1431_v45  ;;  %v1399_v16 = vld [vmem:[#allocation3 + $0x6f8] sm:$0xff] }
 0x42e   :  { %3049 = vmatprep.subr.bf16.mxu1 %v4748_v57  ;;  %v4820_v57 = vcombine.high %v1419_v53, %v1423_v55  ;;  %v1259_v13 = vld [vmem:[#allocation3 + $0x298] sm:$0xff] }
 0x42f   :  { %3009 = vmatpush1.bf16.msra.mxu0 %v4619_v3  ;;  %v4691_v3 = vcombine.low %v1291_v51, %v1295_v52  ;;  %v1263_v14 = vld [vmem:[#allocation3 + $0x2b8] sm:$0xff] }
 0x430   :  { %3010 = vmatprep.subr.bf16.mxu0 %v4612_v7  ;;  %v4684_v7 = vcombine.high %v1283_v59, %v1287_v60  ;;  %v1387_v20 = vld [vmem:[#allocation3 + $0x698] sm:$0xff] }
 0x431   :  { %3050 = vmatpush1.bf16.msra.mxu1 %v4747_v54  ;;  %v4819_v54 = vcombine.low %v1419_v53, %v1423_v55  ;;  %v1391_v22 = vld [vmem:[#allocation3 + $0x6b8] sm:$0xff] }
 0x432   :  { %3051 = vmatprep.subr.bf16.mxu1 %v4740_v8  ;;  %v4812_v8 = vcombine.high %v1411_v0, %v1415_v1  ;;  %v1251_v30 = vld [vmem:[#allocation3 + $0x258] sm:$0xff] }
 0x433   :  { %3011 = vmatpush1.bf16.msra.mxu0 %v4611_v9  ;;  %v4683_v9 = vcombine.low %v1283_v59, %v1287_v60  ;;  %v1255_v31 = vld [vmem:[#allocation3 + $0x278] sm:$0xff] }
 0x434   :  { %3012 = vmatprep.subr.bf16.mxu0 %v4604_v10  ;;  %v4676_v10 = vcombine.high %v1275_v19, %v1279_v2  ;;  %v1379_v32 = vld [vmem:[#allocation3 + $0x658] sm:$0xff] }
 0x435   :  { %3052 = vmatpush1.bf16.msra.mxu1 %v4739_v23  ;;  %v4811_v23 = vcombine.low %v1411_v0, %v1415_v1  ;;  %v1383_v33 = vld [vmem:[#allocation3 + $0x678] sm:$0xff] }
 0x436   :  { %3053 = vmatprep.subr.bf16.mxu1 %v4732_v24  ;;  %v4804_v24 = vcombine.high %v1403_v4, %v1407_v21  ;;  %v1243_v41 = vld [vmem:[#allocation3 + $0x218] sm:$0xff] }
 0x437   :  { %3013 = vmatpush1.bf16.msra.mxu0 %v4603_v17  ;;  %v4675_v17 = vcombine.low %v1275_v19, %v1279_v2  ;;  %v1247_v42 = vld [vmem:[#allocation3 + $0x238] sm:$0xff] }
 0x438   :  { %3014 = vmatprep.subr.bf16.mxu0 %v4596_v5  ;;  %v4668_v5 = vcombine.high %v1267_v11, %v1271_v12  ;;  %v1371_v43 = vld [vmem:[#allocation3 + $0x618] sm:$0xff]  ;;  %v4643_v51 = vcombine.low %v1243_v41, %v1247_v42 }
 0x439   :  { %3054 = vmatpush1.bf16.msra.mxu1 %v4731_v18  ;;  %v4803_v18 = vcombine.low %v1403_v4, %v1407_v21  ;;  %v1375_v45 = vld [vmem:[#allocation3 + $0x638] sm:$0xff] }
 0x43a   :  { %3055 = vmatprep.subr.bf16.mxu1 %v4724_v6  ;;  %v4796_v6 = vcombine.high %v1395_v15, %v1399_v16  ;;  %v4771_v52 = vcombine.low %v1371_v43, %v1375_v45  ;;  %v5698_v53 = vld [vmem:[#allocation11 + $0x13] sm:$0xff] }
 0x43b   :  { %3015 = vmatpush1.bf16.msra.mxu0 %v4595_v26  ;;  %v4667_v26 = vcombine.low %v1267_v11, %v1271_v12  ;;  %v1441_v55 = vrot.slane %v5698_v53, %v5587_v38 }
 0x43c   :  { %3016 = vmatprep.subr.bf16.mxu0 %v4588_v28  ;;  %v4660_v28 = vcombine.high %v1259_v13, %v1263_v14 }
 0x43d   :  { %3056 = vmatpush1.bf16.msra.mxu1 %v4723_v27  ;;  %v4795_v27 = vcombine.low %v1395_v15, %v1399_v16 }
 0x43e   :  { %3057 = vmatprep.subr.bf16.mxu1 %v4716_v29  ;;  %v4788_v29 = vcombine.high %v1387_v20, %v1391_v22 }
 0x43f   :  { %3017 = vmatpush1.bf16.msra.mxu0 %v4587_v34  ;;  %v4659_v34 = vcombine.low %v1259_v13, %v1263_v14 }
 0x440   :  { %3018 = vmatprep.subr.bf16.mxu0 %v4580_v36  ;;  %v4652_v36 = vcombine.high %v1251_v30, %v1255_v31 }
 0x441   :  { %3058 = vmatpush1.bf16.msra.mxu1 %v4715_v35  ;;  %v4787_v35 = vcombine.low %v1387_v20, %v1391_v22 }
 0x442   :  { %3059 = vmatprep.subr.bf16.mxu1 %v4708_v39  ;;  %v4780_v39 = vcombine.high %v1379_v32, %v1383_v33 }
 0x443   :  { %3019 = vmatpush1.bf16.msra.mxu0 %v4579_v46  ;;  %v4651_v46 = vcombine.low %v1251_v30, %v1255_v31 }
 0x444   :  { %3020 = vmatprep.subr.bf16.mxu0 %v4700_v49  ;;  %v4644_v49 = vcombine.high %v1243_v41, %v1247_v42 }
 0x445   :  { %3060 = vmatpush1.bf16.msra.mxu1 %v4707_v47  ;;  %v4779_v47 = vcombine.low %v1379_v32, %v1383_v33 }
 0x446   :  { %3061 = vmatprep.subr.bf16.mxu1 %v4828_v50  ;;  %v4772_v50 = vcombine.high %v1371_v43, %v1375_v45 }
 0x447   :  { %3021 = vmatpush2.bf16.msra.mxu0 %v4699_v56  ;;  %v1445_v56 = vrot.slane %v5698_v53, %v5590_v40 }
 0x448   :  { %3022 = vmatprep.subr.bf16.mxu0 %v4692_v48 }
 0x449   :  { %3062 = vmatpush2.bf16.msra.mxu1 %v4827_v44 }
 0x44a   :  { %3063 = vmatprep.subr.bf16.mxu1 %v4820_v57 }
 0x44b   :  { %3023 = vmatpush2.bf16.msra.mxu0 %v4691_v3 }
 0x44c   :  { %3024 = vmatprep.subr.bf16.mxu0 %v4684_v7 }
 0x44d   :  { %3064 = vmatpush2.bf16.msra.mxu1 %v4819_v54 }
 0x44e   :  { %3065 = vmatprep.subr.bf16.mxu1 %v4812_v8 }
 0x44f   :  { %3025 = vmatpush2.bf16.msra.mxu0 %v4683_v9 }
 0x450   :  { %3026 = vmatprep.subr.bf16.mxu0 %v4676_v10 }
 0x451   :  { %3066 = vmatpush2.bf16.msra.mxu1 %v4811_v23 }
 0x452   :  { %3067 = vmatprep.subr.bf16.mxu1 %v4804_v24 }
 0x453   :  { %3027 = vmatpush2.bf16.msra.mxu0 %v4675_v17 }
 0x454   :  { %3028 = vmatprep.subr.bf16.mxu0 %v4668_v5 }
 0x455   :  { %3068 = vmatpush2.bf16.msra.mxu1 %v4803_v18 }
 0x456   :  { %3069 = vmatprep.subr.bf16.mxu1 %v4796_v6 }
 0x457   :  { %3029 = vmatpush2.bf16.msra.mxu0 %v4667_v26 }
 0x458   :  { %3030 = vmatprep.subr.bf16.mxu0 %v4660_v28 }
 0x459   :  { %3070 = vmatpush2.bf16.msra.mxu1 %v4795_v27 }
 0x45a   :  { %3071 = vmatprep.subr.bf16.mxu1 %v4788_v29 }
 0x45b   :  { %3031 = vmatpush2.bf16.msra.mxu0 %v4659_v34 }
 0x45c   :  { %3032 = vmatprep.subr.bf16.mxu0 %v4652_v36 }
 0x45d   :  { %3072 = vmatpush2.bf16.msra.mxu1 %v4787_v35 }
 0x45e   :  { %3073 = vmatprep.subr.bf16.mxu1 %v4780_v39 }
 0x45f   :  { %3033 = vmatpush2.bf16.msra.mxu0 %v4651_v46 }
 0x460   :  { %3034 = vmatprep.subr.bf16.mxu0 %v4644_v49  ;;  %v1449_v49 = vrot.slane %v5698_v53, %v5617_v61 }
 0x461   :  { %3074 = vmatpush2.bf16.msra.mxu1 %v4779_v47 }
 0x462   :  { %3075 = vmatprep.subr.bf16.mxu1 %v4772_v50  ;;  %v1453_v50 = vrot.slane %v5698_v53, %v5620_v63 }
 0x463   :  { %3035 = vmatpush2.bf16.msra.mxu0 %v4643_v51 }
 0x465   :  { %3076 = vmatpush2.bf16.msra.mxu1 %v4771_v52 }
 0x466   :  { %v2792_v44 = vpop.f32.mrf.mxu0  ;;  %3037 = vmatmul.mubr.bf16.vlgmr.msra.gmra.mxu0 %v5680_v58 }
 0x467   :  { %v2793_v48 = vadd.f32 %v2792_v44, %v1441_v55 }
 0x468   :  { %v2833_v57 = vpop.f32.mrf.mxu1  ;;  %3078 = vmatmul.mubr.bf16.vlgmr.msra.gmra.mxu1 %v5684_v62  ;;  %v2794_v59 = vpop.f32.mrf.mxu0 }
 0x469   :  { %v5706_v60 = vadd.f32 %v2833_v57, %v2793_v48  ;;  %v2795_v0 = vadd.f32 %v2794_v59, %v1445_v56 }
 0x46a   :  { %v2835_v1 = vpop.f32.mrf.mxu1  ;;  %v2796_v3 = vpop.f32.mrf.mxu0 }
 0x46b   :  { %v3088_v54 = vrot.slane %v5706_v60, 4  ;;  %v3144_v7 = vmul.f32 %v5706_v60, %v5706_v60  ;;  %v5711_v8 = vadd.f32 %v2835_v1, %v2795_v0 }
 0x46c   :  { %v2837_v19 = vpop.f32.mrf.mxu1  ;;  %v2797_v2 = vpop.f32.mrf.mxu0 }
 0x46d   :  { %v3089_v58 = vadd.f32 %v3088_v54, %v5706_v60  ;;  %v3152_v4 = vrot.slane %v3144_v7, 4  ;;  %v3094_v62 = vrot.slane %v5711_v8, 4  ;;  %v3145_v21 = vmul.f32 %v5711_v8, %v5711_v8 }
 0x46e   :  { %v2838_v9 = vpop.f32.mrf.mxu1 }
 0x46f   :  { %v3090_v23 = vrot.slane %v3089_v58, 2  ;;  %v3153_v10 = vadd.f32 %v3152_v4, %v3144_v7  ;;  %v3095_v24 = vadd.f32 %v3094_v62, %v5711_v8  ;;  %v3158_v11 = vrot.slane %v3145_v21, 4 }
 0x471   :  { %v3091_v12 = vadd.f32 %v3090_v23, %v3089_v58  ;;  %v3154_v15 = vrot.slane %v3153_v10, 2  ;;  %v3096_v16 = vrot.slane %v3095_v24, 2  ;;  %v3159_v17 = vadd.f32 %v3158_v11, %v3145_v21 }
 0x473   :  { %v3092_v18 = vrot.slane %v3091_v12, 1  ;;  %v3155_v5 = vadd.f32 %v3154_v15, %v3153_v10  ;;  %v3097_v6 = vadd.f32 %v3096_v16, %v3095_v24  ;;  %v3160_v13 = vrot.slane %v3159_v17, 2 }
 0x475   :  { %v3093_v14 = vadd.f32 %v3092_v18, %v3091_v12  ;;  %v3156_v20 = vrot.slane %v3155_v5, 1  ;;  %v3098_v22 = vrot.slane %v3097_v6, 1  ;;  %v3161_v26 = vadd.f32 %v3160_v13, %v3159_v17 }
 0x477   :  { %v5718_v27 = vmul.f32 0.125, %v3093_v14  ;;  %v3157_v28 = vadd.f32 %v3156_v20, %v3155_v5  ;;  %v3099_v29 = vadd.f32 %v3098_v22, %v3097_v6  ;;  %v3162_v30 = vrot.slane %v3161_v26, 1 }
 0x479   :  { %v3200_v31 = vmul.f32 0.125, %v3157_v28  ;;  %v3208_v32 = vmul.f32 %v5718_v27, %v5718_v27  ;;  %v5722_v33 = vmul.f32 0.125, %v3099_v29  ;;  %v3163_v34 = vadd.f32 %v3162_v30, %v3161_v26 }
 0x47b   :  { %v3216_v35 = vsub.f32 %v3200_v31, %v3208_v32  ;;  %v3201_v36 = vmul.f32 0.125, %v3163_v34  ;;  %v3209_v39 = vmul.f32 %v5722_v33, %v5722_v33 }
 0x47d   :  { %v3224_v41 = vadd.f32 1e-05, %v3216_v35  ;;  %v3217_v42 = vsub.f32 %v3201_v36, %v3209_v39 }
 0x47f   :  { %v3225_v43 = vadd.f32 1e-05, %v3217_v42  ;;  %5144 = vrsqrt.f32 %v3224_v41 }
 0x481   :  { %5146 = vrsqrt.f32 %v3225_v43 }
 0x48c   :  { %v5145_v45 = vpop.eup %5144 }
 0x48e   :  { %v5147_v46 = vpop.eup %5146 }
 0x48f   :  { %v3248_v47 = vcombine.low %v5145_v45, %v5147_v46 }
 0x4a6   :  { %v2874_v51 = vpop.f32.mrf.mxu0 }
 0x4a7   :  { %v2875_v52 = vadd.f32 %v2874_v51, %v1449_v49 }
 0x4a8   :  { %v2915_v55 = vpop.f32.mrf.mxu1  ;;  %v2876_v56 = vpop.f32.mrf.mxu0 }
 0x4a9   :  { %v5730_v44 = vadd.f32 %v2915_v55, %v2875_v52  ;;  %v2877_v48 = vadd.f32 %v2876_v56, %v1453_v50  ;;  %v5751_v50 = vrot.slane %v3248_v47, %v5601_v25  ;;  %v5759_v55 = vsub.s32 4, %v5584_v37 }
 0x4aa   :  { %v2917_v57 = vpop.f32.mrf.mxu1  ;;  %v2878_v59 = vpop.f32.mrf.mxu0  ;;  %v5762_v56 = vsub.s32 5, %v5584_v37 }
 0x4ab   :  { %v3100_v0 = vrot.slane %v5730_v44, 4  ;;  %v3146_v1 = vmul.f32 %v5730_v44, %v5730_v44  ;;  %v5735_v3 = vadd.f32 %v2917_v57, %v2877_v48  ;;  %v1457_v48 = vrot.slane %v5698_v53, %v5759_v55 }
 0x4ac   :  { %v2919_v54 = vpop.f32.mrf.mxu1  ;;  %v2879_v7 = vpop.f32.mrf.mxu0  ;;  %v1461_v57 = vrot.slane %v5698_v53, %v5762_v56 }
 0x4ad   :  { %v3101_v19 = vadd.f32 %v3100_v0, %v5730_v44  ;;  %v3164_v2 = vrot.slane %v3146_v1, 4  ;;  %v3106_v58 = vrot.slane %v5735_v3, 4  ;;  %v3147_v4 = vmul.f32 %v5735_v3, %v5735_v3 }
 0x4ae   :  { %v2920_v62 = vpop.f32.mrf.mxu1 }
 0x4af   :  { %v3102_v21 = vrot.slane %v3101_v19, 2  ;;  %v3165_v9 = vadd.f32 %v3164_v2, %v3146_v1  ;;  %v3107_v23 = vadd.f32 %v3106_v58, %v5735_v3  ;;  %v3170_v10 = vrot.slane %v3147_v4, 4 }
 0x4b1   :  { %v3103_v24 = vadd.f32 %v3102_v21, %v3101_v19  ;;  %v3166_v11 = vrot.slane %v3165_v9, 2  ;;  %v3108_v12 = vrot.slane %v3107_v23, 2  ;;  %v3171_v15 = vadd.f32 %v3170_v10, %v3147_v4 }
 0x4b3   :  { %v3104_v16 = vrot.slane %v3103_v24, 1  ;;  %v3167_v17 = vadd.f32 %v3166_v11, %v3165_v9  ;;  %v3109_v18 = vadd.f32 %v3108_v12, %v3107_v23  ;;  %v3172_v5 = vrot.slane %v3171_v15, 2 }
 0x4b5   :  { %v3105_v6 = vadd.f32 %v3104_v16, %v3103_v24  ;;  %v3168_v13 = vrot.slane %v3167_v17, 1  ;;  %v3110_v14 = vrot.slane %v3109_v18, 1  ;;  %v3173_v20 = vadd.f32 %v3172_v5, %v3171_v15 }
 0x4b7   :  { %v5742_v22 = vmul.f32 0.125, %v3105_v6  ;;  %v3169_v26 = vadd.f32 %v3168_v13, %v3167_v17  ;;  %v3111_v28 = vadd.f32 %v3110_v14, %v3109_v18  ;;  %v3174_v29 = vrot.slane %v3173_v20, 1 }
 0x4b9   :  { %v3202_v30 = vmul.f32 0.125, %v3169_v26  ;;  %v3210_v31 = vmul.f32 %v5742_v22, %v5742_v22  ;;  %v5746_v32 = vmul.f32 0.125, %v3111_v28  ;;  %v3175_v34 = vadd.f32 %v3174_v29, %v3173_v20 }
 0x4bb   :  { %v3218_v35 = vsub.f32 %v3202_v30, %v3210_v31  ;;  %v3203_v36 = vmul.f32 0.125, %v3175_v34  ;;  %v3211_v39 = vmul.f32 %v5746_v32, %v5746_v32 }
 0x4bd   :  { %v3226_v41 = vadd.f32 1e-05, %v3218_v35  ;;  %v3219_v42 = vsub.f32 %v3203_v36, %v3211_v39 }
 0x4bf   :  { %v3227_v43 = vadd.f32 1e-05, %v3219_v42  ;;  %5148 = vrsqrt.f32 %v3226_v41 }
 0x4c1   :  { %5150 = vrsqrt.f32 %v3227_v43 }
 0x4cc   :  { %v5149_v45 = vpop.eup %5148 }
 0x4ce   :  { %v5151_v46 = vpop.eup %5150 }
 0x4cf   :  { %v3249_v49 = vcombine.low %v5149_v45, %v5151_v46 }
 0x4d1   :  { %v5754_v51 = vrot.slane %v3249_v49, %v5601_v25 }
 0x4d3   :  { %v3280_v52 = vcombine.low %v5751_v50, %v5754_v51 }
 0x4e6   :  { %v2956_v47 = vpop.f32.mrf.mxu0 }
 0x4e7   :  { %v2957_v59 = vadd.f32 %v2956_v47, %v1457_v48 }
 0x4e8   :  { %v2997_v0 = vpop.f32.mrf.mxu1  ;;  %v2958_v1 = vpop.f32.mrf.mxu0 }
 0x4e9   :  { %v5768_v54 = vadd.f32 %v2997_v0, %v2957_v59  ;;  %v2959_v7 = vadd.f32 %v2958_v1, %v1461_v57 }
 0x4ea   :  { %v2999_v19 = vpop.f32.mrf.mxu1  ;;  %v2960_v2 = vpop.f32.mrf.mxu0 }
 0x4eb   :  { %v3112_v58 = vrot.slane %v5768_v54, 4  ;;  %v3148_v4 = vmul.f32 %v5768_v54, %v5768_v54  ;;  %v5773_v62 = vadd.f32 %v2999_v19, %v2959_v7 }
 0x4ec   :  { %v3001_v21 = vpop.f32.mrf.mxu1  ;;  %v2961_v9 = vpop.f32.mrf.mxu0 }
 0x4ed   :  { %v3113_v23 = vadd.f32 %v3112_v58, %v5768_v54  ;;  %v3176_v10 = vrot.slane %v3148_v4, 4  ;;  %v3118_v24 = vrot.slane %v5773_v62, 4  ;;  %v3149_v11 = vmul.f32 %v5773_v62, %v5773_v62 }
 0x4ee   :  { %v3002_v12 = vpop.f32.mrf.mxu1  ;;  %v5789_v58 = vsub.s32 6, %v5584_v37 }
 0x4ef   :  { %v3114_v15 = vrot.slane %v3113_v23, 2  ;;  %v3177_v16 = vadd.f32 %v3176_v10, %v3148_v4  ;;  %v3119_v17 = vadd.f32 %v3118_v24, %v5773_v62  ;;  %v3182_v18 = vrot.slane %v3149_v11, 4 }
 0x4f0   :  { %v5792_v4 = vsub.s32 7, %v5584_v37  ;;  %v1465_v21 = vrot.slane %v5698_v53, %v5789_v58 }
 0x4f1   :  { %v3115_v5 = vadd.f32 %v3114_v15, %v3113_v23  ;;  %v3178_v6 = vrot.slane %v3177_v16, 2  ;;  %v3120_v13 = vrot.slane %v3119_v17, 2  ;;  %v3183_v14 = vadd.f32 %v3182_v18, %v3149_v11 }
 0x4f2   :  { %v1469_v9 = vrot.slane %v5698_v53, %v5792_v4 }
 0x4f3   :  { %v3116_v20 = vrot.slane %v3115_v5, 1  ;;  %v3179_v26 = vadd.f32 %v3178_v6, %v3177_v16  ;;  %v3121_v28 = vadd.f32 %v3120_v13, %v3119_v17  ;;  %v3184_v29 = vrot.slane %v3183_v14, 2 }
 0x4f5   :  { %v3117_v30 = vadd.f32 %v3116_v20, %v3115_v5  ;;  %v3180_v31 = vrot.slane %v3179_v26, 1  ;;  %v3122_v34 = vrot.slane %v3121_v28, 1  ;;  %v3185_v35 = vadd.f32 %v3184_v29, %v3183_v14 }
 0x4f7   :  { %v5780_v36 = vmul.f32 0.125, %v3117_v30  ;;  %v3181_v39 = vadd.f32 %v3180_v31, %v3179_v26  ;;  %v3123_v41 = vadd.f32 %v3122_v34, %v3121_v28  ;;  %v3186_v42 = vrot.slane %v3185_v35, 1 }
 0x4f9   :  { %v3204_v43 = vmul.f32 0.125, %v3181_v39  ;;  %v3212_v45 = vmul.f32 %v5780_v36, %v5780_v36  ;;  %v5784_v46 = vmul.f32 0.125, %v3123_v41  ;;  %v3187_v49 = vadd.f32 %v3186_v42, %v3185_v35 }
 0x4fb   :  { %v3220_v48 = vsub.f32 %v3204_v43, %v3212_v45  ;;  %v3205_v57 = vmul.f32 0.125, %v3187_v49  ;;  %v3213_v47 = vmul.f32 %v5784_v46, %v5784_v46 }
 0x4fd   :  { %v3228_v59 = vadd.f32 1e-05, %v3220_v48  ;;  %v3221_v0 = vsub.f32 %v3205_v57, %v3213_v47 }
 0x4ff   :  { %v3229_v1 = vadd.f32 1e-05, %v3221_v0  ;;  %5152 = vrsqrt.f32 %v3228_v59 }
 0x501   :  { %5154 = vrsqrt.f32 %v3229_v1 }
 0x50c   :  { %v5153_v7 = vpop.eup %5152 }
 0x50e   :  { %v5155_v19 = vpop.eup %5154 }
 0x50f   :  { %v3250_v2 = vcombine.low %v5153_v7, %v5155_v19 }
 0x526   :  { %v3038_v23 = vpop.f32.mrf.mxu0 }
 0x527   :  { %v3039_v10 = vadd.f32 %v3038_v23, %v1465_v21 }
 0x528   :  { %v3079_v24 = vpop.f32.mrf.mxu1  ;;  %v3040_v11 = vpop.f32.mrf.mxu0 }
 0x529   :  { %v5798_v12 = vadd.f32 %v3079_v24, %v3039_v10  ;;  %v3041_v15 = vadd.f32 %v3040_v11, %v1469_v9 }
 0x52a   :  { %v3081_v16 = vpop.f32.mrf.mxu1  ;;  %v3042_v17 = vpop.f32.mrf.mxu0 }
 0x52b   :  { %v3124_v18 = vrot.slane %v5798_v12, 4  ;;  %v3150_v37 = vmul.f32 %v5798_v12, %v5798_v12  ;;  %v5803_v5 = vadd.f32 %v3081_v16, %v3041_v15 }
 0x52c   :  { %v3083_v6 = vpop.f32.mrf.mxu1  ;;  %v3043_v13 = vpop.f32.mrf.mxu0 }
 0x52d   :  { %v3125_v53 = vadd.f32 %v3124_v18, %v5798_v12  ;;  %v3188_v14 = vrot.slane %v3150_v37, 4  ;;  %v3130_v20 = vrot.slane %v5803_v5, 4  ;;  %v3151_v26 = vmul.f32 %v5803_v5, %v5803_v5 }
 0x52e   :  { %v3084_v28 = vpop.f32.mrf.mxu1 }
 0x52f   :  { %v3126_v29 = vrot.slane %v3125_v53, 2  ;;  %v3189_v30 = vadd.f32 %v3188_v14, %v3150_v37  ;;  %v3131_v31 = vadd.f32 %v3130_v20, %v5803_v5  ;;  %v3194_v34 = vrot.slane %v3151_v26, 4 }
 0x530   :  { %v3272_v14 = vrot.slane %v3250_v2, %v5601_v25  ;;  %v3288_v28 = vrot.slane %v3280_v52, %v5601_v25 }
 0x531   :  { %v3127_v35 = vadd.f32 %v3126_v29, %v3125_v53  ;;  %v3190_v39 = vrot.slane %v3189_v30, 2  ;;  %v3132_v41 = vrot.slane %v3131_v31, 2  ;;  %v3195_v42 = vadd.f32 %v3194_v34, %v3151_v26 }
 0x533   :  { %v3128_v43 = vrot.slane %v3127_v35, 1  ;;  %v3191_v45 = vadd.f32 %v3190_v39, %v3189_v30  ;;  %v3133_v49 = vadd.f32 %v3132_v41, %v3131_v31  ;;  %v3196_v48 = vrot.slane %v3195_v42, 2  ;;  %v3086_v30 = vld [vmem:[#allocation11 + $0x1b] sm:$0xff] }
 0x535   :  { %v3129_v57 = vadd.f32 %v3128_v43, %v3127_v35  ;;  %v3192_v47 = vrot.slane %v3191_v45, 1  ;;  %v3134_v59 = vrot.slane %v3133_v49, 1  ;;  %v3197_v0 = vadd.f32 %v3196_v48, %v3195_v42 }
 0x537   :  { %v3142_v1 = vmul.f32 0.125, %v3129_v57  ;;  %v3193_v7 = vadd.f32 %v3192_v47, %v3191_v45  ;;  %v3135_v19 = vadd.f32 %v3134_v59, %v3133_v49  ;;  %v3198_v21 = vrot.slane %v3197_v0, 1 }
 0x539   :  { %v3206_v9 = vmul.f32 0.125, %v3193_v7  ;;  %v3214_v23 = vmul.f32 %v3142_v1, %v3142_v1  ;;  %v3143_v10 = vmul.f32 0.125, %v3135_v19  ;;  %v3199_v24 = vadd.f32 %v3198_v21, %v3197_v0 }
 0x53b   :  { %v3222_v11 = vsub.f32 %v3206_v9, %v3214_v23  ;;  %v3207_v15 = vmul.f32 0.125, %v3199_v24  ;;  %v3215_v16 = vmul.f32 %v3143_v10, %v3143_v10 }
 0x53d   :  { %v3230_v17 = vadd.f32 1e-05, %v3222_v11  ;;  %v3223_v18 = vsub.f32 %v3207_v15, %v3215_v16  ;;  %v3087_v15 = vld [vmem:[#allocation11 + $0x23] sm:$0xff] }
 0x53f   :  { %v3231_v37 = vadd.f32 1e-05, %v3223_v18  ;;  %5156 = vrsqrt.f32 %v3230_v17 }
 0x541   :  { %5158 = vrsqrt.f32 %v3231_v37 }
 0x54c   :  { %v5157_v6 = vpop.eup %5156 }
 0x54e   :  { %v5159_v13 = vpop.eup %5158 }
 0x54f   :  { %v3251_v53 = vcombine.low %v5157_v6, %v5159_v13 }
 0x551   :  { %v3279_v20 = vrot.slane %v3251_v53, %v5601_v25 }
 0x553   :  { %v3281_v26 = vcombine.low %v3272_v14, %v3279_v20 }
 0x555   :  { %v3295_v29 = vrot.slane %v3281_v26, %v5601_v25 }
 0x557   :  { %v3296_v31 = vcombine.low %v3288_v28, %v3295_v29 }
 0x559   :  { %v3298_v34 = vmul.f32 %v3296_v31, %v3086_v30 }
 0x55b   :  { %v3303_v35 = vrot.slane %v3298_v34, %v5587_v38  ;;  %v3307_v39 = vrot.slane %v3298_v34, %v5590_v40  ;;  %v3311_v41 = vrot.slane %v3298_v34, %v5617_v61  ;;  %v3315_v2 = vrot.slane %v3298_v34, %v5620_v63 }
 0x55c   :  { %v3319_v42 = vrot.slane %v3298_v34, %v5759_v55  ;;  %v3323_v43 = vrot.slane %v3298_v34, %v5762_v56  ;;  %v3327_v50 = vrot.slane %v3298_v34, %v5789_v58  ;;  %v3331_v51 = vrot.slane %v3298_v34, %v5792_v4 }
 0x55d   :  { %v3340_v52 = vmul.f32 %v3303_v35, %v5718_v27  ;;  %v3341_v45 = vmul.f32 %v3307_v39, %v5722_v33  ;;  %v3342_v49 = vmul.f32 %v3311_v41, %v5742_v22  ;;  %v3343_v48 = vmul.f32 %v3315_v2, %v5746_v32 }
 0x55e   :  { %v3344_v57 = vmul.f32 %v3319_v42, %v5780_v36  ;;  %v3345_v47 = vmul.f32 %v3323_v43, %v5784_v46  ;;  %v3346_v59 = vmul.f32 %v3327_v50, %v3142_v1  ;;  %v3347_v0 = vmul.f32 %v3331_v51, %v3143_v10 }
 0x55f   :  { %v3356_v7 = vcombine.low %v3340_v52, %v3341_v45  ;;  %v3357_v19 = vcombine.low %v3342_v49, %v3343_v48  ;;  %v3407_v21 = vmul.f32 %v3303_v35, %v5706_v60  ;;  %v3408_v9 = vmul.f32 %v3307_v39, %v5711_v8 }
 0x560   :  { %v3358_v23 = vcombine.low %v3344_v57, %v3345_v47  ;;  %v3359_v27 = vcombine.low %v3346_v59, %v3347_v0  ;;  %v3409_v33 = vmul.f32 %v3311_v41, %v5730_v44  ;;  %v3410_v22 = vmul.f32 %v3315_v2, %v5735_v3 }
 0x561   :  { %v3366_v32 = vrot.slane %v3356_v7, %v5601_v25  ;;  %v3373_v36 = vrot.slane %v3357_v19, %v5601_v25  ;;  %v3411_v46 = vmul.f32 %v3319_v42, %v5768_v54  ;;  %v3412_v1 = vmul.f32 %v3323_v43, %v5773_v62 }
 0x562   :  { %v3380_v10 = vrot.slane %v3358_v23, %v5601_v25  ;;  %v3387_v60 = vrot.slane %v3359_v27, %v5601_v25  ;;  %v3413_v17 = vmul.f32 %v3327_v50, %v5798_v12  ;;  %v3414_v18 = vmul.f32 %v3331_v51, %v5803_v5 }
 0x563   :  { %v3388_v24 = vcombine.low %v3366_v32, %v3373_v36 }
 0x564   :  { %v3389_v8 = vcombine.low %v3380_v10, %v3387_v60 }
 0x565   :  { %v3396_v11 = vrot.slane %v3388_v24, %v5601_v25 }
 0x566   :  { %v3403_v44 = vrot.slane %v3389_v8, %v5601_v25 }
 0x568   :  { %v3404_v3 = vcombine.low %v3396_v11, %v3403_v44 }
 0x56a   :  { %v3406_v16 = vsub.f32 %v3087_v15, %v3404_v3 }
 0x56c   :  { %v3419_v54 = vrot.slane %v3406_v16, %v5587_v38  ;;  %v3423_v62 = vrot.slane %v3406_v16, %v5590_v40  ;;  %v3427_v37 = vrot.slane %v3406_v16, %v5617_v61  ;;  %v3431_v6 = vrot.slane %v3406_v16, %v5620_v63 }
 0x56d   :  { %v3435_v13 = vrot.slane %v3406_v16, %v5759_v55  ;;  %v3439_v53 = vrot.slane %v3406_v16, %v5762_v56  ;;  %v3443_v25 = vrot.slane %v3406_v16, %v5789_v58  ;;  %v3447_v14 = vrot.slane %v3406_v16, %v5792_v4 }
 0x56e   :  { %v3456_v20 = vadd.f32 %v3419_v54, %v3407_v21  ;;  %v3457_v12 = vadd.f32 %v3423_v62, %v3408_v9  ;;  %v3458_v26 = vadd.f32 %v3427_v37, %v3409_v33  ;;  %v3459_v5 = vadd.f32 %v3431_v6, %v3410_v22 }
 0x56f   :  { %v3460_v28 = vadd.f32 %v3435_v13, %v3411_v46  ;;  %v3461_v29 = vadd.f32 %v3439_v53, %v3412_v1  ;;  %v3462_v30 = vadd.f32 %v3443_v25, %v3413_v17  ;;  %v3463_v31 = vadd.f32 %v3447_v14, %v3414_v18 }
 0x570   :  { %vm3464_vm8 = vcmp.ge.f32.partialorder %v3456_v20, 0.0  ;;  %vm3465_vm9 = vcmp.ge.f32.partialorder %v3457_v12, 0.0  ;;  %vm3466_vm10 = vcmp.ge.f32.partialorder %v3458_v26, 0.0  ;;  %vm3467_vm11 = vcmp.ge.f32.partialorder %v3459_v5, 0.0 }
 0x571   :  { %vm3468_vm12 = vcmp.ge.f32.partialorder %v3460_v28, 0.0  ;;  %vm3469_vm13 = vcmp.ge.f32.partialorder %v3461_v29, 0.0  ;;  %vm3470_vm14 = vcmp.ge.f32.partialorder %v3462_v30, 0.0  ;;  %vm3471_vm15 = vcmp.ge.f32.partialorder %v3463_v31, 0.0 }
 0x572   :  { %v3472_v61 = vmul.f32 0.2, %v3456_v20  ;;  %v3473_v63 = vmul.f32 0.2, %v3457_v12  ;;  %v3474_v55 = vmul.f32 0.2, %v3458_v26 }
 0x573   :  { %v3475_v56 = vmul.f32 0.2, %v3459_v5  ;;  %v3476_v58 = vmul.f32 0.2, %v3460_v28  ;;  %v3477_v4 = vmul.f32 0.2, %v3461_v29 }
 0x574   :  { %v3478_v34 = vmul.f32 0.2, %v3462_v30  ;;  %v3479_v35 = vmul.f32 0.2, %v3463_v31  ;;  %v5854_v39 = vsel %vm3464_vm8, %v3456_v20, %v3472_v61  ;;  %v3481_v41 = vsel %vm3465_vm9, %v3457_v12, %v3473_v63 }
 0x575   :  { %v5858_v2 = vsel %vm3466_vm10, %v3458_v26, %v3474_v55  ;;  %v3483_v42 = vsel %vm3467_vm11, %v3459_v5, %v3475_v56  ;;  %v5862_v43 = vsel %vm3468_vm12, %v3460_v28, %v3476_v58  ;;  %v5865_v50 = vsel %vm3469_vm13, %v3461_v29, %v3477_v4 }
 0x576   :  { %v5868_v51 = vsel %vm3470_vm14, %v3462_v30, %v3478_v34  ;;  %v5871_v52 = vsel %vm3471_vm15, %v3463_v31, %v3479_v35 }
 0x577   :  { %5504 = dma.done.wait [#allocation5 + $0x2], 16384 }
 0x578   :  { %5505 = vsyncadd [#allocation5 + $0x2], 4294950912  ;;  %v3621_v45 = vpack.c.bf16 %v3481_v41, %v3481_v41  ;;  %v3623_v49 = vpack.c.bf16 %v3483_v42, %v3483_v42  ;;  %v5160_v48 = vld [vmem:[#allocation4 + $0x74] ss:$8 sps:$4 sm:$0xff]   ;;  %v5164_v47 = vld [vmem:[#allocation4 + $0x70] ss:$8 sps:$4 sm:$0xff]  }
 0x579   :  { %v5162_v57 = vld [vmem:[#allocation4 + $0x174] ss:$8 sps:$4 sm:$0xff]   ;;  %4280 = vmatprep.subr.bf16.mxu0 %v5160_v48  ;;  %v5165_v59 = vld [vmem:[#allocation4 + $0x170] ss:$8 sps:$4 sm:$0xff]   ;;  %v5166_v0 = vld [vmem:[#allocation4 + $0x64] ss:$8 sps:$4 sm:$0xff]  }
 0x57a   :  { %4312 = vmatprep.mubr.bf16.mxu0 %v3621_v45  ;;  %4353 = vmatprep.mubr.bf16.mxu1 %v3623_v49  ;;  %v5168_v7 = vld [vmem:[#allocation4 + $0x164] ss:$8 sps:$4 sm:$0xff]   ;;  %v5170_v19 = vld [vmem:[#allocation4 + $0x60] ss:$8 sps:$4 sm:$0xff]   ;;  %v5172_v9 = vld [vmem:[#allocation4 + $0x54] ss:$8 sps:$4 sm:$0xff]  }
 0x57b   :  { %4321 = vmatprep.subr.bf16.mxu1 %v5162_v57  ;;  %4281 = vmatpush1.bf16.msra.mxu0 %v5164_v47  ;;  %v5171_v21 = vld [vmem:[#allocation4 + $0x160] ss:$8 sps:$4 sm:$0xff]   ;;  %v5174_v23 = vld [vmem:[#allocation4 + $0x154] ss:$8 sps:$4 sm:$0xff]   ;;  %v5176_v27 = vld [vmem:[#allocation4 + $0x50] ss:$8 sps:$4 sm:$0xff]  }
 0x57c   :  { %4322 = vmatpush1.bf16.msra.mxu1 %v5165_v59  ;;  %4282 = vmatprep.subr.bf16.mxu0 %v5166_v0  ;;  %v5177_v33 = vld [vmem:[#allocation4 + $0x150] ss:$8 sps:$4 sm:$0xff]   ;;  %v5178_v22 = vld [vmem:[#allocation4 + $0x44] ss:$8 sps:$4 sm:$0xff]   ;;  %v5182_v36 = vld [vmem:[#allocation4 + $0x40] ss:$8 sps:$4 sm:$0xff]  }
 0x57d   :  { %4323 = vmatprep.subr.bf16.mxu1 %v5168_v7  ;;  %v5180_v32 = vld [vmem:[#allocation4 + $0x144] ss:$8 sps:$4 sm:$0xff]   ;;  %v5183_v46 = vld [vmem:[#allocation4 + $0x140] ss:$8 sps:$4 sm:$0xff]   ;;  %v5184_v1 = vld [vmem:[#allocation4 + $0x34] ss:$8 sps:$4 sm:$0xff]  }
 0x57e   :  { %v5186_v10 = vld [vmem:[#allocation4 + $0x134] ss:$8 sps:$4 sm:$0xff]   ;;  %v5188_v60 = vld [vmem:[#allocation4 + $0x30] ss:$8 sps:$4 sm:$0xff]   ;;  %v5190_v8 = vld [vmem:[#allocation4 + $0x24] ss:$8 sps:$4 sm:$0xff]  }
 0x57f   :  { %4283 = vmatpush1.bf16.msra.mxu0 %v5170_v19  ;;  %v5189_v24 = vld [vmem:[#allocation4 + $0x130] ss:$8 sps:$4 sm:$0xff]   ;;  %v5192_v11 = vld [vmem:[#allocation4 + $0x124] ss:$8 sps:$4 sm:$0xff]   ;;  %v5194_v44 = vld [vmem:[#allocation4 + $0x20] ss:$8 sps:$4 sm:$0xff]  }
 0x580   :  { %4324 = vmatpush1.bf16.msra.mxu1 %v5171_v21  ;;  %4284 = vmatprep.subr.bf16.mxu0 %v5172_v9  ;;  %v5195_v15 = vld [vmem:[#allocation4 + $0x120] ss:$8 sps:$4 sm:$0xff]   ;;  %v5196_v3 = vld [vmem:[#allocation4 + $0x14] ss:$8 sps:$4 sm:$0xff]   ;;  %v5200_v17 = vld [vmem:[#allocation4 + $0x10] ss:$8 sps:$4 sm:$0xff]  }
 0x581   :  { %4325 = vmatprep.subr.bf16.mxu1 %v5174_v23  ;;  %v5198_v16 = vld [vmem:[#allocation4 + $0x114] ss:$8 sps:$4 sm:$0xff]   ;;  %v5201_v18 = vld [vmem:[#allocation4 + $0x110] ss:$8 sps:$4 sm:$0xff]   ;;  %v5202_v54 = vld [vmem:[#allocation4 + $0x4] ss:$8 sps:$4 sm:$0xff]  }
 0x582   :  { %v5204_v62 = vld [vmem:[#allocation4 + $0x104] ss:$8 sps:$4 sm:$0xff]   ;;  %v5206_v37 = vld [vmem:[#allocation4] ss:$8 sps:$4 sm:$0xff]   ;;  %v5208_v13 = vld [vmem:[#allocation4 + $0xf4] ss:$8 sps:$4 sm:$0xff]  }
 0x583   :  { %4285 = vmatpush1.bf16.msra.mxu0 %v5176_v27  ;;  %v5207_v6 = vld [vmem:[#allocation4 + $0x100] ss:$8 sps:$4 sm:$0xff]   ;;  %v5210_v53 = vld [vmem:[#allocation4 + $0x1f4] ss:$8 sps:$4 sm:$0xff]   ;;  %v5212_v25 = vld [vmem:[#allocation4 + $0xf0] ss:$8 sps:$4 sm:$0xff]   ;;  %v3620_v27 = vpack.c.bf16 %v5854_v39, %v5854_v39 }
 0x584   :  { %4326 = vmatpush1.bf16.msra.mxu1 %v5177_v33  ;;  %4286 = vmatprep.subr.bf16.mxu0 %v5178_v22  ;;  %v5213_v14 = vld [vmem:[#allocation4 + $0x1f0] ss:$8 sps:$4 sm:$0xff]   ;;  %v5214_v20 = vld [vmem:[#allocation4 + $0xe4] ss:$8 sps:$4 sm:$0xff]   ;;  %v5218_v26 = vld [vmem:[#allocation4 + $0xe0] ss:$8 sps:$4 sm:$0xff]   ;;  %v3622_v33 = vpack.c.bf16 %v5858_v2, %v5858_v2 }
 0x585   :  { %4327 = vmatprep.subr.bf16.mxu1 %v5180_v32  ;;  %v5216_v12 = vld [vmem:[#allocation4 + $0x1e4] ss:$8 sps:$4 sm:$0xff]   ;;  %v5219_v5 = vld [vmem:[#allocation4 + $0x1e0] ss:$8 sps:$4 sm:$0xff]   ;;  %v5220_v28 = vld [vmem:[#allocation4 + $0xd4] ss:$8 sps:$4 sm:$0xff]  }
 0x586   :  { %v5222_v29 = vld [vmem:[#allocation4 + $0x1d4] ss:$8 sps:$4 sm:$0xff]   ;;  %v5224_v30 = vld [vmem:[#allocation4 + $0xd0] ss:$8 sps:$4 sm:$0xff]   ;;  %v5226_v61 = vld [vmem:[#allocation4 + $0xc4] ss:$8 sps:$4 sm:$0xff]  }
 0x587   :  { %4287 = vmatpush1.bf16.msra.mxu0 %v5182_v36  ;;  %v5225_v31 = vld [vmem:[#allocation4 + $0x1d0] ss:$8 sps:$4 sm:$0xff]   ;;  %v5228_v63 = vld [vmem:[#allocation4 + $0x1c4] ss:$8 sps:$4 sm:$0xff]   ;;  %v5230_v55 = vld [vmem:[#allocation4 + $0xc0] ss:$8 sps:$4 sm:$0xff]  }
 0x588   :  { %4328 = vmatpush1.bf16.msra.mxu1 %v5183_v46  ;;  %4288 = vmatprep.subr.bf16.mxu0 %v5184_v1  ;;  %v5231_v56 = vld [vmem:[#allocation4 + $0x1c0] ss:$8 sps:$4 sm:$0xff]   ;;  %v5232_v58 = vld [vmem:[#allocation4 + $0xb4] ss:$8 sps:$4 sm:$0xff]   ;;  %v5236_v34 = vld [vmem:[#allocation4 + $0xb0] ss:$8 sps:$4 sm:$0xff]   ;;  %v3625_v1 = vpack.c.bf16 %v5865_v50, %v5865_v50 }
 0x589   :  { %4329 = vmatprep.subr.bf16.mxu1 %v5186_v10  ;;  %v5234_v4 = vld [vmem:[#allocation4 + $0x1b4] ss:$8 sps:$4 sm:$0xff]   ;;  %v5237_v35 = vld [vmem:[#allocation4 + $0x1b0] ss:$8 sps:$4 sm:$0xff]   ;;  %v5238_v41 = vld [vmem:[#allocation4 + $0xa4] ss:$8 sps:$4 sm:$0xff]   ;;  %v3627_v10 = vpack.c.bf16 %v5871_v52, %v5871_v52 }
 0x58a   :  { %v5240_v42 = vld [vmem:[#allocation4 + $0x1a4] ss:$8 sps:$4 sm:$0xff]   ;;  %v5242_v45 = vld [vmem:[#allocation4 + $0xa0] ss:$8 sps:$4 sm:$0xff]   ;;  %v5244_v48 = vld [vmem:[#allocation4 + $0x94] ss:$8 sps:$4 sm:$0xff]  }
 0x58b   :  { %4289 = vmatpush1.bf16.msra.mxu0 %v5188_v60  ;;  %v5243_v49 = vld [vmem:[#allocation4 + $0x1a0] ss:$8 sps:$4 sm:$0xff]   ;;  %v5246_v57 = vld [vmem:[#allocation4 + $0x194] ss:$8 sps:$4 sm:$0xff]   ;;  %v5248_v47 = vld [vmem:[#allocation4 + $0x90] ss:$8 sps:$4 sm:$0xff]  }
 0x58c   :  { %4330 = vmatpush1.bf16.msra.mxu1 %v5189_v24  ;;  %4290 = vmatprep.subr.bf16.mxu0 %v5190_v8  ;;  %v5249_v59 = vld [vmem:[#allocation4 + $0x190] ss:$8 sps:$4 sm:$0xff]   ;;  %v5250_v0 = vld [vmem:[#allocation4 + $0x84] ss:$8 sps:$4 sm:$0xff]   ;;  %v5254_v19 = vld [vmem:[#allocation4 + $0x80] ss:$8 sps:$4 sm:$0xff]  }
 0x58d   :  { %4331 = vmatprep.subr.bf16.mxu1 %v5192_v11  ;;  %v5252_v7 = vld [vmem:[#allocation4 + $0x184] ss:$8 sps:$4 sm:$0xff]   ;;  %v5255_v21 = vld [vmem:[#allocation4 + $0x180] ss:$8 sps:$4 sm:$0xff]   ;;  %v5258_v9 = vld [vmem:[#allocation4 + $0x274] ss:$8 sps:$4 sm:$0xff]  }
 0x58e   :  { %v5261_v23 = vld [vmem:[#allocation4 + $0x374] ss:$8 sps:$4 sm:$0xff]   ;;  %v5256_v22 = vld [vmem:[#allocation4 + $0x270] ss:$8 sps:$4 sm:$0xff]   ;;  %v5264_v36 = vld [vmem:[#allocation4 + $0x264] ss:$8 sps:$4 sm:$0xff]  }
 0x58f   :  { %4291 = vmatpush1.bf16.msra.mxu0 %v5194_v44  ;;  %v5259_v32 = vld [vmem:[#allocation4 + $0x370] ss:$8 sps:$4 sm:$0xff]   ;;  %v5267_v46 = vld [vmem:[#allocation4 + $0x364] ss:$8 sps:$4 sm:$0xff]   ;;  %v5262_v39 = vld [vmem:[#allocation4 + $0x260] ss:$8 sps:$4 sm:$0xff]  }
 0x590   :  { %4332 = vmatpush1.bf16.msra.mxu1 %v5195_v15  ;;  %4292 = vmatprep.subr.bf16.mxu0 %v5196_v3  ;;  %v5265_v60 = vld [vmem:[#allocation4 + $0x360] ss:$8 sps:$4 sm:$0xff]   ;;  %v5270_v2 = vld [vmem:[#allocation4 + $0x254] ss:$8 sps:$4 sm:$0xff]   ;;  %v5268_v8 = vld [vmem:[#allocation4 + $0x250] ss:$8 sps:$4 sm:$0xff]  }
 0x591   :  { %4333 = vmatprep.subr.bf16.mxu1 %v5198_v16  ;;  %v5273_v24 = vld [vmem:[#allocation4 + $0x354] ss:$8 sps:$4 sm:$0xff]   ;;  %v5271_v11 = vld [vmem:[#allocation4 + $0x350] ss:$8 sps:$4 sm:$0xff]   ;;  %v5276_v50 = vld [vmem:[#allocation4 + $0x244] ss:$8 sps:$4 sm:$0xff]  }
 0x592   :  { %v5279_v52 = vld [vmem:[#allocation4 + $0x344] ss:$8 sps:$4 sm:$0xff]   ;;  %v5274_v44 = vld [vmem:[#allocation4 + $0x240] ss:$8 sps:$4 sm:$0xff]   ;;  %v5282_v3 = vld [vmem:[#allocation4 + $0x234] ss:$8 sps:$4 sm:$0xff]  }
 0x593   :  { %4293 = vmatpush1.bf16.msra.mxu0 %v5200_v17  ;;  %v5277_v15 = vld [vmem:[#allocation4 + $0x340] ss:$8 sps:$4 sm:$0xff]   ;;  %v5285_v16 = vld [vmem:[#allocation4 + $0x334] ss:$8 sps:$4 sm:$0xff]   ;;  %v5280_v17 = vld [vmem:[#allocation4 + $0x230] ss:$8 sps:$4 sm:$0xff]  }
 0x594   :  { %4334 = vmatpush1.bf16.msra.mxu1 %v5201_v18  ;;  %4294 = vmatprep.subr.bf16.mxu0 %v5202_v54  ;;  %v5283_v18 = vld [vmem:[#allocation4 + $0x330] ss:$8 sps:$4 sm:$0xff]   ;;  %v5288_v54 = vld [vmem:[#allocation4 + $0x224] ss:$8 sps:$4 sm:$0xff]   ;;  %s5522_s4 = smov [#allocation12]  }
 0x595   :  { %4335 = vmatprep.subr.bf16.mxu1 %v5204_v62  ;;  %v5291_v62 = vld [vmem:[#allocation4 + $0x324] ss:$8 sps:$4 sm:$0xff]   ;;  %s4454_s5 = sshll.u32 %s5522_s4, 4  ;;  %s4455_s5 = int_to_ptr.vmem [resolvable:$true] %s4454_s5 }
 0x596   :  { %s5476_s10 = scalar_lea.vmem %s4455_s5, 256  ;;  %p5481_p3 = scmp.lt.s32.totalorder %s4455_s5, %s4455_s5 }
 0x597   :  { %4295 = vmatpush1.bf16.msra.mxu0 %v5206_v37  ;;  %v5286_v37 = vld [vmem:[#allocation4 + $0x220] ss:$8 sps:$4 sm:$0xff]   ;;  %p5477_p2 = scmp.ne.s32.totalorder %s4455_s5, %s5476_s10  ;;  %p5482_p4 = scmp.lt.s32.totalorder %s5476_s10, %s5476_s10 }
 0x598   :  { %4336 = vmatpush1.bf16.msra.mxu1 %v5207_v6  ;;  %4296 = vmatprep.subr.bf16.mxu0 %v5208_v13  ;;  %v5289_v6 = vld [vmem:[#allocation4 + $0x320] ss:$8 sps:$4 sm:$0xff]   ;;  %v5294_v13 = vld [vmem:[#allocation4 + $0x214] ss:$8 sps:$4 sm:$0xff]  }
 0x599   :  { %4337 = vmatprep.subr.bf16.mxu1 %v5210_v53  ;;  %v5297_v53 = vld [vmem:[#allocation4 + $0x314] ss:$8 sps:$4 sm:$0xff]   ;;  %p5483_p5 = por %p5482_p4, %p5481_p3 }
 0x59b   :  { %4297 = vmatpush2.bf16.msra.mxu0 %v5212_v25  ;;  %v5292_v25 = vld [vmem:[#allocation4 + $0x210] ss:$8 sps:$4 sm:$0xff]   ;;  %p5484_p6 = pnand %p5483_p5, %p5477_p2 }
 0x59c   :  { %4338 = vmatpush2.bf16.msra.mxu1 %v5213_v14  ;;  %4298 = vmatprep.subr.bf16.mxu0 %v5214_v20  ;;  %v5295_v14 = vld [vmem:[#allocation4 + $0x310] ss:$8 sps:$4 sm:$0xff]   ;;  %v5300_v20 = vld [vmem:[#allocation4 + $0x204] ss:$8 sps:$4 sm:$0xff]  }
 0x59d   :  { %4339 = vmatprep.subr.bf16.mxu1 %v5216_v12  ;;  %v5303_v12 = vld [vmem:[#allocation4 + $0x304] ss:$8 sps:$4 sm:$0xff]  }
 0x59f   :  { %4299 = vmatpush2.bf16.msra.mxu0 %v5218_v26  ;;  %v5298_v26 = vld [vmem:[#allocation4 + $0x200] ss:$8 sps:$4 sm:$0xff]  }
 0x5a0   :  { %4340 = vmatpush2.bf16.msra.mxu1 %v5219_v5  ;;  %4300 = vmatprep.subr.bf16.mxu0 %v5220_v28  ;;  %v5301_v5 = vld [vmem:[#allocation4 + $0x300] ss:$8 sps:$4 sm:$0xff]   ;;  %v5306_v28 = vld [vmem:[#allocation4 + $0x2f4] ss:$8 sps:$4 sm:$0xff]  }
 0x5a1   :  { %4341 = vmatprep.subr.bf16.mxu1 %v5222_v29  ;;  %v5309_v29 = vld [vmem:[#allocation4 + $0x3f4] ss:$8 sps:$4 sm:$0xff]  }
 0x5a3   :  { %4301 = vmatpush2.bf16.msra.mxu0 %v5224_v30  ;;  %v5304_v30 = vld [vmem:[#allocation4 + $0x2f0] ss:$8 sps:$4 sm:$0xff]  }
 0x5a4   :  { %4342 = vmatpush2.bf16.msra.mxu1 %v5225_v31  ;;  %4302 = vmatprep.subr.bf16.mxu0 %v5226_v61  ;;  %v5307_v31 = vld [vmem:[#allocation4 + $0x3f0] ss:$8 sps:$4 sm:$0xff]   ;;  %v5312_v61 = vld [vmem:[#allocation4 + $0x2e4] ss:$8 sps:$4 sm:$0xff]  }
 0x5a5   :  { %4343 = vmatprep.subr.bf16.mxu1 %v5228_v63  ;;  %v5315_v63 = vld [vmem:[#allocation4 + $0x3e4] ss:$8 sps:$4 sm:$0xff]  }
 0x5a7   :  { %4303 = vmatpush2.bf16.msra.mxu0 %v5230_v55  ;;  %v5310_v55 = vld [vmem:[#allocation4 + $0x2e0] ss:$8 sps:$4 sm:$0xff]  }
 0x5a8   :  { %4344 = vmatpush2.bf16.msra.mxu1 %v5231_v56  ;;  %4304 = vmatprep.subr.bf16.mxu0 %v5232_v58  ;;  %v5313_v56 = vld [vmem:[#allocation4 + $0x3e0] ss:$8 sps:$4 sm:$0xff]   ;;  %v5318_v58 = vld [vmem:[#allocation4 + $0x2d4] ss:$8 sps:$4 sm:$0xff]  }
 0x5a9   :  { %4345 = vmatprep.subr.bf16.mxu1 %v5234_v4  ;;  %v5321_v4 = vld [vmem:[#allocation4 + $0x3d4] ss:$8 sps:$4 sm:$0xff]  }
 0x5ab   :  { %4305 = vmatpush2.bf16.msra.mxu0 %v5236_v34  ;;  %v5316_v34 = vld [vmem:[#allocation4 + $0x2d0] ss:$8 sps:$4 sm:$0xff]  }
 0x5ac   :  { %4346 = vmatpush2.bf16.msra.mxu1 %v5237_v35  ;;  %4306 = vmatprep.subr.bf16.mxu0 %v5238_v41  ;;  %v5319_v35 = vld [vmem:[#allocation4 + $0x3d0] ss:$8 sps:$4 sm:$0xff]   ;;  %v5324_v41 = vld [vmem:[#allocation4 + $0x2c4] ss:$8 sps:$4 sm:$0xff]  }
 0x5ad   :  { %4347 = vmatprep.subr.bf16.mxu1 %v5240_v42  ;;  %v5327_v42 = vld [vmem:[#allocation4 + $0x3c4] ss:$8 sps:$4 sm:$0xff]  }
 0x5af   :  { %4307 = vmatpush2.bf16.msra.mxu0 %v5242_v45  ;;  %v5322_v45 = vld [vmem:[#allocation4 + $0x2c0] ss:$8 sps:$4 sm:$0xff]  }
 0x5b0   :  { %4348 = vmatpush2.bf16.msra.mxu1 %v5243_v49  ;;  %4308 = vmatprep.subr.bf16.mxu0 %v5244_v48  ;;  %v5325_v49 = vld [vmem:[#allocation4 + $0x3c0] ss:$8 sps:$4 sm:$0xff]   ;;  %v5330_v48 = vld [vmem:[#allocation4 + $0x2b4] ss:$8 sps:$4 sm:$0xff]  }
 0x5b1   :  { %4349 = vmatprep.subr.bf16.mxu1 %v5246_v57  ;;  %v5333_v57 = vld [vmem:[#allocation4 + $0x3b4] ss:$8 sps:$4 sm:$0xff]  }
 0x5b3   :  { %4309 = vmatpush2.bf16.msra.mxu0 %v5248_v47  ;;  %v5328_v47 = vld [vmem:[#allocation4 + $0x2b0] ss:$8 sps:$4 sm:$0xff]  }
 0x5b4   :  { %4350 = vmatpush2.bf16.msra.mxu1 %v5249_v59  ;;  %4310 = vmatprep.subr.bf16.mxu0 %v5250_v0  ;;  %v5331_v59 = vld [vmem:[#allocation4 + $0x3b0] ss:$8 sps:$4 sm:$0xff]   ;;  %v5336_v0 = vld [vmem:[#allocation4 + $0x2a4] ss:$8 sps:$4 sm:$0xff]  }
 0x5b5   :  { %4351 = vmatprep.subr.bf16.mxu1 %v5252_v7  ;;  %v5339_v7 = vld [vmem:[#allocation4 + $0x3a4] ss:$8 sps:$4 sm:$0xff]  }
 0x5b7   :  { %4311 = vmatpush2.bf16.msra.mxu0 %v5254_v19  ;;  %v5334_v19 = vld [vmem:[#allocation4 + $0x2a0] ss:$8 sps:$4 sm:$0xff]  }
 0x5b8   :  { %4352 = vmatpush2.bf16.msra.mxu1 %v5255_v21  ;;  %4362 = vmatprep.subr.bf16.mxu0 %v5258_v9  ;;  %v5337_v21 = vld [vmem:[#allocation4 + $0x3a0] ss:$8 sps:$4 sm:$0xff]   ;;  %v5342_v9 = vld [vmem:[#allocation4 + $0x294] ss:$8 sps:$4 sm:$0xff]  }
 0x5b9   :  { %4403 = vmatprep.subr.bf16.mxu1 %v5261_v23  ;;  %v5345_v23 = vld [vmem:[#allocation4 + $0x394] ss:$8 sps:$4 sm:$0xff]  }
 0x5ba   :  { %4313 = vmatmul.mubr.bf16.vlgmr.msra.gmra.mxu0 %v3620_v27  ;;  %v5340_v27 = vld [vmem:[#allocation4 + $0x290] ss:$8 sps:$4 sm:$0xff]  }
 0x5bb   :  { %4354 = vmatmul.mubr.bf16.vlgmr.msra.gmra.mxu1 %v3622_v33  ;;  %4363 = vmatpush1.bf16.msra.mxu0 %v5256_v22  ;;  %v5343_v33 = vld [vmem:[#allocation4 + $0x390] ss:$8 sps:$4 sm:$0xff]   ;;  %v5348_v22 = vld [vmem:[#allocation4 + $0x284] ss:$8 sps:$4 sm:$0xff]  }
 0x5bc   :  { %4404 = vmatpush1.bf16.msra.mxu1 %v5259_v32  ;;  %4364 = vmatprep.subr.bf16.mxu0 %v5264_v36  ;;  %v5351_v32 = vld [vmem:[#allocation4 + $0x384] ss:$8 sps:$4 sm:$0xff]   ;;  %v5346_v36 = vld [vmem:[#allocation4 + $0x280] ss:$8 sps:$4 sm:$0xff]  }
 0x5bd   :  { %4405 = vmatprep.subr.bf16.mxu1 %v5267_v46  ;;  %4394 = vmatprep.mubr.bf16.mxu0 %v3625_v1  ;;  %v5349_v46 = vld [vmem:[#allocation4 + $0x380] ss:$8 sps:$4 sm:$0xff]   ;;  %v3624_v1 = vpack.c.bf16 %v5862_v43, %v5862_v43 }
 0x5be   :  { %4435 = vmatprep.mubr.bf16.mxu1 %v3627_v10  ;;  %v3626_v10 = vpack.c.bf16 %v5868_v51, %v5868_v51 }
 0x5bf   :  { %4365 = vmatpush1.bf16.msra.mxu0 %v5262_v39 }
 0x5c0   :  { %4406 = vmatpush1.bf16.msra.mxu1 %v5265_v60  ;;  %4366 = vmatprep.subr.bf16.mxu0 %v5270_v2 }
 0x5c1   :  { %4407 = vmatprep.subr.bf16.mxu1 %v5273_v24 }
 0x5c3   :  { %4367 = vmatpush1.bf16.msra.mxu0 %v5268_v8 }
 0x5c4   :  { %4408 = vmatpush1.bf16.msra.mxu1 %v5271_v11  ;;  %4368 = vmatprep.subr.bf16.mxu0 %v5276_v50 }
 0x5c5   :  { %4409 = vmatprep.subr.bf16.mxu1 %v5279_v52 }
 0x5c7   :  { %4369 = vmatpush1.bf16.msra.mxu0 %v5274_v44  ;;  %v3628_v44 = vld [vmem:[#allocation11 + $0x2b] sm:$0x3] }
 0x5c8   :  { %4410 = vmatpush1.bf16.msra.mxu1 %v5277_v15  ;;  %4370 = vmatprep.subr.bf16.mxu0 %v5282_v3  ;;  %v3633_v15 = vrot.slane %v3628_v44, %v5587_v38  ;;  %v3637_v43 = vrot.slane %v3628_v44, %v5590_v40 }
 0x5c9   :  { %4411 = vmatprep.subr.bf16.mxu1 %v5285_v16 }
 0x5cb   :  { %4371 = vmatpush1.bf16.msra.mxu0 %v5280_v17 }
 0x5cc   :  { %4412 = vmatpush1.bf16.msra.mxu1 %v5283_v18  ;;  %4372 = vmatprep.subr.bf16.mxu0 %v5288_v54 }
 0x5cd   :  { %4413 = vmatprep.subr.bf16.mxu1 %v5291_v62 }
 0x5cf   :  { %4373 = vmatpush1.bf16.msra.mxu0 %v5286_v37 }
 0x5d0   :  { %4414 = vmatpush1.bf16.msra.mxu1 %v5289_v6  ;;  %4374 = vmatprep.subr.bf16.mxu0 %v5294_v13 }
 0x5d1   :  { %4415 = vmatprep.subr.bf16.mxu1 %v5297_v53 }
 0x5d3   :  { %4375 = vmatpush1.bf16.msra.mxu0 %v5292_v25 }
 0x5d4   :  { %4416 = vmatpush1.bf16.msra.mxu1 %v5295_v14  ;;  %4376 = vmatprep.subr.bf16.mxu0 %v5300_v20 }
 0x5d5   :  { %4417 = vmatprep.subr.bf16.mxu1 %v5303_v12 }
 0x5d7   :  { %4377 = vmatpush1.bf16.msra.mxu0 %v5298_v26 }
 0x5d8   :  { %4418 = vmatpush1.bf16.msra.mxu1 %v5301_v5  ;;  %4378 = vmatprep.subr.bf16.mxu0 %v5306_v28 }
 0x5d9   :  { %4419 = vmatprep.subr.bf16.mxu1 %v5309_v29 }
 0x5db   :  { %4379 = vmatpush2.bf16.msra.mxu0 %v5304_v30 }
 0x5dc   :  { %4420 = vmatpush2.bf16.msra.mxu1 %v5307_v31  ;;  %4380 = vmatprep.subr.bf16.mxu0 %v5312_v61 }
 0x5dd   :  { %4421 = vmatprep.subr.bf16.mxu1 %v5315_v63 }
 0x5df   :  { %4381 = vmatpush2.bf16.msra.mxu0 %v5310_v55 }
 0x5e0   :  { %4422 = vmatpush2.bf16.msra.mxu1 %v5313_v56  ;;  %4382 = vmatprep.subr.bf16.mxu0 %v5318_v58 }
 0x5e1   :  { %4423 = vmatprep.subr.bf16.mxu1 %v5321_v4 }
 0x5e3   :  { %4383 = vmatpush2.bf16.msra.mxu0 %v5316_v34 }
 0x5e4   :  { %4424 = vmatpush2.bf16.msra.mxu1 %v5319_v35  ;;  %4384 = vmatprep.subr.bf16.mxu0 %v5324_v41 }
 0x5e5   :  { %4425 = vmatprep.subr.bf16.mxu1 %v5327_v42 }
 0x5e7   :  { %4385 = vmatpush2.bf16.msra.mxu0 %v5322_v45 }
 0x5e8   :  { %4426 = vmatpush2.bf16.msra.mxu1 %v5325_v49  ;;  %4386 = vmatprep.subr.bf16.mxu0 %v5330_v48 }
 0x5e9   :  { %4427 = vmatprep.subr.bf16.mxu1 %v5333_v57 }
 0x5eb   :  { %4387 = vmatpush2.bf16.msra.mxu0 %v5328_v47 }
 0x5ec   :  { %4428 = vmatpush2.bf16.msra.mxu1 %v5331_v59  ;;  %4388 = vmatprep.subr.bf16.mxu0 %v5336_v0 }
 0x5ed   :  { %4429 = vmatprep.subr.bf16.mxu1 %v5339_v7 }
 0x5ef   :  { %4389 = vmatpush2.bf16.msra.mxu0 %v5334_v19 }
 0x5f0   :  { %4430 = vmatpush2.bf16.msra.mxu1 %v5337_v21  ;;  %4390 = vmatprep.subr.bf16.mxu0 %v5342_v9 }
 0x5f1   :  { %4431 = vmatprep.subr.bf16.mxu1 %v5345_v23 }
 0x5f3   :  { %4391 = vmatpush2.bf16.msra.mxu0 %v5340_v27 }
 0x5f4   :  { %4432 = vmatpush2.bf16.msra.mxu1 %v5343_v33  ;;  %4392 = vmatprep.subr.bf16.mxu0 %v5348_v22 }
 0x5f5   :  { %4433 = vmatprep.subr.bf16.mxu1 %v5351_v32 }
 0x5f7   :  { %4393 = vmatpush2.bf16.msra.mxu0 %v5346_v36 }
 0x5f8   :  { %4434 = vmatpush2.bf16.msra.mxu1 %v5349_v46 }
 0x5fa   :  { %4395 = vmatmul.mubr.bf16.vlgmr.msra.gmra.mxu0 %v3624_v1 }
 0x5fb   :  { %4436 = vmatmul.mubr.bf16.vlgmr.msra.gmra.mxu1 %v3626_v10 }
 0x67a   :  { %v4314_v39 = vpop.f32.mrf.mxu0 }
 0x67b   :  { %v4355_v60 = vpop.f32.mrf.mxu1  ;;  %v4315_v3 = vadd.f32 %v4314_v39, %v3633_v15 }
 0x67c   :  { %v4316_v2 = vpop.f32.mrf.mxu0 }
 0x67d   :  { %v4357_v24 = vpop.f32.mrf.mxu1  ;;  %v4317_v16 = vadd.f32 %v4316_v2, %v3637_v43  ;;  %v4356_v51 = vadd.f32 %v4355_v60, %v4315_v3 }
 0x67e   :  { %v4318_v8 = vpop.f32.mrf.mxu0 }
 0x67f   :  { %v4359_v11 = vpop.f32.mrf.mxu1  ;;  %v4358_v54 = vadd.f32 %v4357_v24, %v4317_v16 }
 0x680   :  { %v4319_v50 = vpop.f32.mrf.mxu0 }
 0x681   :  { %v4360_v52 = vpop.f32.mrf.mxu1 }
 0x6ba   :  { %v4396_v17 = vpop.f32.mrf.mxu0 }
 0x6bb   :  { %v4437_v18 = vpop.f32.mrf.mxu1  ;;  %v4397_v62 = vadd.f32 %v4396_v17, %v4356_v51 }
 0x6bc   :  { %v4398_v37 = vpop.f32.mrf.mxu0 }
 0x6bd   :  { %v4439_v6 = vpop.f32.mrf.mxu1  ;;  %v4438_v13 = vadd.f32 %v4437_v18, %v4397_v62  ;;  %v4399_v53 = vadd.f32 %v4398_v37, %v4358_v54 }
 0x6be   :  { %v4400_v25 = vpop.f32.mrf.mxu0 }
 0x6bf   :  { %v4441_v14 = vpop.f32.mrf.mxu1  ;;  %5352 = vtanh.f32 %v4438_v13  ;;  %v4440_v20 = vadd.f32 %v4439_v6, %v4399_v53 }
 0x6c0   :  { %v4401_v12 = vpop.f32.mrf.mxu0 }
 0x6c1   :  { %v4442_v26 = vpop.f32.mrf.mxu1  ;;  %5354 = vtanh.f32 %v4440_v20 }
 0x6cc   :  { %v5353_v38 = vpop.eup %5352 }
 0x6cd   :  { %4446 = vst [vmem:[#allocation12] sm:$0xff] %v5353_v38 }
 0x6ce   :  { %v5355_v40 = vpop.eup %5354 }
 0x6cf   :  { %4447 = vst [vmem:[#allocation12 + $0x8] sm:$0xff] %v5355_v40 }
 0x6d0   :  { %5487 = shalt.err (!%p5484_p6)
}
 0x6d1   :  { %4457 = dma.vmem_to_hbm [thread:$0]  %s4455_s5, 256, %s5897_s7, [#allocation8]  }
 0x6d2   :  { %5506 = dma.done.wait [#allocation8], 256  }
 0x6d3   :  { %5507 = vsyncadd [#allocation8], 4294967040 }
 0x6d4   :  { %4461 = vsyncpa [#allocation7], 1 }
 0x6d5   :  { %4462 = vsyncpa [#allocation10], 1 }
 0x6d6   :  { %4463 = vsyncpa [#allocation8], 1 }
 0x6d7   :  { %4464 = vsyncmov [#allocation5] }
 0x6da   :  { %s4465_s13 = vpop.sfrf %4464 }
 0x6db   :  { %p4957_p7 = scmp.ne.s32.totalorder %s4465_s13, 0 }
 0x6dd   :  { %4469 = shalt.err (%p4957_p7)  }
 0x6de   :  { %4471 = vsyncmov [#allocation5 + $0x1] }
 0x6e1   :  { %s4472_s14 = vpop.sfrf %4471 }
 0x6e2   :  { %p4958_p8 = scmp.ne.s32.totalorder %s4472_s14, 0 }
 0x6e4   :  { %4476 = shalt.err (%p4958_p8)  }
 0x6e5   :  { %4478 = vsyncmov [#allocation5 + $0x2] }
 0x6e8   :  { %s4479_s15 = vpop.sfrf %4478 }
 0x6e9   :  { %p4959_p9 = scmp.ne.s32.totalorder %s4479_s15, 0 }
 0x6eb   :  { %4483 = shalt.err (%p4959_p9)  }

</bundles_post_ra>
